<compile_context>
chip_gen: v5e
topology: v5e:2x2
jax: 0.10.0
libtpu: 0.0.40
codegen_flags: <defaults>
</compile_context>

<pallas_src>
import jax
import jax.numpy as jnp
from jax import lax
from jax.experimental import pallas as pl
from jax.experimental.pallas import tpu as pltpu


def _round_up(x, m):
    return (x + m - 1) // m * m


def _tensorcores_per_chip():
    """Crude generation sniff: v7x exposes 2 TensorCores per chip."""
    try:
        kind = jax.devices()[0].device_kind.lower()
        if "v7" in kind:
            return 2
    except Exception:
        pass
    return 1


# ----------------------------------------------------------------------------
# Parameter packing: PyTorch gate-stacked layout -> padded, pre-transposed
# kernel layout.  Gate order (i, f, g, o) preserved; each gate block is
# zero-padded H->Hp (and in_dim->in_pad) so every gate slice in the kernel
# starts on a 128-lane boundary.  Zero padding is exact: padded hidden units
# get zero pre-activations -> g=tanh(0)=0 -> c,h stay 0 and never leak into
# the real units (their W_hh rows are zero too).
# ----------------------------------------------------------------------------
def _pack_gate_weight(w, in_pad, Hp):
    four_h, in_dim = w.shape           # PyTorch: (4H, in_dim)
    H = four_h // 4
    w4 = w.reshape(4, H, in_dim)
    wp = jnp.zeros((4, Hp, in_pad), jnp.float32).at[:, :H, :in_dim].set(w4)
    return wp.transpose(2, 0, 1).reshape(in_pad, 4 * Hp)      # (in_pad, 4*Hp) f32


def _pack_gate_bias(b_ih, b_hh, Hp):
    four_h = b_ih.shape[0]
    H = four_h // 4
    b = (b_ih + b_hh).reshape(4, H)
    bp = jnp.zeros((4, Hp), jnp.float32).at[:, :H].set(b)
    return bp.reshape(1, 4 * Hp)                               # (1, 4*Hp) f32


# ----------------------------------------------------------------------------
# VMEM usage (bytes) for one grid cell, including double-buffered inputs/outputs
# and all scratch.  Used to size the time chunk tc.
# ----------------------------------------------------------------------------
def _vmem_bytes(tc, bt, Ep, Hp):
    bf16, f32 = 2, 4
    total = 0
    total += 2 * tc * bt * Ep * bf16                                  # x chunk (dbl-buf)
    total += 2 * (Ep * 4 * Hp + Hp * 4 * Hp + 2 * Hp * 4 * Hp) * bf16  # weights (dbl-buf)
    total += 2 * 2 * (4 * Hp) * f32                                   # biases (dbl-buf)
    total += 2 * 2 * (2 * bt * Hp) * f32                              # h/c out blocks
    total += 4 * bt * Hp * f32                                        # h/c carries
    total += tc * bt * 4 * Hp * f32                                   # hoisted projection
    return total


# ----------------------------------------------------------------------------
# Fused 2-layer LSTM kernel over one (batch-tile, time-chunk) grid cell.
#   x_ref      : (tc, bt, Ep) bf16 embedded input chunk
#   wih0/whh0  : (Ep,4Hp)/(Hp,4Hp) bf16, b0: (1,4Hp) f32
#   w1         : (2Hp,4Hp) bf16  == concat_rows(W_ih1^T, W_hh1^T), b1: (1,4Hp) f32
#   h_out/c_out: (2, bt, Hp) f32 final hidden/cell states (written at last chunk)
# Scratch:
#   h0/c0/h1/c1: (bt, Hp) f32  recurrent carries across time chunks
#   xg_s       : (tc*bt, 4Hp) f32  hoisted layer-0 input projection
# ----------------------------------------------------------------------------
def _make_kernel(T_total, tc, bt, Hp, needs_mask):
    def kernel(x_ref, wih0_ref, whh0_ref, b0_ref, w1_ref, b1_ref,
               h_out_ref, c_out_ref,
               h0_s, c0_s, h1_s, c1_s, xg_s):

        # Reset recurrent carries at the start of each batch tile's time sweep.
        @pl.when(pl.program_id(1) == 0)
        def _init():
            h0_s[...] = jnp.zeros_like(h0_s)
            c0_s[...] = jnp.zeros_like(c0_s)
            h1_s[...] = jnp.zeros_like(h1_s)
            c1_s[...] = jnp.zeros_like(c1_s)

        # Phase 1 (no recurrent dependency): one big bf16 MXU matmul for the whole
        # chunk's layer-0 input projection, bias folded in once.
        x_flat = x_ref[...].reshape(tc * bt, -1)
        xg_s[...] = (jnp.dot(x_flat, wih0_ref[...],
                             preferred_element_type=jnp.float32)
                     + b0_ref[...])

        # Hoist weight loads and the layer-1 bias broadcast out of the hot loop.
        whh0 = whh0_ref[...]
        w1 = w1_ref[...]
        b1b = jnp.broadcast_to(b1_ref[...], (bt, 4 * Hp))
        t0 = pl.program_id(1) * tc

        def _sig(v):                       # sigmoid via ONE tanh EUP push
            return 0.5 * (1.0 + jnp.tanh(0.5 * v))

        # Phase 2: sequential recurrence, both layers fused per step.
        def step(t, carry):
            h0, c0, h1, c1 = carry
            off = pl.multiple_of(t * bt, 8)            # sublane-aligned load

            # ---- layer 0 ----
            g0 = xg_s[pl.ds(off, bt), :] + jnp.dot(
                h0.astype(jnp.bfloat16), whh0, preferred_element_type=jnp.float32)
            i0 = _sig(g0[:, 0 * Hp:1 * Hp])
            f0 = _sig(g0[:, 1 * Hp:2 * Hp])
            gg0 = jnp.tanh(g0[:, 2 * Hp:3 * Hp])
            o0 = _sig(g0[:, 3 * Hp:4 * Hp])
            c0n = f0 * c0 + i0 * gg0
            h0n = o0 * jnp.tanh(c0n)

            # ---- layer 1 (fused): K = 2*Hp matmul over [h0_t, h1_{t-1}] ----
            hcat = jnp.concatenate([h0n, h1], axis=-1).astype(jnp.bfloat16)
            g1 = jnp.dot(hcat, w1, preferred_element_type=jnp.float32) + b1b
            i1 = _sig(g1[:, 0 * Hp:1 * Hp])
            f1 = _sig(g1[:, 1 * Hp:2 * Hp])
            gg1 = jnp.tanh(g1[:, 2 * Hp:3 * Hp])
            o1 = _sig(g1[:, 3 * Hp:4 * Hp])
            c1n = f1 * c1 + i1 * gg1
            h1n = o1 * jnp.tanh(c1n)

            if needs_mask:
                # Trailing steps of the last (partial) chunk: discard the update.
                valid = (t0 + t) < T_total
                h0n = jnp.where(valid, h0n, h0)
                c0n = jnp.where(valid, c0n, c0)
                h1n = jnp.where(valid, h1n, h1)
                c1n = jnp.where(valid, c1n, c1)
            return h0n, c0n, h1n, c1n

        h0f, c0f, h1f, c1f = lax.fori_loop(
            0, tc, step,
            (h0_s[...], c0_s[...], h1_s[...], c1_s[...]),
            unroll=min(tc, 8))
        h0_s[...] = h0f
        c0_s[...] = c0f
        h1_s[...] = h1f
        c1_s[...] = c1f

        # Final hidden/cell states, written once at the last time chunk.
        @pl.when(pl.program_id(1) == pl.num_programs(1) - 1)
        def _finalize():
            h_out_ref[0] = h0_s[...]
            h_out_ref[1] = h1_s[...]
            c_out_ref[0] = c0_s[...]
            c_out_ref[1] = c1_s[...]

    return kernel


# ----------------------------------------------------------------------------
# Encoder forward: embedding -> dropout (identity, eval) -> fused 2-layer LSTM.
# ----------------------------------------------------------------------------
def encoder_forward(params, x_ids):
    embed = params["embed"]
    V, E = embed.shape
    T, B = x_ids.shape
    H = params["lstm0"]["w_hh"].shape[1]

    Ep = _round_up(E, 128)      # lane-dense matmul K dim
    Hp = _round_up(H, 128)      # lane-dense gates / hidden
    Bp = _round_up(B, 8)        # full f32 sublanes

    ncores = _tensorcores_per_chip()
    is_v7 = ncores == 2

    # --- plain-JAX glue: pad table/ids once, gather directly into padded bf16 ---
    embed_p = jnp.zeros((V, Ep), jnp.bfloat16).at[:, :E].set(
        embed.astype(jnp.bfloat16))
    ids_p = jnp.zeros((T, Bp), x_ids.dtype).at[:, :B].set(x_ids)
    x_p = embed_p[ids_p]                                         # (T, Bp, Ep) bf16
    # TODO(synk): nn.Dropout is stochastic in train mode; eval-mode identity here.

    # --- pack LSTM weights (bf16 for MXU operands, f32 biases) ---
    p0, p1 = params["lstm0"], params["lstm1"]
    wih0 = _pack_gate_weight(p0["w_ih"], Ep, Hp).astype(jnp.bfloat16)   # (Ep, 4Hp)
    whh0 = _pack_gate_weight(p0["w_hh"], Hp, Hp).astype(jnp.bfloat16)   # (Hp, 4Hp)
    b0 = _pack_gate_bias(p0["b_ih"], p0["b_hh"], Hp)                    # (1, 4Hp) f32
    w1 = jnp.concatenate([_pack_gate_weight(p1["w_ih"], Hp, Hp),
                          _pack_gate_weight(p1["w_hh"], Hp, Hp)],
                         axis=0).astype(jnp.bfloat16)                   # (2Hp, 4Hp)
    b1 = _pack_gate_bias(p1["b_ih"], p1["b_hh"], Hp)                    # (1, 4Hp) f32

    # --- tiling ---
    # Batch tile: largest divisor of Bp (multiple of 8) up to 256 — never tiny.
    bt_cap = 256
    bt = Bp
    if bt > bt_cap:
        bt = bt_cap
        while Bp % bt:
            bt -= 8
    # v7x: split the batch across the two TensorCores via the "parallel" axis.
    if ncores == 2 and Bp >= 16 and Bp % 16 == 0 and (Bp // 2) <= bt_cap:
        bt = Bp // 2
    nb = Bp // bt

    # Time chunk: largest tc (<=128) whose working set fits the VMEM budget.
    budget = (44 << 20) if is_v7 else (96 << 20)
    tc = min(T, 128)
    while tc > 1 and _vmem_bytes(tc, bt, Ep, Hp) > budget:
        tc = max(1, tc // 2)
    nt = pl.cdiv(T, tc)
    needs_mask = (T % tc) != 0

    vmem_limit = min(budget + (8 << 20), 100 << 20)

    grid_spec = pltpu.PrefetchScalarGridSpec(
        num_scalar_prefetch=0,
        grid=(nb, nt),
        in_specs=[
            pl.BlockSpec((tc, bt, Ep), lambda b, t: (t, b, 0)),     # x chunk
            pl.BlockSpec((Ep, 4 * Hp), lambda b, t: (0, 0)),        # W_ih layer 0
            pl.BlockSpec((Hp, 4 * Hp), lambda b, t: (0, 0)),        # W_hh layer 0
            pl.BlockSpec((1, 4 * Hp), lambda b, t: (0, 0)),         # bias  layer 0
            pl.BlockSpec((2 * Hp, 4 * Hp), lambda b, t: (0, 0)),    # [W_ih1; W_hh1]
            pl.BlockSpec((1, 4 * Hp), lambda b, t: (0, 0)),         # bias  layer 1
        ],
        out_specs=(
            pl.BlockSpec((2, bt, Hp), lambda b, t: (0, b, 0)),      # h (2, B, H)
            pl.BlockSpec((2, bt, Hp), lambda b, t: (0, b, 0)),      # c (2, B, H)
        ),
        scratch_shapes=[
            pltpu.VMEM((bt, Hp), jnp.float32),            # h carry, layer 0
            pltpu.VMEM((bt, Hp), jnp.float32),            # c carry, layer 0
            pltpu.VMEM((bt, Hp), jnp.float32),            # h carry, layer 1
            pltpu.VMEM((bt, Hp), jnp.float32),            # c carry, layer 1
            pltpu.VMEM((tc * bt, 4 * Hp), jnp.float32),   # hoisted input projection
        ],
    )

    kernel = _make_kernel(T, tc, bt, Hp, needs_mask)

    h_p, c_p = pl.pallas_call(
        kernel,
        out_shape=(jax.ShapeDtypeStruct((2, Bp, Hp), jnp.float32),
                   jax.ShapeDtypeStruct((2, Bp, Hp), jnp.float32)),
        grid_spec=grid_spec,
        compiler_params=pltpu.CompilerParams(
            dimension_semantics=("parallel", "arbitrary"),
            vmem_limit_bytes=int(vmem_limit)),
    )(x_p, wih0, whh0, b0, w1, b1)

    return h_p[:, :B, :H], c_p[:, :B, :H]


# ----------------------------------------------------------------------------
# Pure-JAX reference (same math, unpadded, f32) for a correctness sanity check.
# ----------------------------------------------------------------------------
def encoder_reference(params, x_ids):
    x = params["embed"][x_ids]
    hs, cs = [], []
    for layer in range(2):
        p = params[f"lstm{layer}"]
        H = p["w_hh"].shape[1]
        w_ih_t, w_hh_t = p["w_ih"].T, p["w_hh"].T
        b = (p["b_ih"] + p["b_hh"])[None, :]
        T, B, _ = x.shape
        h = jnp.zeros((B, H), jnp.float32)
        c = jnp.zeros((B, H), jnp.float32)
        outs = []
        for t in range(T):
            gates = x[t] @ w_ih_t + h @ w_hh_t + b
            i = jax.nn.sigmoid(gates[:, 0 * H:1 * H])
            f = jax.nn.sigmoid(gates[:, 1 * H:2 * H])
            g = jnp.tanh(gates[:, 2 * H:3 * H])
            o = jax.nn.sigmoid(gates[:, 3 * H:4 * H])
            c = f * c + i * g
            h = o * jnp.tanh(c)
            outs.append(h)
        x = jnp.stack(outs, axis=0)
        hs.append(h)
        cs.append(c)
    return jnp.stack(hs, 0), jnp.stack(cs, 0)


# ----------------------------------------------------------------------------
# Deterministic parameter init (shapes follow nn.Embedding / nn.LSTM).
# ----------------------------------------------------------------------------
def init_params(key, input_dim, embed_dim, hidden_dim):
    ks = jax.random.split(key, 9)
    k_bound = 1.0 / (hidden_dim ** 0.5)
    params = {
        # nn.Embedding default init: N(0, 1)
        "embed": jax.random.normal(ks[0], (input_dim, embed_dim), jnp.float32),
    }
    in_dims = [embed_dim, hidden_dim]
    for layer in range(2):
        base = 1 + 4 * layer
        in_dim = in_dims[layer]
        params[f"lstm{layer}"] = {
            # PyTorch layout: weight_ih_l{k}: (4H, in_dim); gate order i, f, g, o.
            "w_ih": jax.random.uniform(ks[base + 0], (4 * hidden_dim, in_dim),
                                       jnp.float32, -k_bound, k_bound),
            "w_hh": jax.random.uniform(ks[base + 1], (4 * hidden_dim, hidden_dim),
                                       jnp.float32, -k_bound, k_bound),
            "b_ih": jax.random.uniform(ks[base + 2], (4 * hidden_dim,),
                                       jnp.float32, -k_bound, k_bound),
            "b_hh": jax.random.uniform(ks[base + 3], (4 * hidden_dim,),
                                       jnp.float32, -k_bound, k_bound),
        }
    return params


if __name__ == "__main__":
    # Small shapes consistent with the module's forward.
    INPUT_DIM = 16    # vocab size
    EMBED_DIM = 32
    HIDDEN_DIM = 32
    SEQ_LEN = 8
    BATCH = 2

    key = jax.random.PRNGKey(0)
    k_param, k_data = jax.random.split(key)

    params = init_params(k_param, INPUT_DIM, EMBED_DIM, HIDDEN_DIM)
    # Token ids, seq-first layout (T, B), matching nn.LSTM default.
    x_ids = jax.random.randint(k_data, (SEQ_LEN, BATCH), 0, INPUT_DIM,
                               dtype=jnp.int32)

    h, c = jax.jit(encoder_forward)(params, x_ids)
    jax.block_until_ready((h, c))

    h_ref, c_ref = encoder_reference(params, x_ids)
    assert h.shape == (2, BATCH, HIDDEN_DIM) and c.shape == (2, BATCH, HIDDEN_DIM)
    # bf16 MXU operands -> tolerance loosened accordingly vs the f32 reference.
    assert jnp.allclose(h, h_ref, atol=3e-2, rtol=3e-2)
    assert jnp.allclose(c, c_ref, atol=3e-2, rtol=3e-2)

    print("KERNEL_OK")
</pallas_src>

<mosaic_0001>
module attributes {stable_mosaic.version = 11 : i64} {
  func.func @kernel(%arg0: i32, %arg1: i32, %arg2: memref<8x8x128xbf16, #tpu.memory_space<vmem>>, %arg3: memref<128x512xbf16, #tpu.memory_space<vmem>>, %arg4: memref<128x512xbf16, #tpu.memory_space<vmem>>, %arg5: memref<1x512xf32, #tpu.memory_space<vmem>>, %arg6: memref<256x512xbf16, #tpu.memory_space<vmem>>, %arg7: memref<1x512xf32, #tpu.memory_space<vmem>>, %arg8: memref<2x8x128xf32, #tpu.memory_space<vmem>>, %arg9: memref<2x8x128xf32, #tpu.memory_space<vmem>>, %arg10: memref<8x128xf32, #tpu.memory_space<vmem>>, %arg11: memref<8x128xf32, #tpu.memory_space<vmem>>, %arg12: memref<8x128xf32, #tpu.memory_space<vmem>>, %arg13: memref<8x128xf32, #tpu.memory_space<vmem>>, %arg14: memref<64x512xf32, #tpu.memory_space<vmem>>) attributes {dimension_semantics = [#tpu.dimension_semantics<parallel>, #tpu.dimension_semantics<arbitrary>], iteration_bounds = array<i64: 1, 1>, scalar_prefetch = 0 : i64, scratch_operands = 5 : i64, tpu.core_type = #tpu.core_type<tc>, window_params = [{transform_indices = @transform_0, window_bounds = array<i64: 8, 8, 128>}, {pipeline_mode = #tpu.pipeline_mode<synchronous>, transform_indices = @transform_1, window_bounds = array<i64: 128, 512>}, {pipeline_mode = #tpu.pipeline_mode<synchronous>, transform_indices = @transform_2, window_bounds = array<i64: 128, 512>}, {pipeline_mode = #tpu.pipeline_mode<synchronous>, transform_indices = @transform_3, window_bounds = array<i64: 1, 512>}, {pipeline_mode = #tpu.pipeline_mode<synchronous>, transform_indices = @transform_4, window_bounds = array<i64: 256, 512>}, {pipeline_mode = #tpu.pipeline_mode<synchronous>, transform_indices = @transform_5, window_bounds = array<i64: 1, 512>}, {transform_indices = @transform_6, window_bounds = array<i64: 2, 8, 128>}, {transform_indices = @transform_7, window_bounds = array<i64: 2, 8, 128>}]} {
    %c0_i32 = arith.constant 0 : i32
    %0 = arith.cmpi eq, %arg1, %c0_i32 : i32
    %1 = arith.extui %0 : i1 to i32
    %c0_i32_0 = arith.constant 0 : i32
    %2 = arith.cmpi ne, %1, %c0_i32_0 : i32
    scf.if %2 {
      %cst_210 = arith.constant 0.000000e+00 : f32
      %611 = vector.broadcast %cst_210 : f32 to vector<8x128xf32>
      %c0_211 = arith.constant 0 : index
      %c0_212 = arith.constant 0 : index
      %612 = vector.load %arg10[%c0_211, %c0_212] : memref<8x128xf32, #tpu.memory_space<vmem>>, vector<8x128xf32>
      tpu.vector_store %arg10[%c0_211, %c0_212], %611 {strides = array<i32>} : memref<8x128xf32, #tpu.memory_space<vmem>>, vector<8x128xf32>,
      %cst_213 = arith.constant 0.000000e+00 : f32
      %613 = vector.broadcast %cst_213 : f32 to vector<8x128xf32>
      %c0_214 = arith.constant 0 : index
      %c0_215 = arith.constant 0 : index
      %614 = vector.load %arg11[%c0_214, %c0_215] : memref<8x128xf32, #tpu.memory_space<vmem>>, vector<8x128xf32>
      tpu.vector_store %arg11[%c0_214, %c0_215], %613 {strides = array<i32>} : memref<8x128xf32, #tpu.memory_space<vmem>>, vector<8x128xf32>,
      %cst_216 = arith.constant 0.000000e+00 : f32
      %615 = vector.broadcast %cst_216 : f32 to vector<8x128xf32>
      %c0_217 = arith.constant 0 : index
      %c0_218 = arith.constant 0 : index
      %616 = vector.load %arg12[%c0_217, %c0_218] : memref<8x128xf32, #tpu.memory_space<vmem>>, vector<8x128xf32>
      tpu.vector_store %arg12[%c0_217, %c0_218], %615 {strides = array<i32>} : memref<8x128xf32, #tpu.memory_space<vmem>>, vector<8x128xf32>,
      %cst_219 = arith.constant 0.000000e+00 : f32
      %617 = vector.broadcast %cst_219 : f32 to vector<8x128xf32>
      %c0_220 = arith.constant 0 : index
      %c0_221 = arith.constant 0 : index
      %618 = vector.load %arg13[%c0_220, %c0_221] : memref<8x128xf32, #tpu.memory_space<vmem>>, vector<8x128xf32>
      tpu.vector_store %arg13[%c0_220, %c0_221], %617 {strides = array<i32>} : memref<8x128xf32, #tpu.memory_space<vmem>>, vector<8x128xf32>,
    } else {
    }
    %c0 = arith.constant 0 : index
    %c0_1 = arith.constant 0 : index
    %c0_2 = arith.constant 0 : index
    %3 = vector.load %arg2[%c0, %c0_1, %c0_2] : memref<8x8x128xbf16, #tpu.memory_space<vmem>>, vector<8x8x128xbf16>
    %4 = vector.shape_cast %3 : vector<8x8x128xbf16> to vector<64x128xbf16>
    %c0_3 = arith.constant 0 : index
    %c0_4 = arith.constant 0 : index
    %5 = vector.load %arg3[%c0_3, %c0_4] : memref<128x512xbf16, #tpu.memory_space<vmem>>, vector<128x512xbf16>
    %cst = arith.constant dense<0.000000e+00> : vector<64x512xf32>
    %6 = tpu.matmul %4, %5, %cst {dimension_numbers = #tpu.dot_dimension_numbers<[1], [0], [0], [1], [0, 0, 1, 1], [], []>} : vector<64x128xbf16>, vector<128x512xbf16>, vector<64x512xf32> -> vector<64x512xf32>
    %c0_5 = arith.constant 0 : index
    %c0_6 = arith.constant 0 : index
    %7 = vector.load %arg5[%c0_5, %c0_6] : memref<1x512xf32, #tpu.memory_space<vmem>>, vector<1x512xf32>
    %8 = vector.broadcast %7 : vector<1x512xf32> to vector<64x512xf32>
    %9 = arith.addf %6, %8 : vector<64x512xf32>
    %c0_7 = arith.constant 0 : index
    %c0_8 = arith.constant 0 : index
    %10 = vector.load %arg14[%c0_7, %c0_8] : memref<64x512xf32, #tpu.memory_space<vmem>>, vector<64x512xf32>
    tpu.vector_store %arg14[%c0_7, %c0_8], %9 {strides = array<i32>} : memref<64x512xf32, #tpu.memory_space<vmem>>, vector<64x512xf32>,
    %c0_9 = arith.constant 0 : index
    %c0_10 = arith.constant 0 : index
    %11 = vector.load %arg4[%c0_9, %c0_10] : memref<128x512xbf16, #tpu.memory_space<vmem>>, vector<128x512xbf16>
    %c0_11 = arith.constant 0 : index
    %c0_12 = arith.constant 0 : index
    %12 = vector.load %arg6[%c0_11, %c0_12] : memref<256x512xbf16, #tpu.memory_space<vmem>>, vector<256x512xbf16>
    %c0_13 = arith.constant 0 : index
    %c0_14 = arith.constant 0 : index
    %13 = vector.load %arg7[%c0_13, %c0_14] : memref<1x512xf32, #tpu.memory_space<vmem>>, vector<1x512xf32>
    %14 = vector.shape_cast %13 : vector<1x512xf32> to vector<1x512xf32>
    %15 = vector.broadcast %14 : vector<1x512xf32> to vector<8x512xf32>
    %c0_15 = arith.constant 0 : index
    %c0_16 = arith.constant 0 : index
    %16 = vector.load %arg10[%c0_15, %c0_16] : memref<8x128xf32, #tpu.memory_space<vmem>>, vector<8x128xf32>
    %c0_17 = arith.constant 0 : index
    %c0_18 = arith.constant 0 : index
    %17 = vector.load %arg11[%c0_17, %c0_18] : memref<8x128xf32, #tpu.memory_space<vmem>>, vector<8x128xf32>
    %c0_19 = arith.constant 0 : index
    %c0_20 = arith.constant 0 : index
    %18 = vector.load %arg12[%c0_19, %c0_20] : memref<8x128xf32, #tpu.memory_space<vmem>>, vector<8x128xf32>
    %c0_21 = arith.constant 0 : index
    %c0_22 = arith.constant 0 : index
    %19 = vector.load %arg13[%c0_21, %c0_22] : memref<8x128xf32, #tpu.memory_space<vmem>>, vector<8x128xf32>
    %c0_i32_23 = arith.constant 0 : i32
    %c8_i32 = arith.constant 8 : i32
    %20 = arith.muli %c0_i32_23, %c8_i32 : i32
    %21 = tpu.assume_multiple %20, 8 : i32
    %22 = arith.index_cast %21 : i32 to index
    %c0_24 = arith.constant 0 : index
    %23 = vector.load %arg14[%22, %c0_24] : memref<64x512xf32, #tpu.memory_space<vmem>>, vector<8x512xf32>
    %24 = arith.truncf %16 : vector<8x128xf32> to vector<8x128xbf16>
    %cst_25 = arith.constant dense<0.000000e+00> : vector<8x512xf32>
    %25 = tpu.matmul %24, %11, %cst_25 {dimension_numbers = #tpu.dot_dimension_numbers<[1], [0], [0], [1], [0, 0, 1, 1], [], []>} : vector<8x128xbf16>, vector<128x512xbf16>, vector<8x512xf32> -> vector<8x512xf32>
    %26 = arith.addf %23, %25 : vector<8x512xf32>
    %27 = vector.extract_strided_slice %26 {offsets = [0, 0], sizes = [8, 128], strides = [1, 1]} : vector<8x512xf32> to vector<8x128xf32>
    %cst_26 = arith.constant 5.000000e-01 : f32
    %28 = vector.broadcast %cst_26 : f32 to vector<8x128xf32>
    %29 = arith.mulf %28, %27 : vector<8x128xf32>
    %30 = math.tanh %29 : vector<8x128xf32>
    %cst_27 = arith.constant 1.000000e+00 : f32
    %31 = vector.broadcast %cst_27 : f32 to vector<8x128xf32>
    %32 = arith.addf %31, %30 : vector<8x128xf32>
    %cst_28 = arith.constant 5.000000e-01 : f32
    %33 = vector.broadcast %cst_28 : f32 to vector<8x128xf32>
    %34 = arith.mulf %33, %32 : vector<8x128xf32>
    %35 = vector.extract_strided_slice %26 {offsets = [0, 128], sizes = [8, 128], strides = [1, 1]} : vector<8x512xf32> to vector<8x128xf32>
    %cst_29 = arith.constant 5.000000e-01 : f32
    %36 = vector.broadcast %cst_29 : f32 to vector<8x128xf32>
    %37 = arith.mulf %36, %35 : vector<8x128xf32>
    %38 = math.tanh %37 : vector<8x128xf32>
    %cst_30 = arith.constant 1.000000e+00 : f32
    %39 = vector.broadcast %cst_30 : f32 to vector<8x128xf32>
    %40 = arith.addf %39, %38 : vector<8x128xf32>
    %cst_31 = arith.constant 5.000000e-01 : f32
    %41 = vector.broadcast %cst_31 : f32 to vector<8x128xf32>
    %42 = arith.mulf %41, %40 : vector<8x128xf32>
    %43 = vector.extract_strided_slice %26 {offsets = [0, 256], sizes = [8, 128], strides = [1, 1]} : vector<8x512xf32> to vector<8x128xf32>
    %44 = math.tanh %43 : vector<8x128xf32>
    %45 = vector.extract_strided_slice %26 {offsets = [0, 384], sizes = [8, 128], strides = [1, 1]} : vector<8x512xf32> to vector<8x128xf32>
    %cst_32 = arith.constant 5.000000e-01 : f32
    %46 = vector.broadcast %cst_32 : f32 to vector<8x128xf32>
    %47 = arith.mulf %46, %45 : vector<8x128xf32>
    %48 = math.tanh %47 : vector<8x128xf32>
    %cst_33 = arith.constant 1.000000e+00 : f32
    %49 = vector.broadcast %cst_33 : f32 to vector<8x128xf32>
    %50 = arith.addf %49, %48 : vector<8x128xf32>
    %cst_34 = arith.constant 5.000000e-01 : f32
    %51 = vector.broadcast %cst_34 : f32 to vector<8x128xf32>
    %52 = arith.mulf %51, %50 : vector<8x128xf32>
    %53 = arith.mulf %42, %17 : vector<8x128xf32>
    %54 = arith.mulf %34, %44 : vector<8x128xf32>
    %55 = arith.addf %53, %54 : vector<8x128xf32>
    %56 = math.tanh %55 : vector<8x128xf32>
    %57 = arith.mulf %52, %56 : vector<8x128xf32>
    %58 = tpu.concatenate %57, %18 in 1 : vector<8x128xf32>, vector<8x128xf32> -> vector<8x256xf32>
    %59 = arith.truncf %58 : vector<8x256xf32> to vector<8x256xbf16>
    %cst_35 = arith.constant dense<0.000000e+00> : vector<8x512xf32>
    %60 = tpu.matmul %59, %12, %cst_35 {dimension_numbers = #tpu.dot_dimension_numbers<[1], [0], [0], [1], [0, 0, 1, 1], [], []>} : vector<8x256xbf16>, vector<256x512xbf16>, vector<8x512xf32> -> vector<8x512xf32>
    %61 = arith.addf %60, %15 : vector<8x512xf32>
    %62 = vector.extract_strided_slice %61 {offsets = [0, 0], sizes = [8, 128], strides = [1, 1]} : vector<8x512xf32> to vector<8x128xf32>
    %cst_36 = arith.constant 5.000000e-01 : f32
    %63 = vector.broadcast %cst_36 : f32 to vector<8x128xf32>
    %64 = arith.mulf %63, %62 : vector<8x128xf32>
    %65 = math.tanh %64 : vector<8x128xf32>
    %cst_37 = arith.constant 1.000000e+00 : f32
    %66 = vector.broadcast %cst_37 : f32 to vector<8x128xf32>
    %67 = arith.addf %66, %65 : vector<8x128xf32>
    %cst_38 = arith.constant 5.000000e-01 : f32
    %68 = vector.broadcast %cst_38 : f32 to vector<8x128xf32>
    %69 = arith.mulf %68, %67 : vector<8x128xf32>
    %70 = vector.extract_strided_slice %61 {offsets = [0, 128], sizes = [8, 128], strides = [1, 1]} : vector<8x512xf32> to vector<8x128xf32>
    %cst_39 = arith.constant 5.000000e-01 : f32
    %71 = vector.broadcast %cst_39 : f32 to vector<8x128xf32>
    %72 = arith.mulf %71, %70 : vector<8x128xf32>
    %73 = math.tanh %72 : vector<8x128xf32>
    %cst_40 = arith.constant 1.000000e+00 : f32
    %74 = vector.broadcast %cst_40 : f32 to vector<8x128xf32>
    %75 = arith.addf %74, %73 : vector<8x128xf32>
    %cst_41 = arith.constant 5.000000e-01 : f32
    %76 = vector.broadcast %cst_41 : f32 to vector<8x128xf32>
    %77 = arith.mulf %76, %75 : vector<8x128xf32>
    %78 = vector.extract_strided_slice %61 {offsets = [0, 256], sizes = [8, 128], strides = [1, 1]} : vector<8x512xf32> to vector<8x128xf32>
    %79 = math.tanh %78 : vector<8x128xf32>
    %80 = vector.extract_strided_slice %61 {offsets = [0, 384], sizes = [8, 128], strides = [1, 1]} : vector<8x512xf32> to vector<8x128xf32>
    %cst_42 = arith.constant 5.000000e-01 : f32
    %81 = vector.broadcast %cst_42 : f32 to vector<8x128xf32>
    %82 = arith.mulf %81, %80 : vector<8x128xf32>
    %83 = math.tanh %82 : vector<8x128xf32>
    %cst_43 = arith.constant 1.000000e+00 : f32
    %84 = vector.broadcast %cst_43 : f32 to vector<8x128xf32>
    %85 = arith.addf %84, %83 : vector<8x128xf32>
    %cst_44 = arith.constant 5.000000e-01 : f32
    %86 = vector.broadcast %cst_44 : f32 to vector<8x128xf32>
    %87 = arith.mulf %86, %85 : vector<8x128xf32>
    %88 = arith.mulf %77, %19 : vector<8x128xf32>
    %89 = arith.mulf %69, %79 : vector<8x128xf32>
    %90 = arith.addf %88, %89 : vector<8x128xf32>
    %91 = math.tanh %90 : vector<8x128xf32>
    %92 = arith.mulf %87, %91 : vector<8x128xf32>
    %c1_i32 = arith.constant 1 : i32
    %c8_i32_45 = arith.constant 8 : i32
    %93 = arith.muli %c1_i32, %c8_i32_45 : i32
    %94 = tpu.assume_multiple %93, 8 : i32
    %95 = arith.index_cast %94 : i32 to index
    %c0_46 = arith.constant 0 : index
    %96 = vector.load %arg14[%95, %c0_46] : memref<64x512xf32, #tpu.memory_space<vmem>>, vector<8x512xf32>
    %97 = arith.truncf %57 : vector<8x128xf32> to vector<8x128xbf16>
    %cst_47 = arith.constant dense<0.000000e+00> : vector<8x512xf32>
    %98 = tpu.matmul %97, %11, %cst_47 {dimension_numbers = #tpu.dot_dimension_numbers<[1], [0], [0], [1], [0, 0, 1, 1], [], []>} : vector<8x128xbf16>, vector<128x512xbf16>, vector<8x512xf32> -> vector<8x512xf32>
    %99 = arith.addf %96, %98 : vector<8x512xf32>
    %100 = vector.extract_strided_slice %99 {offsets = [0, 0], sizes = [8, 128], strides = [1, 1]} : vector<8x512xf32> to vector<8x128xf32>
    %cst_48 = arith.constant 5.000000e-01 : f32
    %101 = vector.broadcast %cst_48 : f32 to vector<8x128xf32>
    %102 = arith.mulf %101, %100 : vector<8x128xf32>
    %103 = math.tanh %102 : vector<8x128xf32>
    %cst_49 = arith.constant 1.000000e+00 : f32
    %104 = vector.broadcast %cst_49 : f32 to vector<8x128xf32>
    %105 = arith.addf %104, %103 : vector<8x128xf32>
    %cst_50 = arith.constant 5.000000e-01 : f32
    %106 = vector.broadcast %cst_50 : f32 to vector<8x128xf32>
    %107 = arith.mulf %106, %105 : vector<8x128xf32>
    %108 = vector.extract_strided_slice %99 {offsets = [0, 128], sizes = [8, 128], strides = [1, 1]} : vector<8x512xf32> to vector<8x128xf32>
    %cst_51 = arith.constant 5.000000e-01 : f32
    %109 = vector.broadcast %cst_51 : f32 to vector<8x128xf32>
    %110 = arith.mulf %109, %108 : vector<8x128xf32>
    %111 = math.tanh %110 : vector<8x128xf32>
    %cst_52 = arith.constant 1.000000e+00 : f32
    %112 = vector.broadcast %cst_52 : f32 to vector<8x128xf32>
    %113 = arith.addf %112, %111 : vector<8x128xf32>
    %cst_53 = arith.constant 5.000000e-01 : f32
    %114 = vector.broadcast %cst_53 : f32 to vector<8x128xf32>
    %115 = arith.mulf %114, %113 : vector<8x128xf32>
    %116 = vector.extract_strided_slice %99 {offsets = [0, 256], sizes = [8, 128], strides = [1, 1]} : vector<8x512xf32> to vector<8x128xf32>
    %117 = math.tanh %116 : vector<8x128xf32>
    %118 = vector.extract_strided_slice %99 {offsets = [0, 384], sizes = [8, 128], strides = [1, 1]} : vector<8x512xf32> to vector<8x128xf32>
    %cst_54 = arith.constant 5.000000e-01 : f32
    %119 = vector.broadcast %cst_54 : f32 to vector<8x128xf32>
    %120 = arith.mulf %119, %118 : vector<8x128xf32>
    %121 = math.tanh %120 : vector<8x128xf32>
    %cst_55 = arith.constant 1.000000e+00 : f32
    %122 = vector.broadcast %cst_55 : f32 to vector<8x128xf32>
    %123 = arith.addf %122, %121 : vector<8x128xf32>
    %cst_56 = arith.constant 5.000000e-01 : f32
    %124 = vector.broadcast %cst_56 : f32 to vector<8x128xf32>
    %125 = arith.mulf %124, %123 : vector<8x128xf32>
    %126 = arith.mulf %115, %55 : vector<8x128xf32>
    %127 = arith.mulf %107, %117 : vector<8x128xf32>
    %128 = arith.addf %126, %127 : vector<8x128xf32>
    %129 = math.tanh %128 : vector<8x128xf32>
    %130 = arith.mulf %125, %129 : vector<8x128xf32>
    %131 = tpu.concatenate %130, %92 in 1 : vector<8x128xf32>, vector<8x128xf32> -> vector<8x256xf32>
    %132 = arith.truncf %131 : vector<8x256xf32> to vector<8x256xbf16>
    %cst_57 = arith.constant dense<0.000000e+00> : vector<8x512xf32>
    %133 = tpu.matmul %132, %12, %cst_57 {dimension_numbers = #tpu.dot_dimension_numbers<[1], [0], [0], [1], [0, 0, 1, 1], [], []>} : vector<8x256xbf16>, vector<256x512xbf16>, vector<8x512xf32> -> vector<8x512xf32>
    %134 = arith.addf %133, %15 : vector<8x512xf32>
    %135 = vector.extract_strided_slice %134 {offsets = [0, 0], sizes = [8, 128], strides = [1, 1]} : vector<8x512xf32> to vector<8x128xf32>
    %cst_58 = arith.constant 5.000000e-01 : f32
    %136 = vector.broadcast %cst_58 : f32 to vector<8x128xf32>
    %137 = arith.mulf %136, %135 : vector<8x128xf32>
    %138 = math.tanh %137 : vector<8x128xf32>
    %cst_59 = arith.constant 1.000000e+00 : f32
    %139 = vector.broadcast %cst_59 : f32 to vector<8x128xf32>
    %140 = arith.addf %139, %138 : vector<8x128xf32>
    %cst_60 = arith.constant 5.000000e-01 : f32
    %141 = vector.broadcast %cst_60 : f32 to vector<8x128xf32>
    %142 = arith.mulf %141, %140 : vector<8x128xf32>
    %143 = vector.extract_strided_slice %134 {offsets = [0, 128], sizes = [8, 128], strides = [1, 1]} : vector<8x512xf32> to vector<8x128xf32>
    %cst_61 = arith.constant 5.000000e-01 : f32
    %144 = vector.broadcast %cst_61 : f32 to vector<8x128xf32>
    %145 = arith.mulf %144, %143 : vector<8x128xf32>
    %146 = math.tanh %145 : vector<8x128xf32>
    %cst_62 = arith.constant 1.000000e+00 : f32
    %147 = vector.broadcast %cst_62 : f32 to vector<8x128xf32>
    %148 = arith.addf %147, %146 : vector<8x128xf32>
    %cst_63 = arith.constant 5.000000e-01 : f32
    %149 = vector.broadcast %cst_63 : f32 to vector<8x128xf32>
    %150 = arith.mulf %149, %148 : vector<8x128xf32>
    %151 = vector.extract_strided_slice %134 {offsets = [0, 256], sizes = [8, 128], strides = [1, 1]} : vector<8x512xf32> to vector<8x128xf32>
    %152 = math.tanh %151 : vector<8x128xf32>
    %153 = vector.extract_strided_slice %134 {offsets = [0, 384], sizes = [8, 128], strides = [1, 1]} : vector<8x512xf32> to vector<8x128xf32>
    %cst_64 = arith.constant 5.000000e-01 : f32
    %154 = vector.broadcast %cst_64 : f32 to vector<8x128xf32>
    %155 = arith.mulf %154, %153 : vector<8x128xf32>
    %156 = math.tanh %155 : vector<8x128xf32>
    %cst_65 = arith.constant 1.000000e+00 : f32
    %157 = vector.broadcast %cst_65 : f32 to vector<8x128xf32>
    %158 = arith.addf %157, %156 : vector<8x128xf32>
    %cst_66 = arith.constant 5.000000e-01 : f32
    %159 = vector.broadcast %cst_66 : f32 to vector<8x128xf32>
    %160 = arith.mulf %159, %158 : vector<8x128xf32>
    %161 = arith.mulf %150, %90 : vector<8x128xf32>
    %162 = arith.mulf %142, %152 : vector<8x128xf32>
    %163 = arith.addf %161, %162 : vector<8x128xf32>
    %164 = math.tanh %163 : vector<8x128xf32>
    %165 = arith.mulf %160, %164 : vector<8x128xf32>
    %c2_i32 = arith.constant 2 : i32
    %c8_i32_67 = arith.constant 8 : i32
    %166 = arith.muli %c2_i32, %c8_i32_67 : i32
    %167 = tpu.assume_multiple %166, 8 : i32
    %168 = arith.index_cast %167 : i32 to index
    %c0_68 = arith.constant 0 : index
    %169 = vector.load %arg14[%168, %c0_68] : memref<64x512xf32, #tpu.memory_space<vmem>>, vector<8x512xf32>
    %170 = arith.truncf %130 : vector<8x128xf32> to vector<8x128xbf16>
    %cst_69 = arith.constant dense<0.000000e+00> : vector<8x512xf32>
    %171 = tpu.matmul %170, %11, %cst_69 {dimension_numbers = #tpu.dot_dimension_numbers<[1], [0], [0], [1], [0, 0, 1, 1], [], []>} : vector<8x128xbf16>, vector<128x512xbf16>, vector<8x512xf32> -> vector<8x512xf32>
    %172 = arith.addf %169, %171 : vector<8x512xf32>
    %173 = vector.extract_strided_slice %172 {offsets = [0, 0], sizes = [8, 128], strides = [1, 1]} : vector<8x512xf32> to vector<8x128xf32>
    %cst_70 = arith.constant 5.000000e-01 : f32
    %174 = vector.broadcast %cst_70 : f32 to vector<8x128xf32>
    %175 = arith.mulf %174, %173 : vector<8x128xf32>
    %176 = math.tanh %175 : vector<8x128xf32>
    %cst_71 = arith.constant 1.000000e+00 : f32
    %177 = vector.broadcast %cst_71 : f32 to vector<8x128xf32>
    %178 = arith.addf %177, %176 : vector<8x128xf32>
    %cst_72 = arith.constant 5.000000e-01 : f32
    %179 = vector.broadcast %cst_72 : f32 to vector<8x128xf32>
    %180 = arith.mulf %179, %178 : vector<8x128xf32>
    %181 = vector.extract_strided_slice %172 {offsets = [0, 128], sizes = [8, 128], strides = [1, 1]} : vector<8x512xf32> to vector<8x128xf32>
    %cst_73 = arith.constant 5.000000e-01 : f32
    %182 = vector.broadcast %cst_73 : f32 to vector<8x128xf32>
    %183 = arith.mulf %182, %181 : vector<8x128xf32>
    %184 = math.tanh %183 : vector<8x128xf32>
    %cst_74 = arith.constant 1.000000e+00 : f32
    %185 = vector.broadcast %cst_74 : f32 to vector<8x128xf32>
    %186 = arith.addf %185, %184 : vector<8x128xf32>
    %cst_75 = arith.constant 5.000000e-01 : f32
    %187 = vector.broadcast %cst_75 : f32 to vector<8x128xf32>
    %188 = arith.mulf %187, %186 : vector<8x128xf32>
    %189 = vector.extract_strided_slice %172 {offsets = [0, 256], sizes = [8, 128], strides = [1, 1]} : vector<8x512xf32> to vector<8x128xf32>
    %190 = math.tanh %189 : vector<8x128xf32>
    %191 = vector.extract_strided_slice %172 {offsets = [0, 384], sizes = [8, 128], strides = [1, 1]} : vector<8x512xf32> to vector<8x128xf32>
    %cst_76 = arith.constant 5.000000e-01 : f32
    %192 = vector.broadcast %cst_76 : f32 to vector<8x128xf32>
    %193 = arith.mulf %192, %191 : vector<8x128xf32>
    %194 = math.tanh %193 : vector<8x128xf32>
    %cst_77 = arith.constant 1.000000e+00 : f32
    %195 = vector.broadcast %cst_77 : f32 to vector<8x128xf32>
    %196 = arith.addf %195, %194 : vector<8x128xf32>
    %cst_78 = arith.constant 5.000000e-01 : f32
    %197 = vector.broadcast %cst_78 : f32 to vector<8x128xf32>
    %198 = arith.mulf %197, %196 : vector<8x128xf32>
    %199 = arith.mulf %188, %128 : vector<8x128xf32>
    %200 = arith.mulf %180, %190 : vector<8x128xf32>
    %201 = arith.addf %199, %200 : vector<8x128xf32>
    %202 = math.tanh %201 : vector<8x128xf32>
    %203 = arith.mulf %198, %202 : vector<8x128xf32>
    %204 = tpu.concatenate %203, %165 in 1 : vector<8x128xf32>, vector<8x128xf32> -> vector<8x256xf32>
    %205 = arith.truncf %204 : vector<8x256xf32> to vector<8x256xbf16>
    %cst_79 = arith.constant dense<0.000000e+00> : vector<8x512xf32>
    %206 = tpu.matmul %205, %12, %cst_79 {dimension_numbers = #tpu.dot_dimension_numbers<[1], [0], [0], [1], [0, 0, 1, 1], [], []>} : vector<8x256xbf16>, vector<256x512xbf16>, vector<8x512xf32> -> vector<8x512xf32>
    %207 = arith.addf %206, %15 : vector<8x512xf32>
    %208 = vector.extract_strided_slice %207 {offsets = [0, 0], sizes = [8, 128], strides = [1, 1]} : vector<8x512xf32> to vector<8x128xf32>
    %cst_80 = arith.constant 5.000000e-01 : f32
    %209 = vector.broadcast %cst_80 : f32 to vector<8x128xf32>
    %210 = arith.mulf %209, %208 : vector<8x128xf32>
    %211 = math.tanh %210 : vector<8x128xf32>
    %cst_81 = arith.constant 1.000000e+00 : f32
    %212 = vector.broadcast %cst_81 : f32 to vector<8x128xf32>
    %213 = arith.addf %212, %211 : vector<8x128xf32>
    %cst_82 = arith.constant 5.000000e-01 : f32
    %214 = vector.broadcast %cst_82 : f32 to vector<8x128xf32>
    %215 = arith.mulf %214, %213 : vector<8x128xf32>
    %216 = vector.extract_strided_slice %207 {offsets = [0, 128], sizes = [8, 128], strides = [1, 1]} : vector<8x512xf32> to vector<8x128xf32>
    %cst_83 = arith.constant 5.000000e-01 : f32
    %217 = vector.broadcast %cst_83 : f32 to vector<8x128xf32>
    %218 = arith.mulf %217, %216 : vector<8x128xf32>
    %219 = math.tanh %218 : vector<8x128xf32>
    %cst_84 = arith.constant 1.000000e+00 : f32
    %220 = vector.broadcast %cst_84 : f32 to vector<8x128xf32>
    %221 = arith.addf %220, %219 : vector<8x128xf32>
    %cst_85 = arith.constant 5.000000e-01 : f32
    %222 = vector.broadcast %cst_85 : f32 to vector<8x128xf32>
    %223 = arith.mulf %222, %221 : vector<8x128xf32>
    %224 = vector.extract_strided_slice %207 {offsets = [0, 256], sizes = [8, 128], strides = [1, 1]} : vector<8x512xf32> to vector<8x128xf32>
    %225 = math.tanh %224 : vector<8x128xf32>
    %226 = vector.extract_strided_slice %207 {offsets = [0, 384], sizes = [8, 128], strides = [1, 1]} : vector<8x512xf32> to vector<8x128xf32>
    %cst_86 = arith.constant 5.000000e-01 : f32
    %227 = vector.broadcast %cst_86 : f32 to vector<8x128xf32>
    %228 = arith.mulf %227, %226 : vector<8x128xf32>
    %229 = math.tanh %228 : vector<8x128xf32>
    %cst_87 = arith.constant 1.000000e+00 : f32
    %230 = vector.broadcast %cst_87 : f32 to vector<8x128xf32>
    %231 = arith.addf %230, %229 : vector<8x128xf32>
    %cst_88 = arith.constant 5.000000e-01 : f32
    %232 = vector.broadcast %cst_88 : f32 to vector<8x128xf32>
    %233 = arith.mulf %232, %231 : vector<8x128xf32>
    %234 = arith.mulf %223, %163 : vector<8x128xf32>
    %235 = arith.mulf %215, %225 : vector<8x128xf32>
    %236 = arith.addf %234, %235 : vector<8x128xf32>
    %237 = math.tanh %236 : vector<8x128xf32>
    %238 = arith.mulf %233, %237 : vector<8x128xf32>
    %c3_i32 = arith.constant 3 : i32
    %c8_i32_89 = arith.constant 8 : i32
    %239 = arith.muli %c3_i32, %c8_i32_89 : i32
    %240 = tpu.assume_multiple %239, 8 : i32
    %241 = arith.index_cast %240 : i32 to index
    %c0_90 = arith.constant 0 : index
    %242 = vector.load %arg14[%241, %c0_90] : memref<64x512xf32, #tpu.memory_space<vmem>>, vector<8x512xf32>
    %243 = arith.truncf %203 : vector<8x128xf32> to vector<8x128xbf16>
    %cst_91 = arith.constant dense<0.000000e+00> : vector<8x512xf32>
    %244 = tpu.matmul %243, %11, %cst_91 {dimension_numbers = #tpu.dot_dimension_numbers<[1], [0], [0], [1], [0, 0, 1, 1], [], []>} : vector<8x128xbf16>, vector<128x512xbf16>, vector<8x512xf32> -> vector<8x512xf32>
    %245 = arith.addf %242, %244 : vector<8x512xf32>
    %246 = vector.extract_strided_slice %245 {offsets = [0, 0], sizes = [8, 128], strides = [1, 1]} : vector<8x512xf32> to vector<8x128xf32>
    %cst_92 = arith.constant 5.000000e-01 : f32
    %247 = vector.broadcast %cst_92 : f32 to vector<8x128xf32>
    %248 = arith.mulf %247, %246 : vector<8x128xf32>
    %249 = math.tanh %248 : vector<8x128xf32>
    %cst_93 = arith.constant 1.000000e+00 : f32
    %250 = vector.broadcast %cst_93 : f32 to vector<8x128xf32>
    %251 = arith.addf %250, %249 : vector<8x128xf32>
    %cst_94 = arith.constant 5.000000e-01 : f32
    %252 = vector.broadcast %cst_94 : f32 to vector<8x128xf32>
    %253 = arith.mulf %252, %251 : vector<8x128xf32>
    %254 = vector.extract_strided_slice %245 {offsets = [0, 128], sizes = [8, 128], strides = [1, 1]} : vector<8x512xf32> to vector<8x128xf32>
    %cst_95 = arith.constant 5.000000e-01 : f32
    %255 = vector.broadcast %cst_95 : f32 to vector<8x128xf32>
    %256 = arith.mulf %255, %254 : vector<8x128xf32>
    %257 = math.tanh %256 : vector<8x128xf32>
    %cst_96 = arith.constant 1.000000e+00 : f32
    %258 = vector.broadcast %cst_96 : f32 to vector<8x128xf32>
    %259 = arith.addf %258, %257 : vector<8x128xf32>
    %cst_97 = arith.constant 5.000000e-01 : f32
    %260 = vector.broadcast %cst_97 : f32 to vector<8x128xf32>
    %261 = arith.mulf %260, %259 : vector<8x128xf32>
    %262 = vector.extract_strided_slice %245 {offsets = [0, 256], sizes = [8, 128], strides = [1, 1]} : vector<8x512xf32> to vector<8x128xf32>
    %263 = math.tanh %262 : vector<8x128xf32>
    %264 = vector.extract_strided_slice %245 {offsets = [0, 384], sizes = [8, 128], strides = [1, 1]} : vector<8x512xf32> to vector<8x128xf32>
    %cst_98 = arith.constant 5.000000e-01 : f32
    %265 = vector.broadcast %cst_98 : f32 to vector<8x128xf32>
    %266 = arith.mulf %265, %264 : vector<8x128xf32>
    %267 = math.tanh %266 : vector<8x128xf32>
    %cst_99 = arith.constant 1.000000e+00 : f32
    %268 = vector.broadcast %cst_99 : f32 to vector<8x128xf32>
    %269 = arith.addf %268, %267 : vector<8x128xf32>
    %cst_100 = arith.constant 5.000000e-01 : f32
    %270 = vector.broadcast %cst_100 : f32 to vector<8x128xf32>
    %271 = arith.mulf %270, %269 : vector<8x128xf32>
    %272 = arith.mulf %261, %201 : vector<8x128xf32>
    %273 = arith.mulf %253, %263 : vector<8x128xf32>
    %274 = arith.addf %272, %273 : vector<8x128xf32>
    %275 = math.tanh %274 : vector<8x128xf32>
    %276 = arith.mulf %271, %275 : vector<8x128xf32>
    %277 = tpu.concatenate %276, %238 in 1 : vector<8x128xf32>, vector<8x128xf32> -> vector<8x256xf32>
    %278 = arith.truncf %277 : vector<8x256xf32> to vector<8x256xbf16>
    %cst_101 = arith.constant dense<0.000000e+00> : vector<8x512xf32>
    %279 = tpu.matmul %278, %12, %cst_101 {dimension_numbers = #tpu.dot_dimension_numbers<[1], [0], [0], [1], [0, 0, 1, 1], [], []>} : vector<8x256xbf16>, vector<256x512xbf16>, vector<8x512xf32> -> vector<8x512xf32>
    %280 = arith.addf %279, %15 : vector<8x512xf32>
    %281 = vector.extract_strided_slice %280 {offsets = [0, 0], sizes = [8, 128], strides = [1, 1]} : vector<8x512xf32> to vector<8x128xf32>
    %cst_102 = arith.constant 5.000000e-01 : f32
    %282 = vector.broadcast %cst_102 : f32 to vector<8x128xf32>
    %283 = arith.mulf %282, %281 : vector<8x128xf32>
    %284 = math.tanh %283 : vector<8x128xf32>
    %cst_103 = arith.constant 1.000000e+00 : f32
    %285 = vector.broadcast %cst_103 : f32 to vector<8x128xf32>
    %286 = arith.addf %285, %284 : vector<8x128xf32>
    %cst_104 = arith.constant 5.000000e-01 : f32
    %287 = vector.broadcast %cst_104 : f32 to vector<8x128xf32>
    %288 = arith.mulf %287, %286 : vector<8x128xf32>
    %289 = vector.extract_strided_slice %280 {offsets = [0, 128], sizes = [8, 128], strides = [1, 1]} : vector<8x512xf32> to vector<8x128xf32>
    %cst_105 = arith.constant 5.000000e-01 : f32
    %290 = vector.broadcast %cst_105 : f32 to vector<8x128xf32>
    %291 = arith.mulf %290, %289 : vector<8x128xf32>
    %292 = math.tanh %291 : vector<8x128xf32>
    %cst_106 = arith.constant 1.000000e+00 : f32
    %293 = vector.broadcast %cst_106 : f32 to vector<8x128xf32>
    %294 = arith.addf %293, %292 : vector<8x128xf32>
    %cst_107 = arith.constant 5.000000e-01 : f32
    %295 = vector.broadcast %cst_107 : f32 to vector<8x128xf32>
    %296 = arith.mulf %295, %294 : vector<8x128xf32>
    %297 = vector.extract_strided_slice %280 {offsets = [0, 256], sizes = [8, 128], strides = [1, 1]} : vector<8x512xf32> to vector<8x128xf32>
    %298 = math.tanh %297 : vector<8x128xf32>
    %299 = vector.extract_strided_slice %280 {offsets = [0, 384], sizes = [8, 128], strides = [1, 1]} : vector<8x512xf32> to vector<8x128xf32>
    %cst_108 = arith.constant 5.000000e-01 : f32
    %300 = vector.broadcast %cst_108 : f32 to vector<8x128xf32>
    %301 = arith.mulf %300, %299 : vector<8x128xf32>
    %302 = math.tanh %301 : vector<8x128xf32>
    %cst_109 = arith.constant 1.000000e+00 : f32
    %303 = vector.broadcast %cst_109 : f32 to vector<8x128xf32>
    %304 = arith.addf %303, %302 : vector<8x128xf32>
    %cst_110 = arith.constant 5.000000e-01 : f32
    %305 = vector.broadcast %cst_110 : f32 to vector<8x128xf32>
    %306 = arith.mulf %305, %304 : vector<8x128xf32>
    %307 = arith.mulf %296, %236 : vector<8x128xf32>
    %308 = arith.mulf %288, %298 : vector<8x128xf32>
    %309 = arith.addf %307, %308 : vector<8x128xf32>
    %310 = math.tanh %309 : vector<8x128xf32>
    %311 = arith.mulf %306, %310 : vector<8x128xf32>
    %c4_i32 = arith.constant 4 : i32
    %c8_i32_111 = arith.constant 8 : i32
    %312 = arith.muli %c4_i32, %c8_i32_111 : i32
    %313 = tpu.assume_multiple %312, 8 : i32
    %314 = arith.index_cast %313 : i32 to index
    %c0_112 = arith.constant 0 : index
    %315 = vector.load %arg14[%314, %c0_112] : memref<64x512xf32, #tpu.memory_space<vmem>>, vector<8x512xf32>
    %316 = arith.truncf %276 : vector<8x128xf32> to vector<8x128xbf16>
    %cst_113 = arith.constant dense<0.000000e+00> : vector<8x512xf32>
    %317 = tpu.matmul %316, %11, %cst_113 {dimension_numbers = #tpu.dot_dimension_numbers<[1], [0], [0], [1], [0, 0, 1, 1], [], []>} : vector<8x128xbf16>, vector<128x512xbf16>, vector<8x512xf32> -> vector<8x512xf32>
    %318 = arith.addf %315, %317 : vector<8x512xf32>
    %319 = vector.extract_strided_slice %318 {offsets = [0, 0], sizes = [8, 128], strides = [1, 1]} : vector<8x512xf32> to vector<8x128xf32>
    %cst_114 = arith.constant 5.000000e-01 : f32
    %320 = vector.broadcast %cst_114 : f32 to vector<8x128xf32>
    %321 = arith.mulf %320, %319 : vector<8x128xf32>
    %322 = math.tanh %321 : vector<8x128xf32>
    %cst_115 = arith.constant 1.000000e+00 : f32
    %323 = vector.broadcast %cst_115 : f32 to vector<8x128xf32>
    %324 = arith.addf %323, %322 : vector<8x128xf32>
    %cst_116 = arith.constant 5.000000e-01 : f32
    %325 = vector.broadcast %cst_116 : f32 to vector<8x128xf32>
    %326 = arith.mulf %325, %324 : vector<8x128xf32>
    %327 = vector.extract_strided_slice %318 {offsets = [0, 128], sizes = [8, 128], strides = [1, 1]} : vector<8x512xf32> to vector<8x128xf32>
    %cst_117 = arith.constant 5.000000e-01 : f32
    %328 = vector.broadcast %cst_117 : f32 to vector<8x128xf32>
    %329 = arith.mulf %328, %327 : vector<8x128xf32>
    %330 = math.tanh %329 : vector<8x128xf32>
    %cst_118 = arith.constant 1.000000e+00 : f32
    %331 = vector.broadcast %cst_118 : f32 to vector<8x128xf32>
    %332 = arith.addf %331, %330 : vector<8x128xf32>
    %cst_119 = arith.constant 5.000000e-01 : f32
    %333 = vector.broadcast %cst_119 : f32 to vector<8x128xf32>
    %334 = arith.mulf %333, %332 : vector<8x128xf32>
    %335 = vector.extract_strided_slice %318 {offsets = [0, 256], sizes = [8, 128], strides = [1, 1]} : vector<8x512xf32> to vector<8x128xf32>
    %336 = math.tanh %335 : vector<8x128xf32>
    %337 = vector.extract_strided_slice %318 {offsets = [0, 384], sizes = [8, 128], strides = [1, 1]} : vector<8x512xf32> to vector<8x128xf32>
    %cst_120 = arith.constant 5.000000e-01 : f32
    %338 = vector.broadcast %cst_120 : f32 to vector<8x128xf32>
    %339 = arith.mulf %338, %337 : vector<8x128xf32>
    %340 = math.tanh %339 : vector<8x128xf32>
    %cst_121 = arith.constant 1.000000e+00 : f32
    %341 = vector.broadcast %cst_121 : f32 to vector<8x128xf32>
    %342 = arith.addf %341, %340 : vector<8x128xf32>
    %cst_122 = arith.constant 5.000000e-01 : f32
    %343 = vector.broadcast %cst_122 : f32 to vector<8x128xf32>
    %344 = arith.mulf %343, %342 : vector<8x128xf32>
    %345 = arith.mulf %334, %274 : vector<8x128xf32>
    %346 = arith.mulf %326, %336 : vector<8x128xf32>
    %347 = arith.addf %345, %346 : vector<8x128xf32>
    %348 = math.tanh %347 : vector<8x128xf32>
    %349 = arith.mulf %344, %348 : vector<8x128xf32>
    %350 = tpu.concatenate %349, %311 in 1 : vector<8x128xf32>, vector<8x128xf32> -> vector<8x256xf32>
    %351 = arith.truncf %350 : vector<8x256xf32> to vector<8x256xbf16>
    %cst_123 = arith.constant dense<0.000000e+00> : vector<8x512xf32>
    %352 = tpu.matmul %351, %12, %cst_123 {dimension_numbers = #tpu.dot_dimension_numbers<[1], [0], [0], [1], [0, 0, 1, 1], [], []>} : vector<8x256xbf16>, vector<256x512xbf16>, vector<8x512xf32> -> vector<8x512xf32>
    %353 = arith.addf %352, %15 : vector<8x512xf32>
    %354 = vector.extract_strided_slice %353 {offsets = [0, 0], sizes = [8, 128], strides = [1, 1]} : vector<8x512xf32> to vector<8x128xf32>
    %cst_124 = arith.constant 5.000000e-01 : f32
    %355 = vector.broadcast %cst_124 : f32 to vector<8x128xf32>
    %356 = arith.mulf %355, %354 : vector<8x128xf32>
    %357 = math.tanh %356 : vector<8x128xf32>
    %cst_125 = arith.constant 1.000000e+00 : f32
    %358 = vector.broadcast %cst_125 : f32 to vector<8x128xf32>
    %359 = arith.addf %358, %357 : vector<8x128xf32>
    %cst_126 = arith.constant 5.000000e-01 : f32
    %360 = vector.broadcast %cst_126 : f32 to vector<8x128xf32>
    %361 = arith.mulf %360, %359 : vector<8x128xf32>
    %362 = vector.extract_strided_slice %353 {offsets = [0, 128], sizes = [8, 128], strides = [1, 1]} : vector<8x512xf32> to vector<8x128xf32>
    %cst_127 = arith.constant 5.000000e-01 : f32
    %363 = vector.broadcast %cst_127 : f32 to vector<8x128xf32>
    %364 = arith.mulf %363, %362 : vector<8x128xf32>
    %365 = math.tanh %364 : vector<8x128xf32>
    %cst_128 = arith.constant 1.000000e+00 : f32
    %366 = vector.broadcast %cst_128 : f32 to vector<8x128xf32>
    %367 = arith.addf %366, %365 : vector<8x128xf32>
    %cst_129 = arith.constant 5.000000e-01 : f32
    %368 = vector.broadcast %cst_129 : f32 to vector<8x128xf32>
    %369 = arith.mulf %368, %367 : vector<8x128xf32>
    %370 = vector.extract_strided_slice %353 {offsets = [0, 256], sizes = [8, 128], strides = [1, 1]} : vector<8x512xf32> to vector<8x128xf32>
    %371 = math.tanh %370 : vector<8x128xf32>
    %372 = vector.extract_strided_slice %353 {offsets = [0, 384], sizes = [8, 128], strides = [1, 1]} : vector<8x512xf32> to vector<8x128xf32>
    %cst_130 = arith.constant 5.000000e-01 : f32
    %373 = vector.broadcast %cst_130 : f32 to vector<8x128xf32>
    %374 = arith.mulf %373, %372 : vector<8x128xf32>
    %375 = math.tanh %374 : vector<8x128xf32>
    %cst_131 = arith.constant 1.000000e+00 : f32
    %376 = vector.broadcast %cst_131 : f32 to vector<8x128xf32>
    %377 = arith.addf %376, %375 : vector<8x128xf32>
    %cst_132 = arith.constant 5.000000e-01 : f32
    %378 = vector.broadcast %cst_132 : f32 to vector<8x128xf32>
    %379 = arith.mulf %378, %377 : vector<8x128xf32>
    %380 = arith.mulf %369, %309 : vector<8x128xf32>
    %381 = arith.mulf %361, %371 : vector<8x128xf32>
    %382 = arith.addf %380, %381 : vector<8x128xf32>
    %383 = math.tanh %382 : vector<8x128xf32>
    %384 = arith.mulf %379, %383 : vector<8x128xf32>
    %c5_i32 = arith.constant 5 : i32
    %c8_i32_133 = arith.constant 8 : i32
    %385 = arith.muli %c5_i32, %c8_i32_133 : i32
    %386 = tpu.assume_multiple %385, 8 : i32
    %387 = arith.index_cast %386 : i32 to index
    %c0_134 = arith.constant 0 : index
    %388 = vector.load %arg14[%387, %c0_134] : memref<64x512xf32, #tpu.memory_space<vmem>>, vector<8x512xf32>
    %389 = arith.truncf %349 : vector<8x128xf32> to vector<8x128xbf16>
    %cst_135 = arith.constant dense<0.000000e+00> : vector<8x512xf32>
    %390 = tpu.matmul %389, %11, %cst_135 {dimension_numbers = #tpu.dot_dimension_numbers<[1], [0], [0], [1], [0, 0, 1, 1], [], []>} : vector<8x128xbf16>, vector<128x512xbf16>, vector<8x512xf32> -> vector<8x512xf32>
    %391 = arith.addf %388, %390 : vector<8x512xf32>
    %392 = vector.extract_strided_slice %391 {offsets = [0, 0], sizes = [8, 128], strides = [1, 1]} : vector<8x512xf32> to vector<8x128xf32>
    %cst_136 = arith.constant 5.000000e-01 : f32
    %393 = vector.broadcast %cst_136 : f32 to vector<8x128xf32>
    %394 = arith.mulf %393, %392 : vector<8x128xf32>
    %395 = math.tanh %394 : vector<8x128xf32>
    %cst_137 = arith.constant 1.000000e+00 : f32
    %396 = vector.broadcast %cst_137 : f32 to vector<8x128xf32>
    %397 = arith.addf %396, %395 : vector<8x128xf32>
    %cst_138 = arith.constant 5.000000e-01 : f32
    %398 = vector.broadcast %cst_138 : f32 to vector<8x128xf32>
    %399 = arith.mulf %398, %397 : vector<8x128xf32>
    %400 = vector.extract_strided_slice %391 {offsets = [0, 128], sizes = [8, 128], strides = [1, 1]} : vector<8x512xf32> to vector<8x128xf32>
    %cst_139 = arith.constant 5.000000e-01 : f32
    %401 = vector.broadcast %cst_139 : f32 to vector<8x128xf32>
    %402 = arith.mulf %401, %400 : vector<8x128xf32>
    %403 = math.tanh %402 : vector<8x128xf32>
    %cst_140 = arith.constant 1.000000e+00 : f32
    %404 = vector.broadcast %cst_140 : f32 to vector<8x128xf32>
    %405 = arith.addf %404, %403 : vector<8x128xf32>
    %cst_141 = arith.constant 5.000000e-01 : f32
    %406 = vector.broadcast %cst_141 : f32 to vector<8x128xf32>
    %407 = arith.mulf %406, %405 : vector<8x128xf32>
    %408 = vector.extract_strided_slice %391 {offsets = [0, 256], sizes = [8, 128], strides = [1, 1]} : vector<8x512xf32> to vector<8x128xf32>
    %409 = math.tanh %408 : vector<8x128xf32>
    %410 = vector.extract_strided_slice %391 {offsets = [0, 384], sizes = [8, 128], strides = [1, 1]} : vector<8x512xf32> to vector<8x128xf32>
    %cst_142 = arith.constant 5.000000e-01 : f32
    %411 = vector.broadcast %cst_142 : f32 to vector<8x128xf32>
    %412 = arith.mulf %411, %410 : vector<8x128xf32>
    %413 = math.tanh %412 : vector<8x128xf32>
    %cst_143 = arith.constant 1.000000e+00 : f32
    %414 = vector.broadcast %cst_143 : f32 to vector<8x128xf32>
    %415 = arith.addf %414, %413 : vector<8x128xf32>
    %cst_144 = arith.constant 5.000000e-01 : f32
    %416 = vector.broadcast %cst_144 : f32 to vector<8x128xf32>
    %417 = arith.mulf %416, %415 : vector<8x128xf32>
    %418 = arith.mulf %407, %347 : vector<8x128xf32>
    %419 = arith.mulf %399, %409 : vector<8x128xf32>
    %420 = arith.addf %418, %419 : vector<8x128xf32>
    %421 = math.tanh %420 : vector<8x128xf32>
    %422 = arith.mulf %417, %421 : vector<8x128xf32>
    %423 = tpu.concatenate %422, %384 in 1 : vector<8x128xf32>, vector<8x128xf32> -> vector<8x256xf32>
    %424 = arith.truncf %423 : vector<8x256xf32> to vector<8x256xbf16>
    %cst_145 = arith.constant dense<0.000000e+00> : vector<8x512xf32>
    %425 = tpu.matmul %424, %12, %cst_145 {dimension_numbers = #tpu.dot_dimension_numbers<[1], [0], [0], [1], [0, 0, 1, 1], [], []>} : vector<8x256xbf16>, vector<256x512xbf16>, vector<8x512xf32> -> vector<8x512xf32>
    %426 = arith.addf %425, %15 : vector<8x512xf32>
    %427 = vector.extract_strided_slice %426 {offsets = [0, 0], sizes = [8, 128], strides = [1, 1]} : vector<8x512xf32> to vector<8x128xf32>
    %cst_146 = arith.constant 5.000000e-01 : f32
    %428 = vector.broadcast %cst_146 : f32 to vector<8x128xf32>
    %429 = arith.mulf %428, %427 : vector<8x128xf32>
    %430 = math.tanh %429 : vector<8x128xf32>
    %cst_147 = arith.constant 1.000000e+00 : f32
    %431 = vector.broadcast %cst_147 : f32 to vector<8x128xf32>
    %432 = arith.addf %431, %430 : vector<8x128xf32>
    %cst_148 = arith.constant 5.000000e-01 : f32
    %433 = vector.broadcast %cst_148 : f32 to vector<8x128xf32>
    %434 = arith.mulf %433, %432 : vector<8x128xf32>
    %435 = vector.extract_strided_slice %426 {offsets = [0, 128], sizes = [8, 128], strides = [1, 1]} : vector<8x512xf32> to vector<8x128xf32>
    %cst_149 = arith.constant 5.000000e-01 : f32
    %436 = vector.broadcast %cst_149 : f32 to vector<8x128xf32>
    %437 = arith.mulf %436, %435 : vector<8x128xf32>
    %438 = math.tanh %437 : vector<8x128xf32>
    %cst_150 = arith.constant 1.000000e+00 : f32
    %439 = vector.broadcast %cst_150 : f32 to vector<8x128xf32>
    %440 = arith.addf %439, %438 : vector<8x128xf32>
    %cst_151 = arith.constant 5.000000e-01 : f32
    %441 = vector.broadcast %cst_151 : f32 to vector<8x128xf32>
    %442 = arith.mulf %441, %440 : vector<8x128xf32>
    %443 = vector.extract_strided_slice %426 {offsets = [0, 256], sizes = [8, 128], strides = [1, 1]} : vector<8x512xf32> to vector<8x128xf32>
    %444 = math.tanh %443 : vector<8x128xf32>
    %445 = vector.extract_strided_slice %426 {offsets = [0, 384], sizes = [8, 128], strides = [1, 1]} : vector<8x512xf32> to vector<8x128xf32>
    %cst_152 = arith.constant 5.000000e-01 : f32
    %446 = vector.broadcast %cst_152 : f32 to vector<8x128xf32>
    %447 = arith.mulf %446, %445 : vector<8x128xf32>
    %448 = math.tanh %447 : vector<8x128xf32>
    %cst_153 = arith.constant 1.000000e+00 : f32
    %449 = vector.broadcast %cst_153 : f32 to vector<8x128xf32>
    %450 = arith.addf %449, %448 : vector<8x128xf32>
    %cst_154 = arith.constant 5.000000e-01 : f32
    %451 = vector.broadcast %cst_154 : f32 to vector<8x128xf32>
    %452 = arith.mulf %451, %450 : vector<8x128xf32>
    %453 = arith.mulf %442, %382 : vector<8x128xf32>
    %454 = arith.mulf %434, %444 : vector<8x128xf32>
    %455 = arith.addf %453, %454 : vector<8x128xf32>
    %456 = math.tanh %455 : vector<8x128xf32>
    %457 = arith.mulf %452, %456 : vector<8x128xf32>
    %c6_i32 = arith.constant 6 : i32
    %c8_i32_155 = arith.constant 8 : i32
    %458 = arith.muli %c6_i32, %c8_i32_155 : i32
    %459 = tpu.assume_multiple %458, 8 : i32
    %460 = arith.index_cast %459 : i32 to index
    %c0_156 = arith.constant 0 : index
    %461 = vector.load %arg14[%460, %c0_156] : memref<64x512xf32, #tpu.memory_space<vmem>>, vector<8x512xf32>
    %462 = arith.truncf %422 : vector<8x128xf32> to vector<8x128xbf16>
    %cst_157 = arith.constant dense<0.000000e+00> : vector<8x512xf32>
    %463 = tpu.matmul %462, %11, %cst_157 {dimension_numbers = #tpu.dot_dimension_numbers<[1], [0], [0], [1], [0, 0, 1, 1], [], []>} : vector<8x128xbf16>, vector<128x512xbf16>, vector<8x512xf32> -> vector<8x512xf32>
    %464 = arith.addf %461, %463 : vector<8x512xf32>
    %465 = vector.extract_strided_slice %464 {offsets = [0, 0], sizes = [8, 128], strides = [1, 1]} : vector<8x512xf32> to vector<8x128xf32>
    %cst_158 = arith.constant 5.000000e-01 : f32
    %466 = vector.broadcast %cst_158 : f32 to vector<8x128xf32>
    %467 = arith.mulf %466, %465 : vector<8x128xf32>
    %468 = math.tanh %467 : vector<8x128xf32>
    %cst_159 = arith.constant 1.000000e+00 : f32
    %469 = vector.broadcast %cst_159 : f32 to vector<8x128xf32>
    %470 = arith.addf %469, %468 : vector<8x128xf32>
    %cst_160 = arith.constant 5.000000e-01 : f32
    %471 = vector.broadcast %cst_160 : f32 to vector<8x128xf32>
    %472 = arith.mulf %471, %470 : vector<8x128xf32>
    %473 = vector.extract_strided_slice %464 {offsets = [0, 128], sizes = [8, 128], strides = [1, 1]} : vector<8x512xf32> to vector<8x128xf32>
    %cst_161 = arith.constant 5.000000e-01 : f32
    %474 = vector.broadcast %cst_161 : f32 to vector<8x128xf32>
    %475 = arith.mulf %474, %473 : vector<8x128xf32>
    %476 = math.tanh %475 : vector<8x128xf32>
    %cst_162 = arith.constant 1.000000e+00 : f32
    %477 = vector.broadcast %cst_162 : f32 to vector<8x128xf32>
    %478 = arith.addf %477, %476 : vector<8x128xf32>
    %cst_163 = arith.constant 5.000000e-01 : f32
    %479 = vector.broadcast %cst_163 : f32 to vector<8x128xf32>
    %480 = arith.mulf %479, %478 : vector<8x128xf32>
    %481 = vector.extract_strided_slice %464 {offsets = [0, 256], sizes = [8, 128], strides = [1, 1]} : vector<8x512xf32> to vector<8x128xf32>
    %482 = math.tanh %481 : vector<8x128xf32>
    %483 = vector.extract_strided_slice %464 {offsets = [0, 384], sizes = [8, 128], strides = [1, 1]} : vector<8x512xf32> to vector<8x128xf32>
    %cst_164 = arith.constant 5.000000e-01 : f32
    %484 = vector.broadcast %cst_164 : f32 to vector<8x128xf32>
    %485 = arith.mulf %484, %483 : vector<8x128xf32>
    %486 = math.tanh %485 : vector<8x128xf32>
    %cst_165 = arith.constant 1.000000e+00 : f32
    %487 = vector.broadcast %cst_165 : f32 to vector<8x128xf32>
    %488 = arith.addf %487, %486 : vector<8x128xf32>
    %cst_166 = arith.constant 5.000000e-01 : f32
    %489 = vector.broadcast %cst_166 : f32 to vector<8x128xf32>
    %490 = arith.mulf %489, %488 : vector<8x128xf32>
    %491 = arith.mulf %480, %420 : vector<8x128xf32>
    %492 = arith.mulf %472, %482 : vector<8x128xf32>
    %493 = arith.addf %491, %492 : vector<8x128xf32>
    %494 = math.tanh %493 : vector<8x128xf32>
    %495 = arith.mulf %490, %494 : vector<8x128xf32>
    %496 = tpu.concatenate %495, %457 in 1 : vector<8x128xf32>, vector<8x128xf32> -> vector<8x256xf32>
    %497 = arith.truncf %496 : vector<8x256xf32> to vector<8x256xbf16>
    %cst_167 = arith.constant dense<0.000000e+00> : vector<8x512xf32>
    %498 = tpu.matmul %497, %12, %cst_167 {dimension_numbers = #tpu.dot_dimension_numbers<[1], [0], [0], [1], [0, 0, 1, 1], [], []>} : vector<8x256xbf16>, vector<256x512xbf16>, vector<8x512xf32> -> vector<8x512xf32>
    %499 = arith.addf %498, %15 : vector<8x512xf32>
    %500 = vector.extract_strided_slice %499 {offsets = [0, 0], sizes = [8, 128], strides = [1, 1]} : vector<8x512xf32> to vector<8x128xf32>
    %cst_168 = arith.constant 5.000000e-01 : f32
    %501 = vector.broadcast %cst_168 : f32 to vector<8x128xf32>
    %502 = arith.mulf %501, %500 : vector<8x128xf32>
    %503 = math.tanh %502 : vector<8x128xf32>
    %cst_169 = arith.constant 1.000000e+00 : f32
    %504 = vector.broadcast %cst_169 : f32 to vector<8x128xf32>
    %505 = arith.addf %504, %503 : vector<8x128xf32>
    %cst_170 = arith.constant 5.000000e-01 : f32
    %506 = vector.broadcast %cst_170 : f32 to vector<8x128xf32>
    %507 = arith.mulf %506, %505 : vector<8x128xf32>
    %508 = vector.extract_strided_slice %499 {offsets = [0, 128], sizes = [8, 128], strides = [1, 1]} : vector<8x512xf32> to vector<8x128xf32>
    %cst_171 = arith.constant 5.000000e-01 : f32
    %509 = vector.broadcast %cst_171 : f32 to vector<8x128xf32>
    %510 = arith.mulf %509, %508 : vector<8x128xf32>
    %511 = math.tanh %510 : vector<8x128xf32>
    %cst_172 = arith.constant 1.000000e+00 : f32
    %512 = vector.broadcast %cst_172 : f32 to vector<8x128xf32>
    %513 = arith.addf %512, %511 : vector<8x128xf32>
    %cst_173 = arith.constant 5.000000e-01 : f32
    %514 = vector.broadcast %cst_173 : f32 to vector<8x128xf32>
    %515 = arith.mulf %514, %513 : vector<8x128xf32>
    %516 = vector.extract_strided_slice %499 {offsets = [0, 256], sizes = [8, 128], strides = [1, 1]} : vector<8x512xf32> to vector<8x128xf32>
    %517 = math.tanh %516 : vector<8x128xf32>
    %518 = vector.extract_strided_slice %499 {offsets = [0, 384], sizes = [8, 128], strides = [1, 1]} : vector<8x512xf32> to vector<8x128xf32>
    %cst_174 = arith.constant 5.000000e-01 : f32
    %519 = vector.broadcast %cst_174 : f32 to vector<8x128xf32>
    %520 = arith.mulf %519, %518 : vector<8x128xf32>
    %521 = math.tanh %520 : vector<8x128xf32>
    %cst_175 = arith.constant 1.000000e+00 : f32
    %522 = vector.broadcast %cst_175 : f32 to vector<8x128xf32>
    %523 = arith.addf %522, %521 : vector<8x128xf32>
    %cst_176 = arith.constant 5.000000e-01 : f32
    %524 = vector.broadcast %cst_176 : f32 to vector<8x128xf32>
    %525 = arith.mulf %524, %523 : vector<8x128xf32>
    %526 = arith.mulf %515, %455 : vector<8x128xf32>
    %527 = arith.mulf %507, %517 : vector<8x128xf32>
    %528 = arith.addf %526, %527 : vector<8x128xf32>
    %529 = math.tanh %528 : vector<8x128xf32>
    %530 = arith.mulf %525, %529 : vector<8x128xf32>
    %c7_i32 = arith.constant 7 : i32
    %c8_i32_177 = arith.constant 8 : i32
    %531 = arith.muli %c7_i32, %c8_i32_177 : i32
    %532 = tpu.assume_multiple %531, 8 : i32
    %533 = arith.index_cast %532 : i32 to index
    %c0_178 = arith.constant 0 : index
    %534 = vector.load %arg14[%533, %c0_178] : memref<64x512xf32, #tpu.memory_space<vmem>>, vector<8x512xf32>
    %535 = arith.truncf %495 : vector<8x128xf32> to vector<8x128xbf16>
    %cst_179 = arith.constant dense<0.000000e+00> : vector<8x512xf32>
    %536 = tpu.matmul %535, %11, %cst_179 {dimension_numbers = #tpu.dot_dimension_numbers<[1], [0], [0], [1], [0, 0, 1, 1], [], []>} : vector<8x128xbf16>, vector<128x512xbf16>, vector<8x512xf32> -> vector<8x512xf32>
    %537 = arith.addf %534, %536 : vector<8x512xf32>
    %538 = vector.extract_strided_slice %537 {offsets = [0, 0], sizes = [8, 128], strides = [1, 1]} : vector<8x512xf32> to vector<8x128xf32>
    %cst_180 = arith.constant 5.000000e-01 : f32
    %539 = vector.broadcast %cst_180 : f32 to vector<8x128xf32>
    %540 = arith.mulf %539, %538 : vector<8x128xf32>
    %541 = math.tanh %540 : vector<8x128xf32>
    %cst_181 = arith.constant 1.000000e+00 : f32
    %542 = vector.broadcast %cst_181 : f32 to vector<8x128xf32>
    %543 = arith.addf %542, %541 : vector<8x128xf32>
    %cst_182 = arith.constant 5.000000e-01 : f32
    %544 = vector.broadcast %cst_182 : f32 to vector<8x128xf32>
    %545 = arith.mulf %544, %543 : vector<8x128xf32>
    %546 = vector.extract_strided_slice %537 {offsets = [0, 128], sizes = [8, 128], strides = [1, 1]} : vector<8x512xf32> to vector<8x128xf32>
    %cst_183 = arith.constant 5.000000e-01 : f32
    %547 = vector.broadcast %cst_183 : f32 to vector<8x128xf32>
    %548 = arith.mulf %547, %546 : vector<8x128xf32>
    %549 = math.tanh %548 : vector<8x128xf32>
    %cst_184 = arith.constant 1.000000e+00 : f32
    %550 = vector.broadcast %cst_184 : f32 to vector<8x128xf32>
    %551 = arith.addf %550, %549 : vector<8x128xf32>
    %cst_185 = arith.constant 5.000000e-01 : f32
    %552 = vector.broadcast %cst_185 : f32 to vector<8x128xf32>
    %553 = arith.mulf %552, %551 : vector<8x128xf32>
    %554 = vector.extract_strided_slice %537 {offsets = [0, 256], sizes = [8, 128], strides = [1, 1]} : vector<8x512xf32> to vector<8x128xf32>
    %555 = math.tanh %554 : vector<8x128xf32>
    %556 = vector.extract_strided_slice %537 {offsets = [0, 384], sizes = [8, 128], strides = [1, 1]} : vector<8x512xf32> to vector<8x128xf32>
    %cst_186 = arith.constant 5.000000e-01 : f32
    %557 = vector.broadcast %cst_186 : f32 to vector<8x128xf32>
    %558 = arith.mulf %557, %556 : vector<8x128xf32>
    %559 = math.tanh %558 : vector<8x128xf32>
    %cst_187 = arith.constant 1.000000e+00 : f32
    %560 = vector.broadcast %cst_187 : f32 to vector<8x128xf32>
    %561 = arith.addf %560, %559 : vector<8x128xf32>
    %cst_188 = arith.constant 5.000000e-01 : f32
    %562 = vector.broadcast %cst_188 : f32 to vector<8x128xf32>
    %563 = arith.mulf %562, %561 : vector<8x128xf32>
    %564 = arith.mulf %553, %493 : vector<8x128xf32>
    %565 = arith.mulf %545, %555 : vector<8x128xf32>
    %566 = arith.addf %564, %565 : vector<8x128xf32>
    %567 = math.tanh %566 : vector<8x128xf32>
    %568 = arith.mulf %563, %567 : vector<8x128xf32>
    %569 = tpu.concatenate %568, %530 in 1 : vector<8x128xf32>, vector<8x128xf32> -> vector<8x256xf32>
    %570 = arith.truncf %569 : vector<8x256xf32> to vector<8x256xbf16>
    %cst_189 = arith.constant dense<0.000000e+00> : vector<8x512xf32>
    %571 = tpu.matmul %570, %12, %cst_189 {dimension_numbers = #tpu.dot_dimension_numbers<[1], [0], [0], [1], [0, 0, 1, 1], [], []>} : vector<8x256xbf16>, vector<256x512xbf16>, vector<8x512xf32> -> vector<8x512xf32>
    %572 = arith.addf %571, %15 : vector<8x512xf32>
    %573 = vector.extract_strided_slice %572 {offsets = [0, 0], sizes = [8, 128], strides = [1, 1]} : vector<8x512xf32> to vector<8x128xf32>
    %cst_190 = arith.constant 5.000000e-01 : f32
    %574 = vector.broadcast %cst_190 : f32 to vector<8x128xf32>
    %575 = arith.mulf %574, %573 : vector<8x128xf32>
    %576 = math.tanh %575 : vector<8x128xf32>
    %cst_191 = arith.constant 1.000000e+00 : f32
    %577 = vector.broadcast %cst_191 : f32 to vector<8x128xf32>
    %578 = arith.addf %577, %576 : vector<8x128xf32>
    %cst_192 = arith.constant 5.000000e-01 : f32
    %579 = vector.broadcast %cst_192 : f32 to vector<8x128xf32>
    %580 = arith.mulf %579, %578 : vector<8x128xf32>
    %581 = vector.extract_strided_slice %572 {offsets = [0, 128], sizes = [8, 128], strides = [1, 1]} : vector<8x512xf32> to vector<8x128xf32>
    %cst_193 = arith.constant 5.000000e-01 : f32
    %582 = vector.broadcast %cst_193 : f32 to vector<8x128xf32>
    %583 = arith.mulf %582, %581 : vector<8x128xf32>
    %584 = math.tanh %583 : vector<8x128xf32>
    %cst_194 = arith.constant 1.000000e+00 : f32
    %585 = vector.broadcast %cst_194 : f32 to vector<8x128xf32>
    %586 = arith.addf %585, %584 : vector<8x128xf32>
    %cst_195 = arith.constant 5.000000e-01 : f32
    %587 = vector.broadcast %cst_195 : f32 to vector<8x128xf32>
    %588 = arith.mulf %587, %586 : vector<8x128xf32>
    %589 = vector.extract_strided_slice %572 {offsets = [0, 256], sizes = [8, 128], strides = [1, 1]} : vector<8x512xf32> to vector<8x128xf32>
    %590 = math.tanh %589 : vector<8x128xf32>
    %591 = vector.extract_strided_slice %572 {offsets = [0, 384], sizes = [8, 128], strides = [1, 1]} : vector<8x512xf32> to vector<8x128xf32>
    %cst_196 = arith.constant 5.000000e-01 : f32
    %592 = vector.broadcast %cst_196 : f32 to vector<8x128xf32>
    %593 = arith.mulf %592, %591 : vector<8x128xf32>
    %594 = math.tanh %593 : vector<8x128xf32>
    %cst_197 = arith.constant 1.000000e+00 : f32
    %595 = vector.broadcast %cst_197 : f32 to vector<8x128xf32>
    %596 = arith.addf %595, %594 : vector<8x128xf32>
    %cst_198 = arith.constant 5.000000e-01 : f32
    %597 = vector.broadcast %cst_198 : f32 to vector<8x128xf32>
    %598 = arith.mulf %597, %596 : vector<8x128xf32>
    %599 = arith.mulf %588, %528 : vector<8x128xf32>
    %600 = arith.mulf %580, %590 : vector<8x128xf32>
    %601 = arith.addf %599, %600 : vector<8x128xf32>
    %602 = math.tanh %601 : vector<8x128xf32>
    %603 = arith.mulf %598, %602 : vector<8x128xf32>
    %c8_i32_199 = arith.constant 8 : i32
    %c0_200 = arith.constant 0 : index
    %c0_201 = arith.constant 0 : index
    %604 = vector.load %arg10[%c0_200, %c0_201] : memref<8x128xf32, #tpu.memory_space<vmem>>, vector<8x128xf32>
    tpu.vector_store %arg10[%c0_200, %c0_201], %568 {strides = array<i32>} : memref<8x128xf32, #tpu.memory_space<vmem>>, vector<8x128xf32>,
    %c0_202 = arith.constant 0 : index
    %c0_203 = arith.constant 0 : index
    %605 = vector.load %arg11[%c0_202, %c0_203] : memref<8x128xf32, #tpu.memory_space<vmem>>, vector<8x128xf32>
    tpu.vector_store %arg11[%c0_202, %c0_203], %566 {strides = array<i32>} : memref<8x128xf32, #tpu.memory_space<vmem>>, vector<8x128xf32>,
    %c0_204 = arith.constant 0 : index
    %c0_205 = arith.constant 0 : index
    %606 = vector.load %arg12[%c0_204, %c0_205] : memref<8x128xf32, #tpu.memory_space<vmem>>, vector<8x128xf32>
    tpu.vector_store %arg12[%c0_204, %c0_205], %603 {strides = array<i32>} : memref<8x128xf32, #tpu.memory_space<vmem>>, vector<8x128xf32>,
    %c0_206 = arith.constant 0 : index
    %c0_207 = arith.constant 0 : index
    %607 = vector.load %arg13[%c0_206, %c0_207] : memref<8x128xf32, #tpu.memory_space<vmem>>, vector<8x128xf32>
    tpu.vector_store %arg13[%c0_206, %c0_207], %601 {strides = array<i32>} : memref<8x128xf32, #tpu.memory_space<vmem>>, vector<8x128xf32>,
    %c0_i32_208 = arith.constant 0 : i32
    %608 = arith.cmpi eq, %arg1, %c0_i32_208 : i32
    %609 = arith.extui %608 : i1 to i32
    %c0_i32_209 = arith.constant 0 : i32
    %610 = arith.cmpi ne, %609, %c0_i32_209 : i32
    scf.if %610 {
      %c0_210 = arith.constant 0 : index
      %c0_211 = arith.constant 0 : index
      %611 = vector.load %arg10[%c0_210, %c0_211] : memref<8x128xf32, #tpu.memory_space<vmem>>, vector<8x128xf32>
      %c0_212 = arith.constant 0 : index
      %c0_213 = arith.constant 0 : index
      %c0_214 = arith.constant 0 : index
      %612 = vector.load %arg8[%c0_212, %c0_213, %c0_214] : memref<2x8x128xf32, #tpu.memory_space<vmem>>, vector<1x8x128xf32>
      %613 = vector.shape_cast %612 : vector<1x8x128xf32> to vector<8x128xf32>
      %614 = vector.shape_cast %611 : vector<8x128xf32> to vector<1x8x128xf32>
      tpu.vector_store %arg8[%c0_212, %c0_213, %c0_214], %614 {strides = array<i32>} : memref<2x8x128xf32, #tpu.memory_space<vmem>>, vector<1x8x128xf32>,
      %c0_215 = arith.constant 0 : index
      %c0_216 = arith.constant 0 : index
      %615 = vector.load %arg12[%c0_215, %c0_216] : memref<8x128xf32, #tpu.memory_space<vmem>>, vector<8x128xf32>
      %c1 = arith.constant 1 : index
      %c0_217 = arith.constant 0 : index
      %c0_218 = arith.constant 0 : index
      %616 = vector.load %arg8[%c1, %c0_217, %c0_218] : memref<2x8x128xf32, #tpu.memory_space<vmem>>, vector<1x8x128xf32>
      %617 = vector.shape_cast %616 : vector<1x8x128xf32> to vector<8x128xf32>
      %618 = vector.shape_cast %615 : vector<8x128xf32> to vector<1x8x128xf32>
      tpu.vector_store %arg8[%c1, %c0_217, %c0_218], %618 {strides = array<i32>} : memref<2x8x128xf32, #tpu.memory_space<vmem>>, vector<1x8x128xf32>,
      %c0_219 = arith.constant 0 : index
      %c0_220 = arith.constant 0 : index
      %619 = vector.load %arg11[%c0_219, %c0_220] : memref<8x128xf32, #tpu.memory_space<vmem>>, vector<8x128xf32>
      %c0_221 = arith.constant 0 : index
      %c0_222 = arith.constant 0 : index
      %c0_223 = arith.constant 0 : index
      %620 = vector.load %arg9[%c0_221, %c0_222, %c0_223] : memref<2x8x128xf32, #tpu.memory_space<vmem>>, vector<1x8x128xf32>
      %621 = vector.shape_cast %620 : vector<1x8x128xf32> to vector<8x128xf32>
      %622 = vector.shape_cast %619 : vector<8x128xf32> to vector<1x8x128xf32>
      tpu.vector_store %arg9[%c0_221, %c0_222, %c0_223], %622 {strides = array<i32>} : memref<2x8x128xf32, #tpu.memory_space<vmem>>, vector<1x8x128xf32>,
      %c0_224 = arith.constant 0 : index
      %c0_225 = arith.constant 0 : index
      %623 = vector.load %arg13[%c0_224, %c0_225] : memref<8x128xf32, #tpu.memory_space<vmem>>, vector<8x128xf32>
      %c1_226 = arith.constant 1 : index
      %c0_227 = arith.constant 0 : index
      %c0_228 = arith.constant 0 : index
      %624 = vector.load %arg9[%c1_226, %c0_227, %c0_228] : memref<2x8x128xf32, #tpu.memory_space<vmem>>, vector<1x8x128xf32>
      %625 = vector.shape_cast %624 : vector<1x8x128xf32> to vector<8x128xf32>
      %626 = vector.shape_cast %623 : vector<8x128xf32> to vector<1x8x128xf32>
      tpu.vector_store %arg9[%c1_226, %c0_227, %c0_228], %626 {strides = array<i32>} : memref<2x8x128xf32, #tpu.memory_space<vmem>>, vector<1x8x128xf32>,
    } else {
    }
    return
  }
  func.func @transform_0(%arg0: i32, %arg1: i32) -> (i32, i32, i32) {
    %c0_i32 = arith.constant 0 : i32
    %c0_i32_0 = arith.constant 0 : i32
    return %arg1, %arg0, %c0_i32 : i32, i32, i32
  }
  func.func @transform_1(%arg0: i32, %arg1: i32) -> (i32, i32) {
    %c0_i32 = arith.constant 0 : i32
    %c0_i32_0 = arith.constant 0 : i32
    %c0_i32_1 = arith.constant 0 : i32
    return %c0_i32, %c0_i32_0 : i32, i32
  }
  func.func @transform_2(%arg0: i32, %arg1: i32) -> (i32, i32) {
    %c0_i32 = arith.constant 0 : i32
    %c0_i32_0 = arith.constant 0 : i32
    %c0_i32_1 = arith.constant 0 : i32
    return %c0_i32, %c0_i32_0 : i32, i32
  }
  func.func @transform_3(%arg0: i32, %arg1: i32) -> (i32, i32) {
    %c0_i32 = arith.constant 0 : i32
    %c0_i32_0 = arith.constant 0 : i32
    %c0_i32_1 = arith.constant 0 : i32
    return %c0_i32, %c0_i32_0 : i32, i32
  }
  func.func @transform_4(%arg0: i32, %arg1: i32) -> (i32, i32) {
    %c0_i32 = arith.constant 0 : i32
    %c0_i32_0 = arith.constant 0 : i32
    %c0_i32_1 = arith.constant 0 : i32
    return %c0_i32, %c0_i32_0 : i32, i32
  }
  func.func @transform_5(%arg0: i32, %arg1: i32) -> (i32, i32) {
    %c0_i32 = arith.constant 0 : i32
    %c0_i32_0 = arith.constant 0 : i32
    %c0_i32_1 = arith.constant 0 : i32
    return %c0_i32, %c0_i32_0 : i32, i32
  }
  func.func @transform_6(%arg0: i32, %arg1: i32) -> (i32, i32, i32) {
    %c0_i32 = arith.constant 0 : i32
    %c0_i32_0 = arith.constant 0 : i32
    %c0_i32_1 = arith.constant 0 : i32
    return %c0_i32, %arg0, %c0_i32_0 : i32, i32, i32
  }
  func.func @transform_7(%arg0: i32, %arg1: i32) -> (i32, i32, i32) {
    %c0_i32 = arith.constant 0 : i32
    %c0_i32_0 = arith.constant 0 : i32
    %c0_i32_1 = arith.constant 0 : i32
    return %c0_i32, %arg0, %c0_i32_0 : i32, i32, i32
  }
}

</mosaic_0001>

<bundles_post_ra>
// kernel: encoder_forward.1
= control target key start
LH: loop header
LB: loop body
LE: loop exit
PB: predicated region body
PF: predicated region fallthrough
CT: control target
= control target key end

     0   :  { %s5540_s1 = inlined_call_operand.vmem [shape: bf16[128,512], index: 1, kind: input, shape index: {}]   ;;  %s5541_s2 = inlined_call_operand.vmem [shape: bf16[128,512], index: 2, kind: input, shape index: {}]   ;;  %s5542_s0 = inlined_call_operand.vmem [shape: bf16[8,8,128], index: 0, kind: input, shape index: {}]   ;;  %s5543_s4 = inlined_call_operand.vmem [shape: bf16[256,512], index: 4, kind: input, shape index: {}]   ;;  %s5544_s3 = inlined_call_operand.vmem [shape: f32[1,512], index: 3, kind: input, shape index: {}]   ;;  %s5545_s5 = inlined_call_operand.vmem [shape: f32[1,512], index: 5, kind: input, shape index: {}]   ;;  %s5546_s7 = inlined_call_operand.vmem [shape: f32[2,8,128], index: 7, kind: output, shape index: {1}]   ;;  %s5547_s6 = inlined_call_operand.vmem [shape: f32[2,8,128], index: 6, kind: output, shape index: {0}]  }
   0x1   :  { %v2808_v0 = vld [vmem:[%s5540_s1 + $0xe0] sm:$0xf]  ;;  %v3242_v1 = vld [vmem:[%s5540_s1 + $0xec] sm:$0xf0]  ;;  %v3240_v2 = vld [vmem:[%s5540_s1 + $0xe4] sm:$0xf] }
   0x2   :  { %v2809_v3 = vor.u32 %v3242_v1, %v2808_v0  ;;  %v2810_v4 = vld [vmem:[%s5540_s1 + $0xf0] sm:$0xf0]  ;;  %v2816_v5 = vld [vmem:[%s5540_s1 + $0xe8] sm:$0xf]  ;;  %v3243_v6 = vld [vmem:[%s5540_s1 + $0xf4] sm:$0xf0] }
   0x3   :  { %v2813_v7 = vor.u32 %v3240_v2, %v2810_v4  ;;  %v2817_v8 = vor.u32 %v3243_v6, %v2816_v5  ;;  %v3241_v9 = vld [vmem:[%s5540_s1 + $0xec] sm:$0xf]  ;;  %v2818_v10 = vld [vmem:[%s5540_s1 + $0xf8] sm:$0xf0]  ;;  %v2792_v11 = vld [vmem:[%s5540_s1 + $0xc0] sm:$0xf] }
   0x4   :  { %267 = vmatpush.bf16.msra.mxu0 %v2809_v3  ;;  %v2821_v12 = vor.u32 %v3241_v9, %v2818_v10  ;;  %v3238_v13 = vld [vmem:[%s5540_s1 + $0xcc] sm:$0xf0]  ;;  %v3236_v14 = vld [vmem:[%s5540_s1 + $0xc4] sm:$0xf]  ;;  %v2794_v15 = vld [vmem:[%s5540_s1 + $0xd0] sm:$0xf0] }
   0x5   :  { %296 = vmatpush.bf16.msra.mxu1 %v2813_v7  ;;  %325 = vmatpush.bf16.msra.mxu2 %v2817_v8  ;;  %v2793_v16 = vor.u32 %v3238_v13, %v2792_v11  ;;  %v2797_v17 = vor.u32 %v3236_v14, %v2794_v15  ;;  %v2800_v18 = vld [vmem:[%s5540_s1 + $0xc8] sm:$0xf]  ;;  %v3239_v19 = vld [vmem:[%s5540_s1 + $0xd4] sm:$0xf0]  ;;  %v3237_v20 = vld [vmem:[%s5540_s1 + $0xcc] sm:$0xf] }
   0x6   :  { %354 = vmatpush.bf16.msra.mxu3 %v2821_v12  ;;  %v2801_v21 = vor.u32 %v3239_v19, %v2800_v18  ;;  %v2802_v22 = vld [vmem:[%s5540_s1 + $0xd8] sm:$0xf0]  ;;  %v2776_v23 = vld [vmem:[%s5540_s1 + $0xa0] sm:$0xf]  ;;  %v3234_v24 = vld [vmem:[%s5540_s1 + $0xac] sm:$0xf0] }
   0x7   :  { %v2805_v25 = vor.u32 %v3237_v20, %v2802_v22  ;;  %v3232_v26 = vld [vmem:[%s5540_s1 + $0xa4] sm:$0xf]  ;;  %v2778_v27 = vld [vmem:[%s5540_s1 + $0xb0] sm:$0xf0]  ;;  %v2784_v28 = vld [vmem:[%s5540_s1 + $0xa8] sm:$0xf]  ;;  %v2777_v29 = vor.u32 %v3234_v24, %v2776_v23 }
   0x8   :  { %268 = vmatpush.bf16.msra.mxu0 %v2793_v16  ;;  %v3235_v30 = vld [vmem:[%s5540_s1 + $0xb4] sm:$0xf0]  ;;  %v3233_v31 = vld [vmem:[%s5540_s1 + $0xac] sm:$0xf]  ;;  %v2786_v32 = vld [vmem:[%s5540_s1 + $0xb8] sm:$0xf0]  ;;  %v2781_v33 = vor.u32 %v3232_v26, %v2778_v27 }
   0x9   :  { %297 = vmatpush.bf16.msra.mxu1 %v2797_v17  ;;  %326 = vmatpush.bf16.msra.mxu2 %v2801_v21  ;;  %v2785_v34 = vor.u32 %v3235_v30, %v2784_v28  ;;  %v2760_v35 = vld [vmem:[%s5540_s1 + $0x80] sm:$0xf]  ;;  %v3230_v36 = vld [vmem:[%s5540_s1 + $0x8c] sm:$0xf0]  ;;  %v3228_v37 = vld [vmem:[%s5540_s1 + $0x84] sm:$0xf]  ;;  %v2789_v38 = vor.u32 %v3233_v31, %v2786_v32 }
   0xa   :  { %355 = vmatpush.bf16.msra.mxu3 %v2805_v25  ;;  %v2762_v39 = vld [vmem:[%s5540_s1 + $0x90] sm:$0xf0]  ;;  %v2768_v40 = vld [vmem:[%s5540_s1 + $0x88] sm:$0xf]  ;;  %v3231_v41 = vld [vmem:[%s5540_s1 + $0x94] sm:$0xf0]  ;;  %v2761_v44 = vor.u32 %v3230_v36, %v2760_v35 }
   0xb   :  { %v3229_v42 = vld [vmem:[%s5540_s1 + $0x8c] sm:$0xf]  ;;  %v2770_v43 = vld [vmem:[%s5540_s1 + $0x98] sm:$0xf0]  ;;  %v2765_v45 = vor.u32 %v3228_v37, %v2762_v39  ;;  %v2769_v46 = vor.u32 %v3231_v41, %v2768_v40  ;;  %v2744_v47 = vld [vmem:[%s5540_s1 + $0x60] sm:$0xf] }
   0xc   :  { %269 = vmatpush.bf16.msra.mxu0 %v2777_v29  ;;  %v3226_v48 = vld [vmem:[%s5540_s1 + $0x6c] sm:$0xf0]  ;;  %v3224_v49 = vld [vmem:[%s5540_s1 + $0x64] sm:$0xf]  ;;  %v2773_v50 = vor.u32 %v3229_v42, %v2770_v43  ;;  %v2746_v51 = vld [vmem:[%s5540_s1 + $0x70] sm:$0xf0] }
   0xd   :  { %298 = vmatpush.bf16.msra.mxu1 %v2781_v33  ;;  %327 = vmatpush.bf16.msra.mxu2 %v2785_v34  ;;  %v2752_v52 = vld [vmem:[%s5540_s1 + $0x68] sm:$0xf]  ;;  %v3227_v53 = vld [vmem:[%s5540_s1 + $0x74] sm:$0xf0]  ;;  %v3225_v54 = vld [vmem:[%s5540_s1 + $0x6c] sm:$0xf]  ;;  %v2745_v56 = vor.u32 %v3226_v48, %v2744_v47  ;;  %v2749_v57 = vor.u32 %v3224_v49, %v2746_v51 }
   0xe   :  { %356 = vmatpush.bf16.msra.mxu3 %v2789_v38  ;;  %v2754_v55 = vld [vmem:[%s5540_s1 + $0x78] sm:$0xf0]  ;;  %v2753_v58 = vor.u32 %v3227_v53, %v2752_v52  ;;  %v2728_v59 = vld [vmem:[%s5540_s1 + $0x40] sm:$0xf]  ;;  %v3222_v60 = vld [vmem:[%s5540_s1 + $0x4c] sm:$0xf0] }
   0xf   :  { %v3220_v61 = vld [vmem:[%s5540_s1 + $0x44] sm:$0xf]  ;;  %v2757_v62 = vor.u32 %v3225_v54, %v2754_v55  ;;  %v2730_v63 = vld [vmem:[%s5540_s1 + $0x50] sm:$0xf0]  ;;  %v2736_v0 = vld [vmem:[%s5540_s1 + $0x48] sm:$0xf]  ;;  %v2729_v4 = vor.u32 %v3222_v60, %v2728_v59 }
  0x10   :  { %270 = vmatpush.bf16.msra.mxu0 %v2761_v44  ;;  %v3223_v1 = vld [vmem:[%s5540_s1 + $0x54] sm:$0xf0]  ;;  %v3221_v2 = vld [vmem:[%s5540_s1 + $0x4c] sm:$0xf]  ;;  %v2738_v3 = vld [vmem:[%s5540_s1 + $0x58] sm:$0xf0]  ;;  %v2733_v5 = vor.u32 %v3220_v61, %v2730_v63 }
  0x11   :  { %299 = vmatpush.bf16.msra.mxu1 %v2765_v45  ;;  %328 = vmatpush.bf16.msra.mxu2 %v2769_v46  ;;  %v2737_v6 = vor.u32 %v3223_v1, %v2736_v0  ;;  %v2712_v7 = vld [vmem:[%s5540_s1 + $0x20] sm:$0xf]  ;;  %v3218_v8 = vld [vmem:[%s5540_s1 + $0x2c] sm:$0xf0]  ;;  %v3216_v9 = vld [vmem:[%s5540_s1 + $0x24] sm:$0xf]  ;;  %v2741_v10 = vor.u32 %v3221_v2, %v2738_v3 }
  0x12   :  { %357 = vmatpush.bf16.msra.mxu3 %v2773_v50  ;;  %v2714_v11 = vld [vmem:[%s5540_s1 + $0x30] sm:$0xf0]  ;;  %v2720_v12 = vld [vmem:[%s5540_s1 + $0x28] sm:$0xf]  ;;  %v3219_v13 = vld [vmem:[%s5540_s1 + $0x34] sm:$0xf0]  ;;  %v2713_v16 = vor.u32 %v3218_v8, %v2712_v7 }
  0x13   :  { %v3217_v14 = vld [vmem:[%s5540_s1 + $0x2c] sm:$0xf]  ;;  %v2722_v15 = vld [vmem:[%s5540_s1 + $0x38] sm:$0xf0]  ;;  %v2696_v17 = vld [vmem:[%s5540_s1] sm:$0xf]  ;;  %v2717_v18 = vor.u32 %v3216_v9, %v2714_v11  ;;  %v2721_v19 = vor.u32 %v3219_v13, %v2720_v12 }
  0x14   :  { %271 = vmatpush.bf16.msra.mxu0 %v2745_v56  ;;  %v3214_v20 = vld [vmem:[%s5540_s1 + $0xc] sm:$0xf0]  ;;  %v3212_v21 = vld [vmem:[%s5540_s1 + $0x4] sm:$0xf]  ;;  %v2698_v22 = vld [vmem:[%s5540_s1 + $0x10] sm:$0xf0]  ;;  %v2725_v23 = vor.u32 %v3217_v14, %v2722_v15 }
  0x15   :  { %300 = vmatpush.bf16.msra.mxu1 %v2749_v57  ;;  %329 = vmatpush.bf16.msra.mxu2 %v2753_v58  ;;  %v2704_v24 = vld [vmem:[%s5540_s1 + $0x8] sm:$0xf]  ;;  %v3215_v25 = vld [vmem:[%s5540_s1 + $0x14] sm:$0xf0]  ;;  %v3213_v26 = vld [vmem:[%s5540_s1 + $0xc] sm:$0xf]  ;;  %v2697_v30 = vor.u32 %v3214_v20, %v2696_v17  ;;  %v2701_v33 = vor.u32 %v3212_v21, %v2698_v22 }
  0x16   :  { %358 = vmatpush.bf16.msra.mxu3 %v2757_v62  ;;  %v2706_v27 = vld [vmem:[%s5540_s1 + $0x18] sm:$0xf0]  ;;  %v2936_v28 = vld [vmem:[%s5541_s2 + $0xe0] sm:$0xf]  ;;  %v3274_v29 = vld [vmem:[%s5541_s2 + $0xec] sm:$0xf0]  ;;  %v2705_v34 = vor.u32 %v3215_v25, %v2704_v24 }
  0x17   :  { %v3272_v31 = vld [vmem:[%s5541_s2 + $0xe4] sm:$0xf]  ;;  %v2938_v32 = vld [vmem:[%s5541_s2 + $0xf0] sm:$0xf0]  ;;  %v2709_v36 = vor.u32 %v3213_v26, %v2706_v27  ;;  %v3749_v37 = vor.u32 %v3274_v29, %v2936_v28  ;;  %v2944_v38 = vld [vmem:[%s5541_s2 + $0xe8] sm:$0xf] }
  0x18   :  { %272 = vmatpush.bf16.msra.mxu0 %v2729_v4  ;;  %v3208_v35 = vld [vmem:[%s5542_s0] sm:$0xff]  ;;  %v3275_v39 = vld [vmem:[%s5541_s2 + $0xf4] sm:$0xf0]  ;;  %v3273_v40 = vld [vmem:[%s5541_s2 + $0xec] sm:$0xf]  ;;  %v3760_v41 = vor.u32 %v3272_v31, %v2938_v32 }
  0x19   :  { %301 = vmatpush.bf16.msra.mxu1 %v2733_v5  ;;  %330 = vmatpush.bf16.msra.mxu2 %v2737_v6  ;;  %v2946_v42 = vld [vmem:[%s5541_s2 + $0xf8] sm:$0xf0]  ;;  %v2920_v43 = vld [vmem:[%s5541_s2 + $0xc0] sm:$0xf]  ;;  %v3270_v44 = vld [vmem:[%s5541_s2 + $0xcc] sm:$0xf0]  ;;  %v3777_v47 = vor.u32 %v3275_v39, %v2944_v38 }
  0x1a   :  { %359 = vmatpush.bf16.msra.mxu3 %v2741_v10  ;;  %5739 = vst [vmem:[#allocation7_spill] sm:$0xff] %v3760_v41  ;;  %v3268_v45 = vld [vmem:[%s5541_s2 + $0xc4] sm:$0xf]  ;;  %v2922_v46 = vld [vmem:[%s5541_s2 + $0xd0] sm:$0xf0]  ;;  %v3780_v48 = vor.u32 %v3273_v40, %v2946_v42  ;;  %v3782_v49 = vor.u32 %v3270_v44, %v2920_v43 }
  0x1b   :  { %v2928_v50 = vld [vmem:[%s5541_s2 + $0xc8] sm:$0xf]  ;;  %v3271_v51 = vld [vmem:[%s5541_s2 + $0xd4] sm:$0xf0]  ;;  %v3269_v52 = vld [vmem:[%s5541_s2 + $0xcc] sm:$0xf]  ;;  %v3794_v53 = vor.u32 %v3268_v45, %v2922_v46 }
  0x1c   :  { %273 = vmatpush.bf16.msra.mxu0 %v2713_v16  ;;  %5740 = vst [vmem:[#allocation8_spill] sm:$0xff] %v3780_v48  ;;  %v2930_v54 = vld [vmem:[%s5541_s2 + $0xd8] sm:$0xf0]  ;;  %v2904_v55 = vld [vmem:[%s5541_s2 + $0xa0] sm:$0xf]  ;;  %v3812_v59 = vor.u32 %v3271_v51, %v2928_v50 }
  0x1d   :  { %302 = vmatpush.bf16.msra.mxu1 %v2717_v18  ;;  %331 = vmatpush.bf16.msra.mxu2 %v2721_v19  ;;  %5741 = vst [vmem:[#allocation9_spill] sm:$0xff] %v3794_v53  ;;  %v3266_v56 = vld [vmem:[%s5541_s2 + $0xac] sm:$0xf0]  ;;  %v3264_v57 = vld [vmem:[%s5541_s2 + $0xa4] sm:$0xf]  ;;  %v3816_v60 = vor.u32 %v3269_v52, %v2930_v54  ;;  %v3209_v19 = vld [vmem:[%s5542_s0 + $0x8] sm:$0xff] }
  0x1e   :  { %360 = vmatpush.bf16.msra.mxu3 %v2725_v23  ;;  %v2906_v58 = vld [vmem:[%s5541_s2 + $0xb0] sm:$0xf0]  ;;  %v3818_v61 = vor.u32 %v3266_v56, %v2904_v55  ;;  %v2912_v62 = vld [vmem:[%s5541_s2 + $0xa8] sm:$0xf]  ;;  %v3267_v63 = vld [vmem:[%s5541_s2 + $0xb4] sm:$0xf0] }
  0x1f   :  { %5742 = vst [vmem:[#allocation10_spill] sm:$0xff] %v3816_v60  ;;  %v3265_v0 = vld [vmem:[%s5541_s2 + $0xac] sm:$0xf]  ;;  %v3830_v1 = vor.u32 %v3264_v57, %v2906_v58  ;;  %v2914_v2 = vld [vmem:[%s5541_s2 + $0xb8] sm:$0xf0]  ;;  %v3848_v7 = vor.u32 %v3267_v63, %v2912_v62 }
  0x20   :  { %274 = vmatpush.bf16.msra.mxu0 %v2697_v30  ;;  %v2888_v3 = vld [vmem:[%s5541_s2 + $0x80] sm:$0xf]  ;;  %v3262_v4 = vld [vmem:[%s5541_s2 + $0x8c] sm:$0xf0]  ;;  %v3260_v5 = vld [vmem:[%s5541_s2 + $0x84] sm:$0xf]  ;;  %v3852_v8 = vor.u32 %v3265_v0, %v2914_v2 }
  0x21   :  { %303 = vmatpush.bf16.msra.mxu1 %v2701_v33  ;;  %332 = vmatpush.bf16.msra.mxu2 %v2705_v34  ;;  %5743 = vst [vmem:[#allocation11_spill] sm:$0xff] %v3830_v1  ;;  %v2890_v6 = vld [vmem:[%s5541_s2 + $0x90] sm:$0xf0]  ;;  %v3854_v9 = vor.u32 %v3262_v4, %v2888_v3  ;;  %v2896_v10 = vld [vmem:[%s5541_s2 + $0x88] sm:$0xf] }
  0x22   :  { %361 = vmatpush.bf16.msra.mxu3 %v2709_v36  ;;  %5744 = vst [vmem:[#allocation12_spill] sm:$0xff] %v3852_v8  ;;  %v3263_v11 = vld [vmem:[%s5541_s2 + $0x94] sm:$0xf0]  ;;  %v3261_v12 = vld [vmem:[%s5541_s2 + $0x8c] sm:$0xf]  ;;  %v3866_v13 = vor.u32 %v3260_v5, %v2890_v6 }
  0x23   :  { %275 = vmatmul.bf16.vlgmr.msra.gmra.mxu0 %v3208_v35  ;;  %5745 = vst [vmem:[#allocation13_spill] sm:$0xff] %v3854_v9  ;;  %v2898_v14 = vld [vmem:[%s5541_s2 + $0x98] sm:$0xf0]  ;;  %v2872_v15 = vld [vmem:[%s5541_s2 + $0x60] sm:$0xf]  ;;  %v3887_v20 = vor.u32 %v3263_v11, %v2896_v10 }
  0x24   :  { %693 = vmatpush.bf16.msrb.mxu0 %v3749_v37  ;;  %304 = vmatmul.bf16.vlgmr.msra.gmra.mxu1 %v3208_v35  ;;  %5746 = vst [vmem:[#allocation14_spill] sm:$0xff] %v3866_v13  ;;  %v3258_v16 = vld [vmem:[%s5541_s2 + $0x6c] sm:$0xf0]  ;;  %v3256_v17 = vld [vmem:[%s5541_s2 + $0x64] sm:$0xf]  ;;  %v3891_v21 = vor.u32 %v3261_v12, %v2898_v14 }
  0x25   :  { %706 = vmatpush.bf16.msrb.mxu1 %v3760_v41  ;;  %333 = vmatmul.bf16.vlgmr.msra.gmra.mxu2 %v3208_v35  ;;  %v2874_v18 = vld [vmem:[%s5541_s2 + $0x70] sm:$0xf0]  ;;  %5747 = vst [vmem:[#allocation15_spill] sm:$0xff] %v3887_v20  ;;  %v3893_v22 = vor.u32 %v3258_v16, %v2872_v15  ;;  %v2880_v23 = vld [vmem:[%s5541_s2 + $0x68] sm:$0xf] }
  0x26   :  { %362 = vmatmul.bf16.vlgmr.msra.gmra.mxu3 %v3208_v35  ;;  %719 = vmatpush.bf16.msrb.mxu2 %v3777_v47  ;;  %5748 = vst [vmem:[#allocation16_spill] sm:$0xff] %v3891_v21  ;;  %v3259_v24 = vld [vmem:[%s5541_s2 + $0x74] sm:$0xf0]  ;;  %v3257_v25 = vld [vmem:[%s5541_s2 + $0x6c] sm:$0xf]  ;;  %v3905_v26 = vor.u32 %v3256_v17, %v2874_v18  ;;  %v3210_v16 = vld [vmem:[%s5542_s0 + $0x10] sm:$0xff] }
  0x27   :  { %732 = vmatpush.bf16.msrb.mxu3 %v3780_v48  ;;  %5749 = vst [vmem:[#allocation17_spill] sm:$0xff] %v3893_v22  ;;  %v2882_v27 = vld [vmem:[%s5541_s2 + $0x78] sm:$0xf0]  ;;  %v2856_v28 = vld [vmem:[%s5541_s2 + $0x40] sm:$0xf]  ;;  %v3923_v32 = vor.u32 %v3259_v24, %v2880_v23  ;;  %v5550_v18 = vmov 0.0|0.0  }
  0x28   :  { %694 = vmatpush.bf16.msrb.mxu0 %v3782_v49  ;;  %5750 = vst [vmem:[#allocation18_spill] sm:$0xff] %v3905_v26  ;;  %v3254_v29 = vld [vmem:[%s5541_s2 + $0x4c] sm:$0xf0]  ;;  %v3252_v30 = vld [vmem:[%s5541_s2 + $0x44] sm:$0xf]  ;;  %v3927_v33 = vor.u32 %v3257_v25, %v2882_v27  ;;  %v3211_v17 = vld [vmem:[%s5542_s0 + $0x18] sm:$0xff] }
  0x29   :  { %707 = vmatpush.bf16.msrb.mxu1 %v3794_v53  ;;  %v2858_v31 = vld [vmem:[%s5541_s2 + $0x50] sm:$0xf0]  ;;  %5751 = vst [vmem:[#allocation19_spill] sm:$0xff] %v3923_v32  ;;  %v3929_v34 = vor.u32 %v3254_v29, %v2856_v28  ;;  %v2864_v35 = vld [vmem:[%s5541_s2 + $0x48] sm:$0xf] }
  0x2a   :  { %720 = vmatpush.bf16.msrb.mxu2 %v3812_v59  ;;  %5752 = vst [vmem:[#allocation20_spill] sm:$0xff] %v3927_v33  ;;  %v3255_v36 = vld [vmem:[%s5541_s2 + $0x54] sm:$0xf0]  ;;  %v3938_v38 = vor.u32 %v3252_v30, %v2858_v31  ;;  %v3253_v39 = vld [vmem:[%s5541_s2 + $0x4c] sm:$0xf] }
  0x2b   :  { %733 = vmatpush.bf16.msrb.mxu3 %v3816_v60  ;;  %5753 = vst [vmem:[#allocation21_spill] sm:$0xff] %v3929_v34  ;;  %v2866_v40 = vld [vmem:[%s5541_s2 + $0x58] sm:$0xf0]  ;;  %v3947_v42 = vor.u32 %v3255_v36, %v2864_v35  ;;  %v2840_v43 = vld [vmem:[%s5541_s2 + $0x20] sm:$0xf] }
  0x2c   :  { %695 = vmatpush.bf16.msrb.mxu0 %v3818_v61  ;;  %5754 = vst [vmem:[#allocation22_spill] sm:$0xff] %v3938_v38  ;;  %v3250_v44 = vld [vmem:[%s5541_s2 + $0x2c] sm:$0xf0]  ;;  %v3248_v45 = vld [vmem:[%s5541_s2 + $0x24] sm:$0xf]  ;;  %v3960_v46 = vor.u32 %v3253_v39, %v2866_v40 }
  0x2d   :  { %708 = vmatpush.bf16.msrb.mxu1 %v3830_v1  ;;  %5755 = vst [vmem:[#allocation23_spill] sm:$0xff] %v3947_v42  ;;  %v3962_v50 = vor.u32 %v3250_v44, %v2840_v43  ;;  %v2842_v51 = vld [vmem:[%s5541_s2 + $0x30] sm:$0xf0]  ;;  %v2848_v52 = vld [vmem:[%s5541_s2 + $0x28] sm:$0xf] }
  0x2e   :  { %721 = vmatpush.bf16.msrb.mxu2 %v3848_v7  ;;  %v3251_v54 = vld [vmem:[%s5541_s2 + $0x34] sm:$0xf0]  ;;  %v3974_v55 = vor.u32 %v3248_v45, %v2842_v51  ;;  %v3249_v56 = vld [vmem:[%s5541_s2 + $0x2c] sm:$0xf]  ;;  %v2850_v57 = vld [vmem:[%s5541_s2 + $0x38] sm:$0xf0] }
  0x2f   :  { %734 = vmatpush.bf16.msrb.mxu3 %v3852_v8  ;;  %5756 = vst [vmem:[#allocation24_spill] sm:$0xff] %v3962_v50  ;;  %v2824_v58 = vld [vmem:[%s5541_s2] sm:$0xf]  ;;  %v3246_v62 = vld [vmem:[%s5541_s2 + $0xc] sm:$0xf0]  ;;  %v3995_v2 = vor.u32 %v3251_v54, %v2848_v52  ;;  %v3999_v3 = vor.u32 %v3249_v56, %v2850_v57 }
  0x30   :  { %696 = vmatpush.bf16.msrb.mxu0 %v3854_v9  ;;  %5757 = vst [vmem:[#allocation25_spill] sm:$0xff] %v3974_v55  ;;  %v3244_v63 = vld [vmem:[%s5541_s2 + $0x4] sm:$0xf]  ;;  %v2826_v0 = vld [vmem:[%s5541_s2 + $0x10] sm:$0xf0]  ;;  %v4001_v4 = vor.u32 %v3246_v62, %v2824_v58 }
  0x31   :  { %709 = vmatpush.bf16.msrb.mxu1 %v3866_v13  ;;  %5758 = vst [vmem:[#allocation26_spill] sm:$0xff] %v3995_v2  ;;  %v2832_v5 = vld [vmem:[%s5541_s2 + $0x8] sm:$0xf]  ;;  %v3247_v6 = vld [vmem:[%s5541_s2 + $0x14] sm:$0xf0]  ;;  %v4010_v10 = vor.u32 %v3244_v63, %v2826_v0 }
  0x32   :  { %722 = vmatpush.bf16.msrb.mxu2 %v3887_v20  ;;  %5759 = vst [vmem:[#allocation27_spill] sm:$0xff] %v3999_v3  ;;  %v3245_v11 = vld [vmem:[%s5541_s2 + $0xc] sm:$0xf]  ;;  %v2834_v12 = vld [vmem:[%s5541_s2 + $0x18] sm:$0xf0]  ;;  %v4019_v14 = vor.u32 %v3247_v6, %v2832_v5 }
  0x33   :  { %735 = vmatpush.bf16.msrb.mxu3 %v3891_v21  ;;  %280 = vmatmul.bf16.gmra.mxu0 %v3209_v19  ;;  %5760 = vst [vmem:[#allocation28_spill] sm:$0xff] %v4001_v4  ;;  %v4023_v15 = vor.u32 %v3245_v11, %v2834_v12  ;;  %v3338_v23 = vld [vmem:[%s5543_s4 + $0x1ec] sm:$0xf0]  ;;  %v3336_v24 = vld [vmem:[%s5543_s4 + $0x1e4] sm:$0xf] }
  0x34   :  { %697 = vmatpush.bf16.msrb.mxu0 %v3893_v22  ;;  %309 = vmatmul.bf16.gmra.mxu1 %v3209_v19  ;;  %5761 = vst [vmem:[#allocation29_spill] sm:$0xff] %v4010_v10  ;;  %v3194_v27 = vld [vmem:[%s5543_s4 + $0x1f0] sm:$0xf0]  ;;  %v3176_v29 = vld [vmem:[%s5543_s4 + $0x1c0] sm:$0xf] }
  0x35   :  { %710 = vmatpush.bf16.msrb.mxu1 %v3905_v26  ;;  %338 = vmatmul.bf16.gmra.mxu2 %v3209_v19  ;;  %5762 = vst [vmem:[#allocation30_spill] sm:$0xff] %v4019_v14  ;;  %v4052_v28 = vor.u32 %v3336_v24, %v3194_v27  ;;  %v3334_v30 = vld [vmem:[%s5543_s4 + $0x1cc] sm:$0xf0]  ;;  %v3332_v31 = vld [vmem:[%s5543_s4 + $0x1c4] sm:$0xf] }
  0x36   :  { %367 = vmatmul.bf16.gmra.mxu3 %v3209_v19  ;;  %723 = vmatpush.bf16.msrb.mxu2 %v3923_v32  ;;  %v3192_v19 = vld [vmem:[%s5543_s4 + $0x1e0] sm:$0xf]  ;;  %v4065_v35 = vor.u32 %v3334_v30, %v3176_v29  ;;  %v3178_v36 = vld [vmem:[%s5543_s4 + $0x1d0] sm:$0xf0]  ;;  %v3330_v43 = vld [vmem:[%s5543_s4 + $0x1ac] sm:$0xf0] }
  0x37   :  { %736 = vmatpush.bf16.msrb.mxu3 %v3927_v33  ;;  %v4047_v25 = vor.u32 %v3338_v23, %v3192_v19  ;;  %v4070_v39 = vor.u32 %v3332_v31, %v3178_v36  ;;  %v3160_v40 = vld [vmem:[%s5543_s4 + $0x1a0] sm:$0xf]  ;;  %v3328_v44 = vld [vmem:[%s5543_s4 + $0x1a4] sm:$0xf]  ;;  %v3162_v51 = vld [vmem:[%s5543_s4 + $0x1b0] sm:$0xf0] }
  0x38   :  { %698 = vmatpush.bf16.msrb.mxu0 %v3929_v34  ;;  %v4083_v45 = vor.u32 %v3330_v43, %v3160_v40  ;;  %v4088_v52 = vor.u32 %v3328_v44, %v3162_v51  ;;  %v3144_v54 = vld [vmem:[%s5543_s4 + $0x180] sm:$0xf]  ;;  %v3326_v56 = vld [vmem:[%s5543_s4 + $0x18c] sm:$0xf0]  ;;  %v3324_v57 = vld [vmem:[%s5543_s4 + $0x184] sm:$0xf] }
  0x39   :  { %711 = vmatpush.bf16.msrb.mxu1 %v3938_v38  ;;  %5763 = vst [vmem:[#allocation31_spill] sm:$0xff] %v4047_v25  ;;  %v4101_v58 = vor.u32 %v3326_v56, %v3144_v54  ;;  %v3146_v62 = vld [vmem:[%s5543_s4 + $0x190] sm:$0xf0]  ;;  %v3128_v0 = vld [vmem:[%s5543_s4 + $0x160] sm:$0xf] }
  0x3a   :  { %724 = vmatpush.bf16.msrb.mxu2 %v3947_v42  ;;  %5764 = vst [vmem:[#allocation32_spill] sm:$0xff] %v4083_v45  ;;  %v4106_v63 = vor.u32 %v3324_v57, %v3146_v62  ;;  %v3322_v5 = vld [vmem:[%s5543_s4 + $0x16c] sm:$0xf0]  ;;  %v3320_v6 = vld [vmem:[%s5543_s4 + $0x164] sm:$0xf] }
  0x3b   :  { %737 = vmatpush.bf16.msrb.mxu3 %v3960_v46  ;;  %v4119_v11 = vor.u32 %v3322_v5, %v3128_v0  ;;  %v3130_v12 = vld [vmem:[%s5543_s4 + $0x170] sm:$0xf0]  ;;  %v3318_v19 = vld [vmem:[%s5543_s4 + $0x14c] sm:$0xf0]  ;;  %v3316_v23 = vld [vmem:[%s5543_s4 + $0x144] sm:$0xf] }
  0x3c   :  { %699 = vmatpush.bf16.msrb.mxu0 %v3962_v50  ;;  %v3114_v27 = vld [vmem:[%s5543_s4 + $0x150] sm:$0xf0]  ;;  %v3096_v30 = vld [vmem:[%s5543_s4 + $0x120] sm:$0xf]  ;;  %v3314_v31 = vld [vmem:[%s5543_s4 + $0x12c] sm:$0xf0] }
  0x3d   :  { %712 = vmatpush.bf16.msrb.mxu1 %v3974_v55  ;;  %5765 = vst [vmem:[#allocation33_spill] sm:$0xff] %v4119_v11  ;;  %v4142_v29 = vor.u32 %v3316_v23, %v3114_v27  ;;  %v3312_v36 = vld [vmem:[%s5543_s4 + $0x124] sm:$0xf]  ;;  %v4155_v40 = vor.u32 %v3314_v31, %v3096_v30  ;;  %v3098_v43 = vld [vmem:[%s5543_s4 + $0x130] sm:$0xf0] }
  0x3e   :  { %725 = vmatpush.bf16.msrb.mxu2 %v3995_v2  ;;  %v4160_v44 = vor.u32 %v3312_v36, %v3098_v43  ;;  %v3080_v56 = vld [vmem:[%s5543_s4 + $0x100] sm:$0xf]  ;;  %v3310_v57 = vld [vmem:[%s5543_s4 + $0x10c] sm:$0xf0]  ;;  %v3308_v62 = vld [vmem:[%s5543_s4 + $0x104] sm:$0xf] }
  0x3f   :  { %738 = vmatpush.bf16.msrb.mxu3 %v3999_v3  ;;  %5768 = vst [vmem:[#allocation36_spill] sm:$0xff] %v4142_v29  ;;  %v4177_v0 = vor.u32 %v3310_v57, %v3080_v56  ;;  %v3082_v5 = vld [vmem:[%s5543_s4 + $0x110] sm:$0xf0]  ;;  %v3337_v23 = vld [vmem:[%s5543_s4 + $0x1ec] sm:$0xf] }
  0x40   :  { %700 = vmatpush.bf16.msrb.mxu0 %v4001_v4  ;;  %5769 = vst [vmem:[#allocation37_spill] sm:$0xff] %v4155_v40  ;;  %v3202_v27 = vld [vmem:[%s5543_s4 + $0x1f8] sm:$0xf0]  ;;  %v3064_v31 = vld [vmem:[%s5543_s4 + $0xe0] sm:$0xf] }
  0x41   :  { %713 = vmatpush.bf16.msrb.mxu1 %v4010_v10  ;;  %5770 = vst [vmem:[#allocation38_spill] sm:$0xff] %v4160_v44  ;;  %v4199_v30 = vor.u32 %v3337_v23, %v3202_v27  ;;  %v3306_v36 = vld [vmem:[%s5543_s4 + $0xec] sm:$0xf0]  ;;  %v3304_v43 = vld [vmem:[%s5543_s4 + $0xe4] sm:$0xf] }
  0x42   :  { %726 = vmatpush.bf16.msrb.mxu2 %v4019_v14  ;;  %5771 = vst [vmem:[#allocation39_spill] sm:$0xff] %v4177_v0  ;;  %v4213_v56 = vor.u32 %v3306_v36, %v3064_v31  ;;  %v3066_v57 = vld [vmem:[%s5543_s4 + $0xf0] sm:$0xf0]  ;;  %v3333_v27 = vld [vmem:[%s5543_s4 + $0x1cc] sm:$0xf] }
  0x43   :  { %739 = vmatpush.bf16.msrb.mxu3 %v4023_v15  ;;  %285 = vmatmul.bf16.gmra.mxu0 %v3210_v16  ;;  %5774 = vst [vmem:[#allocation42_spill] sm:$0xff] %v4199_v30  ;;  %v3186_v31 = vld [vmem:[%s5543_s4 + $0x1d8] sm:$0xf0]  ;;  %v73_v4 = vld [vmem:[%s5544_s3] sm:$0xf] }
  0x44   :  { %314 = vmatmul.bf16.gmra.mxu1 %v3210_v16  ;;  %5775 = vst [vmem:[#allocation43_spill] sm:$0xff] %v4213_v56  ;;  %1089 = vmatpush.bf16.msra.mxu0 %v4213_v56  ;;  %v3154_v34 = vld [vmem:[%s5543_s4 + $0x198] sm:$0xf0]  ;;  %v4323_v32 = vperm.slane %v73_v4, 1 }
  0x45   :  { %343 = vmatmul.bf16.gmra.mxu2 %v3210_v16  ;;  %1102 = vmatpush.bf16.msra.mxu1 %v4047_v25 }
  0x46   :  { %372 = vmatmul.bf16.gmra.mxu3 %v3210_v16  ;;  %v4124_v16 = vor.u32 %v3320_v6, %v3130_v12  ;;  %v3200_v6 = vld [vmem:[%s5543_s4 + $0x1e8] sm:$0xf]  ;;  %v3339_v12 = vld [vmem:[%s5543_s4 + $0x1f4] sm:$0xf0]  ;;  %5790 = vst [vmem:[#allocation58_spill] sm:$0xff] %v4323_v32 }
  0x47   :  { %1128 = vmatpush.bf16.msra.mxu3 %v4052_v28 }
  0x48   :  { %5766 = vst [vmem:[#allocation34_spill] sm:$0xff] %v4124_v16 }
  0x49   :  { %1103 = vmatpush.bf16.msra.mxu1 %v4065_v35 }
  0x4b   :  { %1129 = vmatpush.bf16.msra.mxu3 %v4070_v39 }
  0x4d   :  { %1104 = vmatpush.bf16.msra.mxu1 %v4083_v45 }
  0x4f   :  { %1130 = vmatpush.bf16.msra.mxu3 %v4088_v52 }
  0x51   :  { %1105 = vmatpush.bf16.msra.mxu1 %v4101_v58 }
  0x53   :  { %290 = vmatmul.bf16.gmra.mxu0 %v3211_v17  ;;  %1131 = vmatpush.bf16.msra.mxu3 %v4106_v63 }
  0x54   :  { %319 = vmatmul.bf16.gmra.mxu1 %v3211_v17 }
  0x55   :  { %348 = vmatmul.bf16.gmra.mxu2 %v3211_v17  ;;  %1106 = vmatpush.bf16.msra.mxu1 %v4119_v11 }
  0x56   :  { %377 = vmatmul.bf16.gmra.mxu3 %v3211_v17  ;;  %v3112_v17 = vld [vmem:[%s5543_s4 + $0x140] sm:$0xf] }
  0x57   :  { %1132 = vmatpush.bf16.msra.mxu3 %v4124_v16  ;;  %v4137_v24 = vor.u32 %v3318_v19, %v3112_v17  ;;  %v4188_v17 = vor.u32 %v3308_v62, %v3082_v5  ;;  %v4190_v19 = vor.u32 %v3339_v12, %v3200_v6  ;;  %v3184_v62 = vld [vmem:[%s5543_s4 + $0x1c8] sm:$0xf]  ;;  %v3335_v5 = vld [vmem:[%s5543_s4 + $0x1d4] sm:$0xf0]  ;;  %v4226_v12 = vor.u32 %v3304_v43, %v3066_v57 }
  0x58   :  { %v4228_v23 = vor.u32 %v3335_v5, %v3184_v62  ;;  %v4242_v43 = vor.u32 %v3333_v27, %v3186_v31  ;;  %v3048_v62 = vld [vmem:[%s5543_s4 + $0xc0] sm:$0xf]  ;;  %v3302_v5 = vld [vmem:[%s5543_s4 + $0xcc] sm:$0xf0]  ;;  %v3300_v27 = vld [vmem:[%s5543_s4 + $0xc4] sm:$0xf] }
  0x59   :  { %5767 = vst [vmem:[#allocation35_spill] sm:$0xff] %v4137_v24  ;;  %1107 = vmatpush.bf16.msra.mxu1 %v4137_v24  ;;  %1115 = vmatpush.bf16.msra.mxu2 %v4226_v12  ;;  %v4259_v31 = vor.u32 %v3302_v5, %v3048_v62  ;;  %v3329_v62 = vld [vmem:[%s5543_s4 + $0x1ac] sm:$0xf]  ;;  %v3170_v5 = vld [vmem:[%s5543_s4 + $0x1b8] sm:$0xf0] }
  0x5a   :  { %5772 = vst [vmem:[#allocation40_spill] sm:$0xff] %v4188_v17  ;;  %v4284_v2 = vor.u32 %v3329_v62, %v3170_v5  ;;  %v3034_v62 = vld [vmem:[%s5543_s4 + $0xb0] sm:$0xf0]  ;;  %v3152_v5 = vld [vmem:[%s5543_s4 + $0x188] sm:$0xf] }
  0x5b   :  { %1133 = vmatpush.bf16.msra.mxu3 %v4142_v29  ;;  %5773 = vst [vmem:[#allocation41_spill] sm:$0xff] %v4190_v19  ;;  %1090 = vmatpush.bf16.msra.mxu0 %v4259_v31 }
  0x5c   :  { %5776 = vst [vmem:[#allocation44_spill] sm:$0xff] %v4226_v12 }
  0x5d   :  { %1108 = vmatpush.bf16.msra.mxu1 %v4155_v40  ;;  %5777 = vst [vmem:[#allocation45_spill] sm:$0xff] %v4228_v23 }
  0x5e   :  { %5779 = vst [vmem:[#allocation47_spill] sm:$0xff] %v4242_v43 }
  0x5f   :  { %1134 = vmatpush.bf16.msra.mxu3 %v4160_v44  ;;  %5781 = vst [vmem:[#allocation49_spill] sm:$0xff] %v4259_v31  ;;  %v4309_v31 = vperm.slane %v73_v4, 0 }
  0x60   :  { %5784 = vst [vmem:[#allocation52_spill] sm:$0xff] %v4284_v2 }
  0x61   :  { %1109 = vmatpush.bf16.msra.mxu1 %v4177_v0  ;;  %5786 = vst [vmem:[#allocation54_spill] sm:$0xff] %v4309_v31 }
  0x63   :  { %701 = vmatmul.bf16.vlgmr.msrb.gmra.mxu0 %v5550_v18  ;;  %1135 = vmatpush.bf16.msra.mxu3 %v4188_v17 }
  0x64   :  { %714 = vmatmul.bf16.vlgmr.msrb.gmra.mxu1 %v5550_v18 }
  0x65   :  { %727 = vmatmul.bf16.vlgmr.msrb.gmra.mxu2 %v5550_v18  ;;  %1154 = vmatpush.bf16.msrb.mxu1 %v4190_v19 }
  0x66   :  { %740 = vmatmul.bf16.vlgmr.msrb.gmra.mxu3 %v5550_v18 }
  0x67   :  { %1180 = vmatpush.bf16.msrb.mxu3 %v4199_v30 }
  0x69   :  { %1155 = vmatpush.bf16.msrb.mxu1 %v4228_v23 }
  0x6b   :  { %1181 = vmatpush.bf16.msrb.mxu3 %v4242_v43 }
  0x6f   :  { %1182 = vmatpush.bf16.msrb.mxu3 %v4284_v2 }
  0x74   :  { %1110 = vmatmul.bf16.vlgmr.msra.gmra.mxu1 %v5550_v18 }
  0x76   :  { %1136 = vmatmul.bf16.vlgmr.msra.gmra.mxu3 %v5550_v18  ;;  %v3050_v18 = vld [vmem:[%s5543_s4 + $0xd0] sm:$0xf0] }
  0x77   :  { %v4270_v12 = vor.u32 %v3300_v27, %v3050_v18  ;;  %v3298_v18 = vld [vmem:[%s5543_s4 + $0xac] sm:$0xf0] }
  0x79   :  { %5782 = vst [vmem:[#allocation50_spill] sm:$0xff] %v4270_v12  ;;  %1116 = vmatpush.bf16.msra.mxu2 %v4270_v12  ;;  %v3327_v12 = vld [vmem:[%s5543_s4 + $0x194] sm:$0xf0] }
  0xa0   :  { %v4162_v51 = vpop.f32.mrf.mxu0 }
  0xa1   :  { %v4165_v54 = vpop.f32.mrf.mxu1 }
  0xa8   :  { %v4224_v6 = vpop.f32.mrf.mxu2  ;;  %v4239_v14 = vpop.f32.mrf.mxu0 }
  0xa9   :  { %v4237_v36 = vpop.f32.mrf.mxu3  ;;  %5778 = vst [vmem:[#allocation46_spill] sm:$0xff] %v4239_v14  ;;  %v4245_v57 = vpop.f32.mrf.mxu1  ;;  %v3168_v14 = vld [vmem:[%s5543_s4 + $0x1a8] sm:$0xf] }
  0xaa   :  { %5780 = vst [vmem:[#allocation48_spill] sm:$0xff] %v4245_v57  ;;  %v3331_v57 = vld [vmem:[%s5543_s4 + $0x1b4] sm:$0xf0] }
  0xab   :  { %v4272_v56 = vor.u32 %v3331_v57, %v3168_v14  ;;  %v3032_v14 = vld [vmem:[%s5543_s4 + $0xa0] sm:$0xf]  ;;  %v3296_v57 = vld [vmem:[%s5543_s4 + $0xa4] sm:$0xf] }
  0xac   :  { %v4298_v27 = vor.u32 %v3298_v18, %v3032_v14  ;;  %v4313_v42 = vor.u32 %v3296_v57, %v3034_v62  ;;  %v4315_v14 = vor.u32 %v3327_v12, %v3152_v5  ;;  %v3325_v18 = vld [vmem:[%s5543_s4 + $0x18c] sm:$0xf]  ;;  %v3016_v62 = vld [vmem:[%s5543_s4 + $0x80] sm:$0xf]  ;;  %v3294_v5 = vld [vmem:[%s5543_s4 + $0x8c] sm:$0xf0] }
  0xad   :  { %5783 = vst [vmem:[#allocation51_spill] sm:$0xff] %v4272_v56  ;;  %1156 = vmatpush.bf16.msrb.mxu1 %v4272_v56 }
  0xae   :  { %5785 = vst [vmem:[#allocation53_spill] sm:$0xff] %v4298_v27  ;;  %1091 = vmatpush.bf16.msra.mxu0 %v4298_v27  ;;  %1117 = vmatpush.bf16.msra.mxu2 %v4313_v42 }
  0xaf   :  { %5788 = vst [vmem:[#allocation56_spill] sm:$0xff] %v4313_v42  ;;  %v3323_v42 = vld [vmem:[%s5543_s4 + $0x174] sm:$0xf0] }
  0xb0   :  { %v4311_v50 = vpop.f32.mrf.mxu2  ;;  %5789 = vst [vmem:[#allocation57_spill] sm:$0xff] %v4315_v14  ;;  %v281_v20 = vpop.f32.mrf.mxu0 }
  0xb1   :  { %5787 = vst [vmem:[#allocation55_spill] sm:$0xff] %v4311_v50  ;;  %v4325_v22 = vpop.f32.mrf.mxu3  ;;  %v4328_v50 = vor.u32 %v3325_v18, %v3154_v34  ;;  %v4331_v12 = vadd.f32 %v281_v20, %v4309_v31  ;;  %v310_v57 = vpop.f32.mrf.mxu1  ;;  %1157 = vmatpush.bf16.msrb.mxu1 %v4315_v14  ;;  %v3292_v34 = vld [vmem:[%s5543_s4 + $0x84] sm:$0xf]  ;;  %v4348_v18 = vor.u32 %v3294_v5, %v3016_v62  ;;  %v3321_v62 = vld [vmem:[%s5543_s4 + $0x16c] sm:$0xf] }
  0xb2   :  { %5791 = vst [vmem:[#allocation59_spill] sm:$0xff] %v4325_v22  ;;  %v4345_v20 = vadd.f32 %v310_v57, %v4323_v32  ;;  %v3136_v22 = vld [vmem:[%s5543_s4 + $0x168] sm:$0xf]  ;;  %v3138_v5 = vld [vmem:[%s5543_s4 + $0x178] sm:$0xf0] }
  0xb3   :  { %5792 = vst [vmem:[#allocation60_spill] sm:$0xff] %v4328_v50  ;;  %1183 = vmatpush.bf16.msrb.mxu3 %v4328_v50  ;;  %v4361_v57 = vor.u32 %v3323_v42, %v3136_v22  ;;  %1092 = vmatpush.bf16.msra.mxu0 %v4348_v18  ;;  %v4372_v50 = vor.u32 %v3321_v62, %v3138_v5  ;;  %v3000_v22 = vld [vmem:[%s5543_s4 + $0x60] sm:$0xf]  ;;  %v3290_v42 = vld [vmem:[%s5543_s4 + $0x6c] sm:$0xf0] }
  0xb4   :  { %5793 = vst [vmem:[#allocation61_spill] sm:$0xff] %v4331_v12  ;;  %v3018_v12 = vld [vmem:[%s5543_s4 + $0x90] sm:$0xf0]  ;;  %v3120_v5 = vld [vmem:[%s5543_s4 + $0x148] sm:$0xf] }
  0xb5   :  { %5794 = vst [vmem:[#allocation62_spill] sm:$0xff] %v4345_v20  ;;  %v4359_v27 = vor.u32 %v3292_v34, %v3018_v12  ;;  %v4369_v20 = vperm.slane %v73_v4, 2  ;;  %1158 = vmatpush.bf16.msrb.mxu1 %v4361_v57  ;;  %v3288_v12 = vld [vmem:[%s5543_s4 + $0x64] sm:$0xf]  ;;  %v4386_v34 = vor.u32 %v3290_v42, %v3000_v22  ;;  %v3002_v62 = vld [vmem:[%s5543_s4 + $0x70] sm:$0xf0] }
  0xb6   :  { %5795 = vst [vmem:[#allocation63_spill] sm:$0xff] %v4348_v18  ;;  %v4397_v18 = vperm.slane %v73_v4, 3  ;;  %v4399_v14 = vor.u32 %v3288_v12, %v3002_v62  ;;  %v3317_v22 = vld [vmem:[%s5543_s4 + $0x14c] sm:$0xf]  ;;  %v3122_v42 = vld [vmem:[%s5543_s4 + $0x158] sm:$0xf0] }
  0xb7   :  { %5796 = vst [vmem:[#allocation64_spill] sm:$0xff] %v4359_v27  ;;  %1118 = vmatpush.bf16.msra.mxu2 %v4359_v27  ;;  %1184 = vmatpush.bf16.msrb.mxu3 %v4372_v50  ;;  %v3319_v27 = vld [vmem:[%s5543_s4 + $0x154] sm:$0xf0]  ;;  %v4415_v4 = vor.u32 %v3317_v22, %v3122_v42  ;;  %v3286_v62 = vld [vmem:[%s5543_s4 + $0x4c] sm:$0xf0] }
  0xb8   :  { %5797 = vst [vmem:[#allocation65_spill] sm:$0xff] %v4361_v57  ;;  %v339_v57 = vpop.f32.mrf.mxu2  ;;  %v4412_v56 = vpop.f32.mrf.mxu0  ;;  %1093 = vmatpush.bf16.msra.mxu0 %v4386_v34  ;;  %v2986_v22 = vld [vmem:[%s5543_s4 + $0x50] sm:$0xf0]  ;;  %v3104_v42 = vld [vmem:[%s5543_s4 + $0x128] sm:$0xf] }
  0xb9   :  { %5798 = vst [vmem:[#allocation66_spill] sm:$0xff] %v4369_v20  ;;  %v4410_v9 = vadd.f32 %v339_v57, %v4369_v20  ;;  %v368_v2 = vpop.f32.mrf.mxu3  ;;  %v4420_v12 = vpop.f32.mrf.mxu1  ;;  %v2984_v57 = vld [vmem:[%s5543_s4 + $0x40] sm:$0xf] }
  0xba   :  { %5799 = vst [vmem:[#allocation67_spill] sm:$0xff] %v4372_v50  ;;  %v4401_v50 = vor.u32 %v3319_v27, %v3120_v5  ;;  %v4418_v27 = vadd.f32 %v368_v2, %v4397_v18  ;;  %v3284_v5 = vld [vmem:[%s5543_s4 + $0x44] sm:$0xf]  ;;  %v4434_v2 = vor.u32 %v3286_v62, %v2984_v57  ;;  %v3313_v57 = vld [vmem:[%s5543_s4 + $0x12c] sm:$0xf] }
  0xbb   :  { %5800 = vst [vmem:[#allocation68_spill] sm:$0xff] %v4386_v34  ;;  %1119 = vmatpush.bf16.msra.mxu2 %v4399_v14  ;;  %1185 = vmatpush.bf16.msrb.mxu3 %v4415_v4  ;;  %v3106_v62 = vld [vmem:[%s5543_s4 + $0x138] sm:$0xf0] }
  0xbc   :  { %5801 = vst [vmem:[#allocation69_spill] sm:$0xff] %v4397_v18  ;;  %1159 = vmatpush.bf16.msrb.mxu1 %v4401_v50  ;;  %1094 = vmatpush.bf16.msra.mxu0 %v4434_v2 }
  0xbd   :  { %5802 = vst [vmem:[#allocation70_spill] sm:$0xff] %v4399_v14 }
  0xbe   :  { %5803 = vst [vmem:[#allocation71_spill] sm:$0xff] %v4401_v50 }
  0xbf   :  { %5804 = vst [vmem:[#allocation72_spill] sm:$0xff] %v4410_v9 }
  0xc0   :  { %5805 = vst [vmem:[#allocation73_spill] sm:$0xff] %v4412_v56  ;;  %v3315_v56 = vld [vmem:[%s5543_s4 + $0x134] sm:$0xf0] }
  0xc1   :  { %5806 = vst [vmem:[#allocation74_spill] sm:$0xff] %v4415_v4  ;;  %v4447_v9 = vor.u32 %v3315_v56, %v3104_v42  ;;  %v2968_v56 = vld [vmem:[%s5543_s4 + $0x20] sm:$0xf] }
  0xc2   :  { %5807 = vst [vmem:[#allocation75_spill] sm:$0xff] %v4418_v27  ;;  %v4456_v27 = vor.u32 %v3313_v57, %v3106_v62  ;;  %v2970_v57 = vld [vmem:[%s5543_s4 + $0x30] sm:$0xf0]  ;;  %v3088_v62 = vld [vmem:[%s5543_s4 + $0x108] sm:$0xf] }
  0xc3   :  { %5808 = vst [vmem:[#allocation76_spill] sm:$0xff] %v4420_v12  ;;  %v4445_v12 = vor.u32 %v3284_v5, %v2986_v22  ;;  %1160 = vmatpush.bf16.msrb.mxu1 %v4447_v9  ;;  %v3282_v5 = vld [vmem:[%s5543_s4 + $0x2c] sm:$0xf0]  ;;  %v3280_v22 = vld [vmem:[%s5543_s4 + $0x24] sm:$0xf] }
  0xc4   :  { %5809 = vst [vmem:[#allocation77_spill] sm:$0xff] %v4434_v2  ;;  %1186 = vmatpush.bf16.msrb.mxu3 %v4456_v27  ;;  %v4470_v42 = vor.u32 %v3282_v5, %v2968_v56  ;;  %v4481_v2 = vpop.f32.mrf.mxu2  ;;  %v4483_v14 = vor.u32 %v3280_v22, %v2970_v57  ;;  %v3309_v56 = vld [vmem:[%s5543_s4 + $0x10c] sm:$0xf]  ;;  %v3090_v5 = vld [vmem:[%s5543_s4 + $0x118] sm:$0xf0] }
  0xc5   :  { %5810 = vst [vmem:[#allocation78_spill] sm:$0xff] %v4445_v12  ;;  %1120 = vmatpush.bf16.msra.mxu2 %v4445_v12  ;;  %v3311_v12 = vld [vmem:[%s5543_s4 + $0x114] sm:$0xf0]  ;;  %v4496_v4 = vor.u32 %v3309_v56, %v3090_v5  ;;  %v2952_v57 = vld [vmem:[%s5543_s4] sm:$0xf] }
  0xc6   :  { %5811 = vst [vmem:[#allocation79_spill] sm:$0xff] %v4447_v9  ;;  %v4485_v34 = vor.u32 %v3311_v12, %v3088_v62  ;;  %v286_v9 = vpop.f32.mrf.mxu0  ;;  %1095 = vmatpush.bf16.msra.mxu0 %v4470_v42  ;;  %v315_v12 = vpop.f32.mrf.mxu1  ;;  %v3278_v62 = vld [vmem:[%s5543_s4 + $0xc] sm:$0xf0]  ;;  %v3276_v56 = vld [vmem:[%s5543_s4 + $0x4] sm:$0xf] }
  0xc7   :  { %5812 = vst [vmem:[#allocation80_spill] sm:$0xff] %v4456_v27  ;;  %v4493_v27 = vpop.f32.mrf.mxu3  ;;  %v4499_v22 = vadd.f32 %v286_v9, %v4309_v31  ;;  %v4513_v9 = vadd.f32 %v315_v12, %v4323_v32  ;;  %v4517_v5 = vor.u32 %v3278_v62, %v2952_v57  ;;  %v3305_v57 = vld [vmem:[%s5543_s4 + $0xec] sm:$0xf]  ;;  %v3074_v62 = vld [vmem:[%s5543_s4 + $0xf8] sm:$0xf0] }
  0xc8   :  { %5813 = vst [vmem:[#allocation81_spill] sm:$0xff] %v4470_v42  ;;  %1161 = vmatpush.bf16.msrb.mxu1 %v4485_v34  ;;  %1187 = vmatpush.bf16.msrb.mxu3 %v4496_v4 }
  0xc9   :  { %5814 = vst [vmem:[#allocation82_spill] sm:$0xff] %v4481_v2  ;;  %1121 = vmatpush.bf16.msra.mxu2 %v4483_v14  ;;  %v3072_v2 = vld [vmem:[%s5543_s4 + $0xe8] sm:$0xf] }
  0xca   :  { %5815 = vst [vmem:[#allocation83_spill] sm:$0xff] %v4483_v14  ;;  %1096 = vmatpush.bf16.msra.mxu0 %v4517_v5  ;;  %v5825_v14 = vmov 0.0|0.0  }
  0xcb   :  { %5816 = vst [vmem:[#allocation84_spill] sm:$0xff] %v4485_v34  ;;  %1162 = vmatmul.bf16.vlgmr.msrb.gmra.mxu1 %v5825_v14  ;;  %1188 = vmatmul.bf16.vlgmr.msrb.gmra.mxu3 %v5825_v14 }
  0xcc   :  { %5817 = vst [vmem:[#allocation85_spill] sm:$0xff] %v4493_v27  ;;  %1231 = vmatpush.bf16.msra.mxu1 %v3760_v41  ;;  %v3307_v27 = vld [vmem:[%s5543_s4 + $0xf4] sm:$0xf0]  ;;  %1257 = vmatpush.bf16.msra.mxu3 %v3780_v48  ;;  %v4540_v41 = vor.u32 %v3305_v57, %v3074_v62  ;;  %v3058_v62 = vld [vmem:[%s5543_s4 + $0xd8] sm:$0xf0] }
  0xcd   :  { %5818 = vst [vmem:[#allocation86_spill] sm:$0xff] %v4496_v4 }
  0xce   :  { %5819 = vst [vmem:[#allocation87_spill] sm:$0xff] %v4499_v22  ;;  %v2954_v22 = vld [vmem:[%s5543_s4 + $0x10] sm:$0xf0] }
  0xcf   :  { %5820 = vst [vmem:[#allocation88_spill] sm:$0xff] %v4513_v9  ;;  %v4529_v12 = vor.u32 %v3276_v56, %v2954_v22  ;;  %v4531_v9 = vor.u32 %v3307_v27, %v3072_v2  ;;  %v3056_v27 = vld [vmem:[%s5543_s4 + $0xc8] sm:$0xf]  ;;  %v3303_v2 = vld [vmem:[%s5543_s4 + $0xd4] sm:$0xf0]  ;;  %v344_v56 = vpop.f32.mrf.mxu2  ;;  %v373_v48 = vpop.f32.mrf.mxu3 }
  0xd0   :  { %5821 = vst [vmem:[#allocation89_spill] sm:$0xff] %v4517_v5  ;;  %1232 = vmatpush.bf16.msra.mxu1 %v3794_v53  ;;  %v3301_v22 = vld [vmem:[%s5543_s4 + $0xcc] sm:$0xf]  ;;  %1258 = vmatpush.bf16.msra.mxu3 %v3816_v60  ;;  %v4557_v57 = vor.u32 %v3303_v2, %v3056_v27  ;;  %v4563_v53 = vadd.f32 %v344_v56, %v4369_v20  ;;  %v4573_v60 = vpop.f32.mrf.mxu1  ;;  %v3040_v27 = vld [vmem:[%s5543_s4 + $0xa8] sm:$0xf] }
  0xd1   :  { %5822 = vst [vmem:[#allocation90_spill] sm:$0xff] %v4529_v12  ;;  %1122 = vmatpush.bf16.msra.mxu2 %v4529_v12  ;;  %1141 = vmatpush.bf16.msrb.mxu0 %v4531_v9  ;;  %v4571_v12 = vadd.f32 %v373_v48, %v4397_v18  ;;  %v3299_v2 = vld [vmem:[%s5543_s4 + $0xb4] sm:$0xf0]  ;;  %v3297_v48 = vld [vmem:[%s5543_s4 + $0xac] sm:$0xf] }
  0xd2   :  { %5823 = vst [vmem:[#allocation91_spill] sm:$0xff] %v4531_v9  ;;  %v4567_v9 = vor.u32 %v3301_v22, %v3058_v62  ;;  %v4588_v14 = vor.u32 %v3299_v2, %v3040_v27  ;;  %v3042_v22 = vld [vmem:[%s5543_s4 + $0xb8] sm:$0xf0]  ;;  %v3024_v62 = vld [vmem:[%s5543_s4 + $0x88] sm:$0xf] }
  0xd3   :  { %5824 = vst [vmem:[#allocation92_spill] sm:$0xff] %v4540_v41  ;;  %v4593_v56 = vor.u32 %v3297_v48, %v3042_v22  ;;  %v3295_v27 = vld [vmem:[%s5543_s4 + $0x94] sm:$0xf0]  ;;  %v3293_v2 = vld [vmem:[%s5543_s4 + $0x8c] sm:$0xf] }
  0xd4   :  { %5826 = vst [vmem:[#allocation93_spill] sm:$0xff] %v4557_v57  ;;  %1233 = vmatpush.bf16.msra.mxu1 %v3830_v1  ;;  %1259 = vmatpush.bf16.msra.mxu3 %v3852_v8  ;;  %v4610_v22 = vor.u32 %v3295_v27, %v3024_v62  ;;  %v3008_v62 = vld [vmem:[%s5543_s4 + $0x68] sm:$0xf]  ;;  %v3010_v27 = vld [vmem:[%s5543_s4 + $0x78] sm:$0xf0] }
  0xd5   :  { %1167 = vmatpush.bf16.msrb.mxu2 %v4540_v41  ;;  %5827 = vst [vmem:[#allocation94_spill] sm:$0xff] %v4563_v53  ;;  %v4565_v41 = vpop.f32.mrf.mxu0  ;;  %1142 = vmatpush.bf16.msrb.mxu0 %v4557_v57 }
  0xd6   :  { %5828 = vst [vmem:[#allocation95_spill] sm:$0xff] %v4565_v41  ;;  %v3026_v41 = vld [vmem:[%s5543_s4 + $0x98] sm:$0xf0] }
  0xd7   :  { %5829 = vst [vmem:[#allocation96_spill] sm:$0xff] %v4567_v9  ;;  %v4607_v48 = vpop.f32.mrf.mxu2 }
  0xd8   :  { %5830 = vst [vmem:[#allocation97_spill] sm:$0xff] %v4571_v12  ;;  %1234 = vmatpush.bf16.msra.mxu1 %v3866_v13  ;;  %1260 = vmatpush.bf16.msra.mxu3 %v3891_v21  ;;  %v4617_v12 = vor.u32 %v3293_v2, %v3026_v41  ;;  %v320_v8 = vpop.f32.mrf.mxu1  ;;  %v3291_v41 = vld [vmem:[%s5543_s4 + $0x74] sm:$0xf0] }
  0xd9   :  { %5831 = vst [vmem:[#allocation98_spill] sm:$0xff] %v4573_v60  ;;  %1168 = vmatpush.bf16.msrb.mxu2 %v4567_v9  ;;  %1143 = vmatpush.bf16.msrb.mxu0 %v4588_v14  ;;  %v4615_v60 = vpop.f32.mrf.mxu3 }
  0xda   :  { %5832 = vst [vmem:[#allocation99_spill] sm:$0xff] %v4588_v14 }
  0xdb   :  { %5833 = vst [vmem:[#allocation100_spill] sm:$0xff] %v4593_v56 }
  0xdc   :  { %5834 = vst [vmem:[#allocation101_spill] sm:$0xff] %v4607_v48  ;;  %v4624_v48 = vadd.f32 %v320_v8, %v4323_v32  ;;  %1235 = vmatpush.bf16.msra.mxu1 %v3905_v26  ;;  %1261 = vmatpush.bf16.msra.mxu3 %v3927_v33  ;;  %v4638_v8 = vor.u32 %v3291_v41, %v3008_v62  ;;  %v3287_v62 = vld [vmem:[%s5543_s4 + $0x54] sm:$0xf0]  ;;  %v3285_v41 = vld [vmem:[%s5543_s4 + $0x4c] sm:$0xf] }
  0xdd   :  { %1169 = vmatpush.bf16.msrb.mxu2 %v4593_v56  ;;  %5835 = vst [vmem:[#allocation102_spill] sm:$0xff] %v4610_v22  ;;  %v291_v53 = vpop.f32.mrf.mxu0  ;;  %1144 = vmatpush.bf16.msrb.mxu0 %v4610_v22 }
  0xde   :  { %5836 = vst [vmem:[#allocation103_spill] sm:$0xff] %v4615_v60  ;;  %v4620_v13 = vadd.f32 %v291_v53, %v4309_v31  ;;  %v3289_v53 = vld [vmem:[%s5543_s4 + $0x6c] sm:$0xf] }
  0xdf   :  { %5837 = vst [vmem:[#allocation104_spill] sm:$0xff] %v4617_v12  ;;  %v4643_v2 = vor.u32 %v3289_v53, %v3010_v27  ;;  %v349_v53 = vpop.f32.mrf.mxu2 }
  0xe0   :  { %5838 = vst [vmem:[#allocation105_spill] sm:$0xff] %v4620_v13  ;;  %1236 = vmatpush.bf16.msra.mxu1 %v3938_v38  ;;  %v2992_v13 = vld [vmem:[%s5543_s4 + $0x48] sm:$0xf]  ;;  %1262 = vmatpush.bf16.msra.mxu3 %v3960_v46  ;;  %v4664_v60 = vadd.f32 %v349_v53, %v4369_v20  ;;  %v4673_v1 = vpop.f32.mrf.mxu1 }
  0xe1   :  { %5839 = vst [vmem:[#allocation106_spill] sm:$0xff] %v4624_v48  ;;  %1170 = vmatpush.bf16.msrb.mxu2 %v4617_v12  ;;  %1145 = vmatpush.bf16.msrb.mxu0 %v4638_v8  ;;  %v4658_v27 = vor.u32 %v3287_v62, %v2992_v13  ;;  %v2994_v48 = vld [vmem:[%s5543_s4 + $0x58] sm:$0xf0]  ;;  %v378_v38 = vpop.f32.mrf.mxu3  ;;  %v2976_v13 = vld [vmem:[%s5543_s4 + $0x28] sm:$0xf] }
  0xe2   :  { %5840 = vst [vmem:[#allocation107_spill] sm:$0xff] %v4638_v8  ;;  %v4668_v26 = vor.u32 %v3285_v41, %v2994_v48  ;;  %v4671_v21 = vadd.f32 %v378_v38, %v4397_v18  ;;  %v3283_v48 = vld [vmem:[%s5543_s4 + $0x34] sm:$0xf0]  ;;  %v3281_v38 = vld [vmem:[%s5543_s4 + $0x2c] sm:$0xf] }
  0xe3   :  { %5841 = vst [vmem:[#allocation108_spill] sm:$0xff] %v4643_v2  ;;  %v4688_v62 = vor.u32 %v3283_v48, %v2976_v13  ;;  %v2978_v41 = vld [vmem:[%s5543_s4 + $0x38] sm:$0xf0]  ;;  %v3279_v13 = vld [vmem:[%s5543_s4 + $0x14] sm:$0xf0] }
  0xe4   :  { %5842 = vst [vmem:[#allocation109_spill] sm:$0xff] %v4658_v27  ;;  %1237 = vmatpush.bf16.msra.mxu1 %v3974_v55  ;;  %1263 = vmatpush.bf16.msra.mxu3 %v3999_v3  ;;  %v4693_v53 = vor.u32 %v3281_v38, %v2978_v41  ;;  %v3277_v48 = vld [vmem:[%s5543_s4 + $0xc] sm:$0xf]  ;;  %v277_v38 = vadd.f32 %v4162_v51, %v4309_v31 }
  0xe5   :  { %1171 = vmatpush.bf16.msrb.mxu2 %v4643_v2  ;;  %5843 = vst [vmem:[#allocation110_spill] sm:$0xff] %v4664_v60  ;;  %v4666_v33 = vpop.f32.mrf.mxu0  ;;  %1146 = vmatpush.bf16.msrb.mxu0 %v4658_v27  ;;  %v2962_v60 = vld [vmem:[%s5543_s4 + $0x18] sm:$0xf0] }
  0xe6   :  { %5844 = vst [vmem:[#allocation111_spill] sm:$0xff] %v4666_v33  ;;  %v2960_v33 = vld [vmem:[%s5543_s4 + $0x8] sm:$0xf]  ;;  %v4722_v55 = vor.u32 %v3277_v48, %v2962_v60  ;;  %v335_v60 = vadd.f32 %v4224_v6, %v4369_v20 }
  0xe7   :  { %5845 = vst [vmem:[#allocation112_spill] sm:$0xff] %v4668_v26  ;;  %v4709_v41 = vpop.f32.mrf.mxu2 }
  0xe8   :  { %5846 = vst [vmem:[#allocation113_spill] sm:$0xff] %v4671_v21  ;;  %1238 = vmatpush.bf16.msra.mxu1 %v4010_v10  ;;  %1264 = vmatpush.bf16.msra.mxu3 %v4023_v15  ;;  %v306_v21 = vadd.f32 %v4165_v54, %v4323_v32 }
  0xe9   :  { %5847 = vst [vmem:[#allocation114_spill] sm:$0xff] %v4673_v1  ;;  %1172 = vmatpush.bf16.msrb.mxu2 %v4668_v26  ;;  %1147 = vmatpush.bf16.msrb.mxu0 %v4688_v62  ;;  %v4712_v1 = vor.u32 %v3279_v13, %v2960_v33  ;;  %v4720_v10 = vpop.f32.mrf.mxu3 }
  0xea   :  { %5848 = vst [vmem:[#allocation115_spill] sm:$0xff] %v4688_v62 }
  0xeb   :  { %5849 = vst [vmem:[#allocation116_spill] sm:$0xff] %v4693_v53 }
  0xec   :  { %5850 = vst [vmem:[#allocation117_spill] sm:$0xff] %v4709_v41  ;;  %1307 = vmatpush.bf16.msrb.mxu1 %v4047_v25  ;;  %1333 = vmatpush.bf16.msrb.mxu3 %v4052_v28  ;;  %v715_v41 = vpop.f32.mrf.mxu1 }
  0xed   :  { %1173 = vmatpush.bf16.msrb.mxu2 %v4693_v53  ;;  %5851 = vst [vmem:[#allocation118_spill] sm:$0xff] %v4712_v1  ;;  %v702_v3 = vpop.f32.mrf.mxu0  ;;  %1148 = vmatpush.bf16.msrb.mxu0 %v4712_v1  ;;  %v746_v33 = vadd.f32 %v715_v41, %v306_v21 }
  0xee   :  { %5852 = vst [vmem:[#allocation119_spill] sm:$0xff] %v4720_v10  ;;  %v745_v51 = vadd.f32 %v702_v3, %v277_v38  ;;  %v364_v3 = vadd.f32 %v4237_v36, %v4397_v18 }
  0xef   :  { %5853 = vst [vmem:[#allocation120_spill] sm:$0xff] %v4722_v55  ;;  %v753_v25 = vmul.f32 0.5, %v746_v33  ;;  %v728_v54 = vpop.f32.mrf.mxu2 }
  0xf0   :  { %v749_v13 = vmul.f32 0.5, %v745_v51  ;;  %1308 = vmatpush.bf16.msrb.mxu1 %v4065_v35  ;;  %1334 = vmatpush.bf16.msrb.mxu3 %v4070_v39  ;;  %v747_v21 = vadd.f32 %v728_v54, %v335_v60 }
  0xf1   :  { %1174 = vmatpush.bf16.msrb.mxu2 %v4722_v55  ;;  %v741_v48 = vpop.f32.mrf.mxu3 }
  0xf2   :  { %3341 = vtanh.f32 %v749_v13  ;;  %v748_v41 = vadd.f32 %v741_v48, %v364_v3 }
  0xf3   :  { %3343 = vtanh.f32 %v753_v25 }
  0xf4   :  { %1309 = vmatpush.bf16.msrb.mxu1 %v4083_v45  ;;  %1335 = vmatpush.bf16.msrb.mxu3 %v4088_v52  ;;  %v717_v51 = vpop.f32.mrf.mxu1  ;;  %3345 = vtanh.f32 %v747_v21  ;;  %v758_v13 = vmul.f32 0.5, %v748_v41 }
  0xf5   :  { %v704_v38 = vpop.f32.mrf.mxu0 }
  0xf6   :  { %3347 = vtanh.f32 %v758_v13 }
  0xf7   :  { %v730_v60 = vpop.f32.mrf.mxu2 }
  0xf8   :  { %v3342_v33 = vpop.eup %3341  ;;  %1310 = vmatpush.bf16.msrb.mxu1 %v4101_v58  ;;  %1336 = vmatpush.bf16.msrb.mxu3 %v4106_v63  ;;  %v5857_v60 = vld [vmem:[#allocation15_spill] sm:$0xff] }
  0xf9   :  { %v3344_v6 = vpop.eup %3343  ;;  %v751_v25 = vadd.f32 1.0, %v3342_v33  ;;  %v743_v38 = vpop.f32.mrf.mxu3 }
  0xfa   :  { %v755_v36 = vadd.f32 1.0, %v3344_v6  ;;  %v3346_v54 = vpop.eup %3345  ;;  %v5854_v6 = vld [vmem:[#allocation51_spill] sm:$0xff]  ;;  %v5859_v38 = vld [vmem:[#allocation60_spill] sm:$0xff] }
  0xfb   :  { %v752_v10 = vmul.f32 0.5, %v751_v25  ;;  %v5855_v25 = vld [vmem:[#allocation52_spill] sm:$0xff] }
  0xfc   :  { %v756_v45 = vmul.f32 0.5, %v755_v36  ;;  %1311 = vmatpush.bf16.msrb.mxu1 %v4119_v11  ;;  %1337 = vmatpush.bf16.msrb.mxu3 %v4124_v16  ;;  %v3348_v48 = vpop.eup %3347  ;;  %v5856_v36 = vld [vmem:[#allocation13_spill] sm:$0xff] }
  0xfd   :  { %v763_v21 = vmul.f32 %v3346_v54, %v752_v10  ;;  %v760_v51 = vadd.f32 1.0, %v3348_v48  ;;  %v5858_v54 = vld [vmem:[#allocation57_spill] sm:$0xff] }
  0xfe   :  { %v762_v3 = vmul.f32 0.0, %v756_v45  ;;  %v5862_v48 = vld [vmem:[#allocation65_spill] sm:$0xff] }
  0xff   :  { %v761_v33 = vmul.f32 0.5, %v760_v51  ;;  %v5863_v51 = vld [vmem:[#allocation67_spill] sm:$0xff] }
 0x100   :  { %v4739_v41 = vadd.f32 %v763_v21, %v762_v3  ;;  %1312 = vmatpush.bf16.msrb.mxu1 %v4137_v24  ;;  %1338 = vmatpush.bf16.msrb.mxu3 %v4142_v29  ;;  %v5860_v3 = vld [vmem:[#allocation17_spill] sm:$0xff]  ;;  %v5861_v21 = vld [vmem:[#allocation19_spill] sm:$0xff] }
 0x102   :  { %3349 = vtanh.f32 %v4739_v41 }
 0x104   :  { %1313 = vmatpush.bf16.msrb.mxu1 %v4155_v40  ;;  %1339 = vmatpush.bf16.msrb.mxu3 %v4160_v44  ;;  %v5883_v40 = vld [vmem:[#allocation77_spill] sm:$0xff] }
 0x108   :  { %v3350_v13 = vpop.eup %3349  ;;  %1314 = vmatpush.bf16.msrb.mxu1 %v4177_v0  ;;  %1340 = vmatpush.bf16.msrb.mxu3 %v4188_v17  ;;  %v5879_v17 = vld [vmem:[#allocation63_spill] sm:$0xff]  ;;  %v5880_v0 = vld [vmem:[#allocation64_spill] sm:$0xff] }
 0x109   :  { %v766_v45 = vmul.f32 %v3350_v13, %v761_v33  ;;  %v5864_v33 = vld [vmem:[#allocation21_spill] sm:$0xff]  ;;  %v5865_v13 = vld [vmem:[#allocation23_spill] sm:$0xff] }
 0x10b   :  { %v767_v10 = vpack.c.bf16 %v766_v45, %v766_v45  ;;  %v5866_v45 = vld [vmem:[#allocation74_spill] sm:$0xff] }
 0x10d   :  { %1097 = vmatmul.bf16.vlgmr.msra.gmra.mxu0 %v767_v10  ;;  %1123 = vmatmul.bf16.vlgmr.msra.gmra.mxu2 %v767_v10 }
 0x10e   :  { %1239 = vmatmul.bf16.vlgmr.msra.gmra.mxu1 %v767_v10  ;;  %1265 = vmatmul.bf16.vlgmr.msra.gmra.mxu3 %v767_v10 }
 0x10f   :  { %1218 = vmatpush.bf16.msra.mxu0 %v3749_v37  ;;  %1244 = vmatpush.bf16.msra.mxu2 %v3777_v47 }
 0x110   :  { %1359 = vmatpush.bf16.msra.mxu1 %v4190_v19  ;;  %1385 = vmatpush.bf16.msra.mxu3 %v4199_v30  ;;  %v5878_v30 = vld [vmem:[#allocation56_spill] sm:$0xff]  ;;  %v1137_v19 = vpop.f32.mrf.mxu3 }
 0x113   :  { %1219 = vmatpush.bf16.msra.mxu0 %v3782_v49  ;;  %1245 = vmatpush.bf16.msra.mxu2 %v3812_v59 }
 0x114   :  { %1360 = vmatpush.bf16.msra.mxu1 %v4228_v23  ;;  %1386 = vmatpush.bf16.msra.mxu3 %v4242_v43  ;;  %v5871_v43 = vld [vmem:[#allocation28_spill] sm:$0xff] }
 0x115   :  { %v5874_v23 = vld [vmem:[#allocation44_spill] sm:$0xff] }
 0x117   :  { %1220 = vmatpush.bf16.msra.mxu0 %v3818_v61  ;;  %1246 = vmatpush.bf16.msra.mxu2 %v3848_v7 }
 0x118   :  { %1361 = vmatpush.bf16.msra.mxu1 %v5854_v6  ;;  %1387 = vmatpush.bf16.msra.mxu3 %v5855_v25  ;;  %v5869_v25 = vld [vmem:[#allocation79_spill] sm:$0xff]  ;;  %v5870_v6 = vld [vmem:[#allocation80_spill] sm:$0xff] }
 0x11b   :  { %1221 = vmatpush.bf16.msra.mxu0 %v5856_v36  ;;  %1247 = vmatpush.bf16.msra.mxu2 %v5857_v60 }
 0x11c   :  { %1362 = vmatpush.bf16.msra.mxu1 %v5858_v54  ;;  %1388 = vmatpush.bf16.msra.mxu3 %v5859_v38  ;;  %v5867_v54 = vld [vmem:[#allocation24_spill] sm:$0xff]  ;;  %v5868_v38 = vld [vmem:[#allocation26_spill] sm:$0xff] }
 0x11d   :  { %1149 = vmatmul.bf16.vlgmr.msrb.gmra.mxu0 %v767_v10  ;;  %1175 = vmatmul.bf16.vlgmr.msrb.gmra.mxu2 %v767_v10 }
 0x11f   :  { %1222 = vmatpush.bf16.msra.mxu0 %v5860_v3  ;;  %1248 = vmatpush.bf16.msra.mxu2 %v5861_v21 }
 0x120   :  { %1363 = vmatpush.bf16.msra.mxu1 %v5862_v48  ;;  %1389 = vmatpush.bf16.msra.mxu3 %v5863_v51  ;;  %v5872_v48 = vld [vmem:[#allocation30_spill] sm:$0xff]  ;;  %v5873_v51 = vld [vmem:[#allocation43_spill] sm:$0xff] }
 0x123   :  { %1223 = vmatpush.bf16.msra.mxu0 %v5864_v33  ;;  %1249 = vmatpush.bf16.msra.mxu2 %v5865_v13 }
 0x124   :  { %1364 = vmatpush.bf16.msra.mxu1 %v4401_v50  ;;  %1390 = vmatpush.bf16.msra.mxu3 %v5866_v45  ;;  %v5875_v45 = vld [vmem:[#allocation49_spill] sm:$0xff]  ;;  %v5876_v50 = vld [vmem:[#allocation50_spill] sm:$0xff] }
 0x127   :  { %1224 = vmatpush.bf16.msra.mxu0 %v5867_v54  ;;  %1250 = vmatpush.bf16.msra.mxu2 %v5868_v38 }
 0x128   :  { %1365 = vmatpush.bf16.msra.mxu1 %v5869_v25  ;;  %1391 = vmatpush.bf16.msra.mxu3 %v5870_v6  ;;  %v1111_v25 = vpop.f32.mrf.mxu1  ;;  %v5877_v6 = vld [vmem:[#allocation53_spill] sm:$0xff] }
 0x12b   :  { %1225 = vmatpush.bf16.msra.mxu0 %v5871_v43  ;;  %1251 = vmatpush.bf16.msra.mxu2 %v5872_v48 }
 0x12c   :  { %1366 = vmatpush.bf16.msra.mxu1 %v4485_v34  ;;  %1392 = vmatpush.bf16.msra.mxu3 %v4496_v4  ;;  %v5881_v34 = vld [vmem:[#allocation68_spill] sm:$0xff]  ;;  %v5882_v4 = vld [vmem:[#allocation70_spill] sm:$0xff] }
 0x12e   :  { %1226 = vmatmul.bf16.vlgmr.msra.gmra.mxu0 %v767_v10  ;;  %1252 = vmatmul.bf16.vlgmr.msra.gmra.mxu2 %v767_v10  ;;  %v1139_v10 = vpop.f32.mrf.mxu3 }
 0x12f   :  { %1294 = vmatpush.bf16.msrb.mxu0 %v5873_v51  ;;  %1320 = vmatpush.bf16.msrb.mxu2 %v5874_v23 }
 0x130   :  { %v1113_v44 = vpop.f32.mrf.mxu1 }
 0x131   :  { %v5888_v44 = vld [vmem:[#allocation92_spill] sm:$0xff] }
 0x133   :  { %1295 = vmatpush.bf16.msrb.mxu0 %v5875_v45  ;;  %1321 = vmatpush.bf16.msrb.mxu2 %v5876_v50  ;;  %v5884_v45 = vld [vmem:[#allocation78_spill] sm:$0xff] }
 0x137   :  { %1296 = vmatpush.bf16.msrb.mxu0 %v5877_v6  ;;  %1322 = vmatpush.bf16.msrb.mxu2 %v5878_v30  ;;  %v5885_v6 = vld [vmem:[#allocation83_spill] sm:$0xff]  ;;  %v5886_v30 = vld [vmem:[#allocation90_spill] sm:$0xff] }
 0x13b   :  { %1297 = vmatpush.bf16.msrb.mxu0 %v5879_v17  ;;  %1323 = vmatpush.bf16.msrb.mxu2 %v5880_v0  ;;  %v5887_v17 = vld [vmem:[#allocation91_spill] sm:$0xff] }
 0x13f   :  { %1298 = vmatpush.bf16.msrb.mxu0 %v5881_v34  ;;  %1324 = vmatpush.bf16.msrb.mxu2 %v5882_v4 }
 0x143   :  { %1299 = vmatpush.bf16.msrb.mxu0 %v5883_v40  ;;  %1325 = vmatpush.bf16.msrb.mxu2 %v5884_v45 }
 0x147   :  { %1300 = vmatpush.bf16.msrb.mxu0 %v4470_v42  ;;  %1326 = vmatpush.bf16.msrb.mxu2 %v5885_v6 }
 0x148   :  { %v1163_v10 = vpop.f32.mrf.mxu1 }
 0x14b   :  { %1301 = vmatpush.bf16.msrb.mxu0 %v4517_v5  ;;  %1327 = vmatpush.bf16.msrb.mxu2 %v5886_v30 }
 0x14e   :  { %v1189_v6 = vpop.f32.mrf.mxu3 }
 0x14f   :  { %1346 = vmatpush.bf16.msra.mxu0 %v5887_v17  ;;  %1372 = vmatpush.bf16.msra.mxu2 %v5888_v44 }
 0x150   :  { %v1165_v5 = vpop.f32.mrf.mxu1 }
 0x151   :  { %v511_v5 = vld [vmem:[%s5545_s5] sm:$0xf] }
 0x152   :  { %v4821_v44 = vperm.slane %v511_v5, 2  ;;  %v4824_v45 = vperm.slane %v511_v5, 3 }
 0x153   :  { %1347 = vmatpush.bf16.msra.mxu0 %v4557_v57  ;;  %1373 = vmatpush.bf16.msra.mxu2 %v4567_v9 }
 0x154   :  { %5891 = vst [vmem:[#allocation17_spill] sm:$0xff] %v4821_v44 }
 0x156   :  { %v1191_v9 = vpop.f32.mrf.mxu3 }
 0x157   :  { %1348 = vmatpush.bf16.msra.mxu0 %v4588_v14  ;;  %1374 = vmatpush.bf16.msra.mxu2 %v4593_v56 }
 0x15b   :  { %1349 = vmatpush.bf16.msra.mxu0 %v4610_v22  ;;  %1375 = vmatpush.bf16.msra.mxu2 %v4617_v12 }
 0x15f   :  { %1350 = vmatpush.bf16.msra.mxu0 %v4638_v8  ;;  %1376 = vmatpush.bf16.msra.mxu2 %v4643_v2  ;;  %v4815_v8 = vperm.slane %v511_v5, 0 }
 0x161   :  { %5889 = vst [vmem:[#allocation13_spill] sm:$0xff] %v4815_v8 }
 0x163   :  { %1351 = vmatpush.bf16.msra.mxu0 %v4658_v27  ;;  %1377 = vmatpush.bf16.msra.mxu2 %v4668_v26  ;;  %v4818_v26 = vperm.slane %v511_v5, 1 }
 0x165   :  { %5890 = vst [vmem:[#allocation15_spill] sm:$0xff] %v4818_v26 }
 0x167   :  { %1352 = vmatpush.bf16.msra.mxu0 %v4688_v62  ;;  %1378 = vmatpush.bf16.msra.mxu2 %v4693_v53 }
 0x16b   :  { %1353 = vmatpush.bf16.msra.mxu0 %v4712_v1  ;;  %1379 = vmatpush.bf16.msra.mxu2 %v4722_v55 }
 0x18a   :  { %v1098_v2 = vpop.f32.mrf.mxu0 }
 0x18b   :  { %v1099_v27 = vadd.f32 %v1098_v2, %v4815_v8  ;;  %v1240_v12 = vpop.f32.mrf.mxu1 }
 0x18d   :  { %v1112_v9 = vadd.f32 %v1111_v25, %v1099_v27 }
 0x18f   :  { %v1193_v1 = vmul.f32 0.5, %v1112_v9 }
 0x190   :  { %v1124_v62 = vpop.f32.mrf.mxu2 }
 0x191   :  { %v1125_v53 = vadd.f32 %v1124_v62, %v4818_v26  ;;  %v1266_v22 = vpop.f32.mrf.mxu3  ;;  %3351 = vtanh.f32 %v1193_v1 }
 0x192   :  { %v1100_v56 = vpop.f32.mrf.mxu0 }
 0x193   :  { %v1138_v55 = vadd.f32 %v1137_v19, %v1125_v53  ;;  %v1242_v14 = vpop.f32.mrf.mxu1  ;;  %v5892_v56 = vld [vmem:[#allocation48_spill] sm:$0xff] }
 0x194   :  { %v308_v19 = vadd.f32 %v5892_v56, %v4323_v32  ;;  %v5920_v32 = vld [vmem:[#allocation42_spill] sm:$0xff] }
 0x195   :  { %v1197_v57 = vmul.f32 0.5, %v1138_v55 }
 0x197   :  { %3353 = vtanh.f32 %v1197_v57  ;;  %v3352_v42 = vpop.eup %3351  ;;  %v1271_v57 = vadd.f32 %v1240_v12, %v308_v19 }
 0x198   :  { %v1126_v17 = vpop.f32.mrf.mxu2  ;;  %v1195_v55 = vadd.f32 1.0, %v3352_v42  ;;  %v5893_v42 = vld [vmem:[#allocation46_spill] sm:$0xff] }
 0x199   :  { %v1268_v30 = vpop.f32.mrf.mxu3 }
 0x19a   :  { %v1150_v2 = vpop.f32.mrf.mxu0  ;;  %v1196_v9 = vmul.f32 0.5, %v1195_v55 }
 0x19b   :  { %v1151_v8 = vadd.f32 %v1150_v2, %v4821_v44  ;;  %v1278_v44 = vmul.f32 0.5, %v1271_v57 }
 0x19d   :  { %v3354_v27 = vpop.eup %3353  ;;  %v1164_v25 = vadd.f32 %v1163_v10, %v1151_v8 }
 0x19e   :  { %v1199_v62 = vadd.f32 1.0, %v3354_v27 }
 0x19f   :  { %3355 = vtanh.f32 %v1164_v25  ;;  %v279_v25 = vadd.f32 %v5893_v42, %v4309_v31  ;;  %v5919_v31 = vld [vmem:[#allocation41_spill] sm:$0xff] }
 0x1a0   :  { %v1176_v1 = vpop.f32.mrf.mxu2  ;;  %v1200_v17 = vmul.f32 0.5, %v1199_v62 }
 0x1a1   :  { %v1177_v14 = vadd.f32 %v1176_v1, %v4824_v45 }
 0x1a2   :  { %v1152_v30 = vpop.f32.mrf.mxu0  ;;  %v1206_v8 = vmul.f32 0.0, %v1200_v17  ;;  %v5895_v17 = vld [vmem:[#allocation55_spill] sm:$0xff] }
 0x1a3   :  { %v1190_v53 = vadd.f32 %v1189_v6, %v1177_v14  ;;  %v5894_v6 = vld [vmem:[#allocation59_spill] sm:$0xff]  ;;  %v337_v30 = vadd.f32 %v5895_v17, %v4369_v20 }
 0x1a4   :  { %v366_v19 = vadd.f32 %v5894_v6, %v4397_v18  ;;  %v5917_v20 = vld [vmem:[#allocation39_spill] sm:$0xff]  ;;  %v5918_v18 = vld [vmem:[#allocation40_spill] sm:$0xff] }
 0x1a5   :  { %v3356_v2 = vpop.eup %3355  ;;  %v1202_v26 = vmul.f32 0.5, %v1190_v53 }
 0x1a6   :  { %v1207_v10 = vmul.f32 %v3356_v2, %v1196_v9  ;;  %v1273_v14 = vadd.f32 %v1266_v22, %v366_v19 }
 0x1a7   :  { %3357 = vtanh.f32 %v1202_v26 }
 0x1a8   :  { %v4829_v5 = vadd.f32 %v1207_v10, %v1206_v8  ;;  %v1178_v27 = vpop.f32.mrf.mxu2  ;;  %3359 = vtanh.f32 %v1278_v44  ;;  %v1283_v10 = vmul.f32 0.5, %v1273_v14  ;;  %v5898_v14 = vld [vmem:[#allocation9_spill] sm:$0xff] }
 0x1aa   :  { %3361 = vtanh.f32 %v4829_v5 }
 0x1ab   :  { %v1227_v12 = vpop.f32.mrf.mxu0 }
 0x1ac   :  { %v1270_v62 = vadd.f32 %v1227_v12, %v279_v25 }
 0x1ad   :  { %v3358_v56 = vpop.eup %3357 }
 0x1ae   :  { %v1204_v55 = vadd.f32 1.0, %v3358_v56  ;;  %v1274_v1 = vmul.f32 0.5, %v1270_v62  ;;  %v3360_v57 = vpop.eup %3359  ;;  %v5896_v62 = vld [vmem:[#allocation7_spill] sm:$0xff]  ;;  %v5897_v56 = vld [vmem:[#allocation8_spill] sm:$0xff] }
 0x1af   :  { %v1280_v8 = vadd.f32 1.0, %v3360_v57 }
 0x1b0   :  { %v3362_v26 = vpop.eup %3361  ;;  %v1205_v44 = vmul.f32 0.5, %v1204_v55  ;;  %3363 = vtanh.f32 %v1274_v1 }
 0x1b1   :  { %v1253_v53 = vpop.f32.mrf.mxu2  ;;  %v1281_v12 = vmul.f32 0.5, %v1280_v8  ;;  %v5903_v8 = vld [vmem:[#allocation16_spill] sm:$0xff] }
 0x1b2   :  { %v1210_v9 = vmul.f32 %v3362_v26, %v1205_v44  ;;  %v1272_v2 = vadd.f32 %v1253_v53, %v337_v30  ;;  %v5899_v26 = vld [vmem:[#allocation10_spill] sm:$0xff]  ;;  %v5900_v44 = vld [vmem:[#allocation11_spill] sm:$0xff]  ;;  %v5901_v53 = vld [vmem:[#allocation12_spill] sm:$0xff] }
 0x1b3   :  { %v1229_v27 = vpop.f32.mrf.mxu0  ;;  %v1287_v1 = vmul.f32 %v1281_v12, %v4739_v41  ;;  %v5905_v12 = vld [vmem:[#allocation20_spill] sm:$0xff] }
 0x1b4   :  { %3365 = vtanh.f32 %v1272_v2  ;;  %v1293_v42 = vpack.c.bf16 %v1210_v9, %v1210_v9  ;;  %v5902_v2 = vld [vmem:[#allocation14_spill] sm:$0xff] }
 0x1b5   :  { %3367 = vtanh.f32 %v1283_v10 }
 0x1b6   :  { %v3364_v25 = vpop.eup %3363  ;;  %1315 = vmatmul.bf16.vlgmr.msrb.gmra.mxu1 %v1293_v42  ;;  %1341 = vmatmul.bf16.vlgmr.msrb.gmra.mxu3 %v1293_v42 }
 0x1b7   :  { %v1276_v22 = vadd.f32 1.0, %v3364_v25  ;;  %1436 = vmatpush.bf16.msrb.mxu1 %v5896_v62  ;;  %1462 = vmatpush.bf16.msrb.mxu3 %v5897_v56  ;;  %v5904_v25 = vld [vmem:[#allocation18_spill] sm:$0xff] }
 0x1b9   :  { %v1277_v6 = vmul.f32 0.5, %v1276_v22  ;;  %v1255_v19 = vpop.f32.mrf.mxu2 }
 0x1ba   :  { %v3366_v55 = vpop.eup %3365  ;;  %v5908_v19 = vld [vmem:[#allocation27_spill] sm:$0xff] }
 0x1bb   :  { %v1288_v57 = vmul.f32 %v3366_v55, %v1277_v6  ;;  %1437 = vmatpush.bf16.msrb.mxu1 %v5898_v14  ;;  %1463 = vmatpush.bf16.msrb.mxu3 %v5899_v26  ;;  %v3368_v17 = vpop.eup %3367  ;;  %v5906_v6 = vld [vmem:[#allocation22_spill] sm:$0xff]  ;;  %v5909_v55 = vld [vmem:[#allocation29_spill] sm:$0xff] }
 0x1bc   :  { %v1285_v9 = vadd.f32 1.0, %v3368_v17  ;;  %v5912_v17 = vld [vmem:[#allocation49_spill] sm:$0xff] }
 0x1bd   :  { %v4843_v30 = vadd.f32 %v1288_v57, %v1287_v1  ;;  %v5910_v1 = vld [vmem:[#allocation31_spill] sm:$0xff]  ;;  %v5911_v57 = vld [vmem:[#allocation32_spill] sm:$0xff] }
 0x1be   :  { %v1286_v41 = vmul.f32 0.5, %v1285_v9  ;;  %v5913_v9 = vld [vmem:[#allocation37_spill] sm:$0xff] }
 0x1bf   :  { %3369 = vtanh.f32 %v4843_v30  ;;  %1438 = vmatpush.bf16.msrb.mxu1 %v5900_v44  ;;  %1464 = vmatpush.bf16.msrb.mxu3 %v5901_v53 }
 0x1c3   :  { %1439 = vmatpush.bf16.msrb.mxu1 %v5902_v2  ;;  %1465 = vmatpush.bf16.msrb.mxu3 %v5903_v8 }
 0x1c5   :  { %v3370_v10 = vpop.eup %3369 }
 0x1c6   :  { %v1291_v27 = vmul.f32 %v3370_v10, %v1286_v41  ;;  %1367 = vmatmul.bf16.vlgmr.msra.gmra.mxu1 %v1293_v42  ;;  %1393 = vmatmul.bf16.vlgmr.msra.gmra.mxu3 %v1293_v42  ;;  %v5907_v42 = vld [vmem:[#allocation25_spill] sm:$0xff]  ;;  %v5914_v41 = vld [vmem:[#allocation38_spill] sm:$0xff] }
 0x1c7   :  { %1440 = vmatpush.bf16.msrb.mxu1 %v5904_v25  ;;  %1466 = vmatpush.bf16.msrb.mxu3 %v5905_v12  ;;  %v5915_v10 = vld [vmem:[#allocation53_spill] sm:$0xff] }
 0x1c8   :  { %v1292_v22 = vpack.c.bf16 %v1291_v27, %v1291_v27  ;;  %v5916_v27 = vld [vmem:[#allocation56_spill] sm:$0xff] }
 0x1ca   :  { %1302 = vmatmul.bf16.vlgmr.msrb.gmra.mxu0 %v1292_v22  ;;  %1328 = vmatmul.bf16.vlgmr.msrb.gmra.mxu2 %v1292_v22 }
 0x1cb   :  { %1423 = vmatpush.bf16.msrb.mxu0 %v3749_v37  ;;  %1449 = vmatpush.bf16.msrb.mxu2 %v3777_v47 }
 0x1cc   :  { %1441 = vmatpush.bf16.msrb.mxu1 %v5906_v6  ;;  %1467 = vmatpush.bf16.msrb.mxu3 %v3960_v46 }
 0x1cf   :  { %1424 = vmatpush.bf16.msrb.mxu0 %v3782_v49  ;;  %1450 = vmatpush.bf16.msrb.mxu2 %v3812_v59 }
 0x1d0   :  { %1442 = vmatpush.bf16.msrb.mxu1 %v5907_v42  ;;  %1468 = vmatpush.bf16.msrb.mxu3 %v5908_v19 }
 0x1d3   :  { %1425 = vmatpush.bf16.msrb.mxu0 %v3818_v61  ;;  %1451 = vmatpush.bf16.msrb.mxu2 %v3848_v7 }
 0x1d4   :  { %1443 = vmatpush.bf16.msrb.mxu1 %v5909_v55  ;;  %1469 = vmatpush.bf16.msrb.mxu3 %v4023_v15 }
 0x1d7   :  { %1426 = vmatpush.bf16.msrb.mxu0 %v5856_v36  ;;  %1444 = vmatmul.bf16.vlgmr.msrb.gmra.mxu1 %v1292_v22 }
 0x1d8   :  { %1512 = vmatpush.bf16.msra.mxu1 %v5910_v1  ;;  %1538 = vmatpush.bf16.msra.mxu3 %v4052_v28 }
 0x1d9   :  { %1452 = vmatpush.bf16.msrb.mxu2 %v5857_v60  ;;  %1470 = vmatmul.bf16.vlgmr.msrb.gmra.mxu3 %v1292_v22 }
 0x1da   :  { %1354 = vmatmul.bf16.vlgmr.msra.gmra.mxu0 %v1292_v22  ;;  %1380 = vmatmul.bf16.vlgmr.msra.gmra.mxu2 %v1292_v22 }
 0x1db   :  { %1427 = vmatpush.bf16.msrb.mxu0 %v5860_v3 }
 0x1dc   :  { %1513 = vmatpush.bf16.msra.mxu1 %v4065_v35  ;;  %1539 = vmatpush.bf16.msra.mxu3 %v4070_v39 }
 0x1dd   :  { %1453 = vmatpush.bf16.msrb.mxu2 %v5861_v21 }
 0x1df   :  { %1428 = vmatpush.bf16.msrb.mxu0 %v5864_v33 }
 0x1e0   :  { %1514 = vmatpush.bf16.msra.mxu1 %v5911_v57  ;;  %1540 = vmatpush.bf16.msra.mxu3 %v4088_v52 }
 0x1e1   :  { %1454 = vmatpush.bf16.msrb.mxu2 %v5865_v13 }
 0x1e3   :  { %1429 = vmatpush.bf16.msrb.mxu0 %v5867_v54 }
 0x1e4   :  { %1515 = vmatpush.bf16.msra.mxu1 %v4101_v58  ;;  %1541 = vmatpush.bf16.msra.mxu3 %v4106_v63 }
 0x1e5   :  { %1455 = vmatpush.bf16.msrb.mxu2 %v5868_v38 }
 0x1e7   :  { %1430 = vmatpush.bf16.msrb.mxu0 %v5871_v43  ;;  %v5959_v43 = vld [vmem:[#allocation17_spill] sm:$0xff] }
 0x1e8   :  { %1516 = vmatpush.bf16.msra.mxu1 %v4119_v11  ;;  %1542 = vmatpush.bf16.msra.mxu3 %v4124_v16 }
 0x1e9   :  { %1456 = vmatpush.bf16.msrb.mxu2 %v5872_v48 }
 0x1ea   :  { %1431 = vmatmul.bf16.vlgmr.msrb.gmra.mxu0 %v1292_v22 }
 0x1eb   :  { %1499 = vmatpush.bf16.msra.mxu0 %v5873_v51 }
 0x1ec   :  { %1517 = vmatpush.bf16.msra.mxu1 %v4137_v24  ;;  %1543 = vmatpush.bf16.msra.mxu3 %v4142_v29  ;;  %v5958_v24 = vld [vmem:[#allocation15_spill] sm:$0xff] }
 0x1ed   :  { %1525 = vmatpush.bf16.msra.mxu2 %v5874_v23 }
 0x1ee   :  { %1457 = vmatmul.bf16.vlgmr.msrb.gmra.mxu2 %v1292_v22  ;;  %v5921_v22 = vld [vmem:[#allocation63_spill] sm:$0xff] }
 0x1ef   :  { %1500 = vmatpush.bf16.msra.mxu0 %v5912_v17 }
 0x1f0   :  { %1518 = vmatpush.bf16.msra.mxu1 %v5913_v9  ;;  %1544 = vmatpush.bf16.msra.mxu3 %v5914_v41  ;;  %v5923_v9 = vld [vmem:[#allocation47_spill] sm:$0xff]  ;;  %v5957_v41 = vld [vmem:[#allocation13_spill] sm:$0xff] }
 0x1f1   :  { %1526 = vmatpush.bf16.msra.mxu2 %v5876_v50  ;;  %v5922_v50 = vld [vmem:[#allocation45_spill] sm:$0xff] }
 0x1f3   :  { %1501 = vmatpush.bf16.msra.mxu0 %v5915_v10 }
 0x1f4   :  { %1519 = vmatpush.bf16.msra.mxu1 %v5917_v20  ;;  %1545 = vmatpush.bf16.msra.mxu3 %v5918_v18  ;;  %v5925_v20 = vld [vmem:[#allocation52_spill] sm:$0xff] }
 0x1f5   :  { %1527 = vmatpush.bf16.msra.mxu2 %v5916_v27  ;;  %v5924_v27 = vld [vmem:[#allocation51_spill] sm:$0xff] }
 0x1f7   :  { %1502 = vmatpush.bf16.msra.mxu0 %v5921_v22  ;;  %v5928_v22 = vld [vmem:[#allocation60_spill] sm:$0xff] }
 0x1f8   :  { %1564 = vmatpush.bf16.msrb.mxu1 %v5919_v31  ;;  %1590 = vmatpush.bf16.msrb.mxu3 %v5920_v32  ;;  %v5926_v31 = vld [vmem:[#allocation78_spill] sm:$0xff]  ;;  %v5927_v32 = vld [vmem:[#allocation57_spill] sm:$0xff] }
 0x1f9   :  { %1528 = vmatpush.bf16.msra.mxu2 %v5880_v0  ;;  %v5929_v0 = vld [vmem:[#allocation81_spill] sm:$0xff] }
 0x1fb   :  { %1503 = vmatpush.bf16.msra.mxu0 %v5881_v34  ;;  %v5932_v34 = vld [vmem:[#allocation67_spill] sm:$0xff] }
 0x1fc   :  { %1565 = vmatpush.bf16.msrb.mxu1 %v5922_v50  ;;  %1591 = vmatpush.bf16.msrb.mxu3 %v5923_v9  ;;  %v5930_v50 = vld [vmem:[#allocation83_spill] sm:$0xff]  ;;  %v5931_v9 = vld [vmem:[#allocation65_spill] sm:$0xff] }
 0x1fd   :  { %1529 = vmatpush.bf16.msra.mxu2 %v5882_v4  ;;  %v5933_v4 = vld [vmem:[#allocation89_spill] sm:$0xff] }
 0x1ff   :  { %1504 = vmatpush.bf16.msra.mxu0 %v5883_v40  ;;  %v5936_v40 = vld [vmem:[#allocation92_spill] sm:$0xff] }
 0x200   :  { %1566 = vmatpush.bf16.msrb.mxu1 %v5924_v27  ;;  %1592 = vmatpush.bf16.msrb.mxu3 %v5925_v20  ;;  %v5934_v27 = vld [vmem:[#allocation90_spill] sm:$0xff]  ;;  %v5935_v20 = vld [vmem:[#allocation91_spill] sm:$0xff] }
 0x201   :  { %1530 = vmatpush.bf16.msra.mxu2 %v5926_v31  ;;  %v5937_v31 = vld [vmem:[#allocation71_spill] sm:$0xff] }
 0x203   :  { %1505 = vmatpush.bf16.msra.mxu0 %v5929_v0  ;;  %v5940_v0 = vld [vmem:[#allocation96_spill] sm:$0xff] }
 0x204   :  { %1567 = vmatpush.bf16.msrb.mxu1 %v5927_v32  ;;  %1593 = vmatpush.bf16.msrb.mxu3 %v5928_v22  ;;  %v5938_v32 = vld [vmem:[#allocation74_spill] sm:$0xff]  ;;  %v5939_v22 = vld [vmem:[#allocation93_spill] sm:$0xff] }
 0x205   :  { %1531 = vmatpush.bf16.msra.mxu2 %v5930_v50  ;;  %v5941_v50 = vld [vmem:[#allocation79_spill] sm:$0xff] }
 0x207   :  { %1506 = vmatpush.bf16.msra.mxu0 %v5933_v4  ;;  %v5944_v4 = vld [vmem:[#allocation100_spill] sm:$0xff] }
 0x208   :  { %1568 = vmatpush.bf16.msrb.mxu1 %v5931_v9  ;;  %1594 = vmatpush.bf16.msrb.mxu3 %v5932_v34  ;;  %v5942_v9 = vld [vmem:[#allocation80_spill] sm:$0xff]  ;;  %v5943_v34 = vld [vmem:[#allocation99_spill] sm:$0xff] }
 0x209   :  { %1532 = vmatpush.bf16.msra.mxu2 %v5934_v27  ;;  %v5945_v27 = vld [vmem:[#allocation84_spill] sm:$0xff] }
 0x20b   :  { %1551 = vmatpush.bf16.msrb.mxu0 %v5935_v20  ;;  %v5946_v20 = vld [vmem:[#allocation86_spill] sm:$0xff] }
 0x20c   :  { %1569 = vmatpush.bf16.msrb.mxu1 %v5937_v31  ;;  %1595 = vmatpush.bf16.msrb.mxu3 %v5938_v32  ;;  %v5948_v31 = vld [vmem:[#allocation104_spill] sm:$0xff]  ;;  %v5949_v32 = vld [vmem:[#allocation107_spill] sm:$0xff] }
 0x20d   :  { %1577 = vmatpush.bf16.msrb.mxu2 %v5936_v40  ;;  %v5947_v40 = vld [vmem:[#allocation102_spill] sm:$0xff] }
 0x20f   :  { %1552 = vmatpush.bf16.msrb.mxu0 %v5939_v22  ;;  %v5950_v22 = vld [vmem:[#allocation108_spill] sm:$0xff] }
 0x210   :  { %1570 = vmatpush.bf16.msrb.mxu1 %v5941_v50  ;;  %1596 = vmatpush.bf16.msrb.mxu3 %v5942_v9  ;;  %v5952_v50 = vld [vmem:[#allocation112_spill] sm:$0xff]  ;;  %v5953_v9 = vld [vmem:[#allocation115_spill] sm:$0xff] }
 0x211   :  { %1578 = vmatpush.bf16.msrb.mxu2 %v5940_v0  ;;  %v5951_v0 = vld [vmem:[#allocation109_spill] sm:$0xff] }
 0x213   :  { %1553 = vmatpush.bf16.msrb.mxu0 %v5943_v34  ;;  %v5954_v34 = vld [vmem:[#allocation116_spill] sm:$0xff] }
 0x214   :  { %1571 = vmatpush.bf16.msrb.mxu1 %v5945_v27  ;;  %1597 = vmatpush.bf16.msrb.mxu3 %v5946_v20  ;;  %v5956_v27 = vld [vmem:[#allocation120_spill] sm:$0xff] }
 0x215   :  { %1579 = vmatpush.bf16.msrb.mxu2 %v5944_v4  ;;  %v5955_v4 = vld [vmem:[#allocation118_spill] sm:$0xff] }
 0x217   :  { %1554 = vmatpush.bf16.msrb.mxu0 %v5947_v40 }
 0x219   :  { %1580 = vmatpush.bf16.msrb.mxu2 %v5948_v31 }
 0x21b   :  { %1555 = vmatpush.bf16.msrb.mxu0 %v5949_v32 }
 0x21d   :  { %1581 = vmatpush.bf16.msrb.mxu2 %v5950_v22 }
 0x21f   :  { %1556 = vmatpush.bf16.msrb.mxu0 %v5951_v0 }
 0x221   :  { %1582 = vmatpush.bf16.msrb.mxu2 %v5952_v50 }
 0x223   :  { %1557 = vmatpush.bf16.msrb.mxu0 %v5953_v9 }
 0x225   :  { %1583 = vmatpush.bf16.msrb.mxu2 %v5954_v34 }
 0x227   :  { %1558 = vmatpush.bf16.msrb.mxu0 %v5955_v4 }
 0x229   :  { %1584 = vmatpush.bf16.msrb.mxu2 %v5956_v27 }
 0x233   :  { %v1316_v20 = vpop.f32.mrf.mxu1 }
 0x239   :  { %v1342_v40 = vpop.f32.mrf.mxu3 }
 0x23b   :  { %v1318_v18 = vpop.f32.mrf.mxu1 }
 0x241   :  { %v1344_v31 = vpop.f32.mrf.mxu3 }
 0x243   :  { %v1368_v10 = vpop.f32.mrf.mxu1 }
 0x247   :  { %v1303_v32 = vpop.f32.mrf.mxu0 }
 0x248   :  { %v1304_v22 = vadd.f32 %v1303_v32, %v5957_v41 }
 0x249   :  { %v1394_v17 = vpop.f32.mrf.mxu3 }
 0x24a   :  { %v1317_v0 = vadd.f32 %v1316_v20, %v1304_v22 }
 0x24b   :  { %v1370_v29 = vpop.f32.mrf.mxu1 }
 0x24c   :  { %v1398_v23 = vmul.f32 0.5, %v1317_v0 }
 0x24d   :  { %v1329_v50 = vpop.f32.mrf.mxu2 }
 0x24e   :  { %v1330_v9 = vadd.f32 %v1329_v50, %v5958_v24  ;;  %3371 = vtanh.f32 %v1398_v23 }
 0x24f   :  { %v1305_v34 = vpop.f32.mrf.mxu0 }
 0x250   :  { %v1343_v51 = vadd.f32 %v1342_v40, %v1330_v9  ;;  %v5960_v34 = vld [vmem:[#allocation62_spill] sm:$0xff] }
 0x251   :  { %v1396_v4 = vpop.f32.mrf.mxu3 }
 0x252   :  { %v1402_v48 = vmul.f32 0.5, %v1343_v51 }
 0x254   :  { %3373 = vtanh.f32 %v1402_v48  ;;  %v1445_v27 = vpop.f32.mrf.mxu1  ;;  %v3372_v11 = vpop.eup %3371 }
 0x255   :  { %v1331_v18 = vpop.f32.mrf.mxu2  ;;  %v1400_v50 = vadd.f32 1.0, %v3372_v11  ;;  %v1476_v40 = vadd.f32 %v1445_v27, %v5960_v34  ;;  %v5962_v34 = vld [vmem:[#allocation75_spill] sm:$0xff] }
 0x257   :  { %v1355_v31 = vpop.f32.mrf.mxu0  ;;  %v1401_v9 = vmul.f32 0.5, %v1400_v50  ;;  %v1483_v24 = vmul.f32 0.5, %v1476_v40 }
 0x258   :  { %v1356_v16 = vadd.f32 %v1355_v31, %v5959_v43 }
 0x25a   :  { %v3374_v32 = vpop.eup %3373  ;;  %v1369_v41 = vadd.f32 %v1368_v10, %v1356_v16 }
 0x25b   :  { %v1404_v20 = vadd.f32 1.0, %v3374_v32  ;;  %v5961_v32 = vld [vmem:[#allocation61_spill] sm:$0xff] }
 0x25c   :  { %v1471_v29 = vpop.f32.mrf.mxu3  ;;  %3375 = vtanh.f32 %v1369_v41  ;;  %v1447_v22 = vpop.f32.mrf.mxu1 }
 0x25d   :  { %v1381_v0 = vpop.f32.mrf.mxu2  ;;  %v1405_v23 = vmul.f32 0.5, %v1404_v20  ;;  %v1478_v40 = vadd.f32 %v1471_v29, %v5962_v34 }
 0x25e   :  { %v1382_v4 = vadd.f32 %v1381_v0, %v4824_v45 }
 0x25f   :  { %v1357_v48 = vpop.f32.mrf.mxu0  ;;  %v1411_v43 = vmul.f32 %v1405_v23, %v4829_v5 }
 0x260   :  { %v1395_v51 = vadd.f32 %v1394_v17, %v1382_v4 }
 0x262   :  { %v3376_v18 = vpop.eup %3375  ;;  %v1407_v31 = vmul.f32 0.5, %v1395_v51 }
 0x263   :  { %v1412_v16 = vmul.f32 %v3376_v18, %v1401_v9  ;;  %v1488_v18 = vmul.f32 0.5, %v1478_v40 }
 0x264   :  { %v1473_v10 = vpop.f32.mrf.mxu3  ;;  %3377 = vtanh.f32 %v1407_v31 }
 0x265   :  { %v4944_v41 = vadd.f32 %v1412_v16, %v1411_v43  ;;  %v1383_v11 = vpop.f32.mrf.mxu2  ;;  %3379 = vtanh.f32 %v1483_v24  ;;  %v5963_v43 = vld [vmem:[#allocation72_spill] sm:$0xff] }
 0x267   :  { %3381 = vtanh.f32 %v4944_v41  ;;  %v1432_v27 = vpop.f32.mrf.mxu0 }
 0x268   :  { %v1475_v20 = vadd.f32 %v1432_v27, %v5961_v32 }
 0x26a   :  { %v3378_v22 = vpop.eup %3377  ;;  %v1479_v17 = vmul.f32 0.5, %v1475_v20 }
 0x26b   :  { %v1409_v50 = vadd.f32 1.0, %v3378_v22  ;;  %v3380_v0 = vpop.eup %3379 }
 0x26c   :  { %3383 = vtanh.f32 %v1479_v17  ;;  %v1485_v24 = vadd.f32 1.0, %v3380_v0 }
 0x26d   :  { %v3382_v5 = vpop.eup %3381  ;;  %v1410_v4 = vmul.f32 0.5, %v1409_v50 }
 0x26e   :  { %v1486_v11 = vmul.f32 0.5, %v1485_v24  ;;  %v5970_v24 = vld [vmem:[#allocation35_spill] sm:$0xff] }
 0x26f   :  { %v1415_v48 = vmul.f32 %v3382_v5, %v1410_v4  ;;  %v1434_v9 = vpop.f32.mrf.mxu0  ;;  %v5964_v4 = vld [vmem:[#allocation33_spill] sm:$0xff] }
 0x270   :  { %v1492_v20 = vmul.f32 %v1486_v11, %v4843_v30  ;;  %v5969_v9 = vld [vmem:[#allocation44_spill] sm:$0xff]  ;;  %v5975_v11 = vld [vmem:[#allocation38_spill] sm:$0xff] }
 0x271   :  { %v1458_v23 = vpop.f32.mrf.mxu2  ;;  %v1498_v31 = vpack.c.bf16 %v1415_v48, %v1415_v48  ;;  %v5966_v48 = vld [vmem:[#allocation28_spill] sm:$0xff] }
 0x272   :  { %v1477_v51 = vadd.f32 %v1458_v23, %v5963_v43  ;;  %v3384_v16 = vpop.eup %3383  ;;  %v5965_v23 = vld [vmem:[#allocation34_spill] sm:$0xff] }
 0x273   :  { %v1481_v10 = vadd.f32 1.0, %v3384_v16  ;;  %1520 = vmatmul.bf16.vlgmr.msra.gmra.mxu1 %v1498_v31  ;;  %1546 = vmatmul.bf16.vlgmr.msra.gmra.mxu3 %v1498_v31  ;;  %v5967_v43 = vld [vmem:[#allocation30_spill] sm:$0xff] }
 0x274   :  { %3385 = vtanh.f32 %v1477_v51  ;;  %1641 = vmatpush.bf16.msra.mxu1 %v5896_v62  ;;  %1667 = vmatpush.bf16.msra.mxu3 %v5897_v56  ;;  %v5968_v51 = vld [vmem:[#allocation43_spill] sm:$0xff]  ;;  %v5973_v16 = vld [vmem:[#allocation50_spill] sm:$0xff] }
 0x275   :  { %3387 = vtanh.f32 %v1488_v18  ;;  %v1482_v29 = vmul.f32 0.5, %v1481_v10  ;;  %v5971_v18 = vld [vmem:[#allocation36_spill] sm:$0xff]  ;;  %v5974_v10 = vld [vmem:[#allocation37_spill] sm:$0xff] }
 0x278   :  { %1642 = vmatpush.bf16.msra.mxu1 %v5898_v14  ;;  %1668 = vmatpush.bf16.msra.mxu3 %v5899_v26 }
 0x279   :  { %v1460_v27 = vpop.f32.mrf.mxu2 }
 0x27a   :  { %v3386_v32 = vpop.eup %3385  ;;  %v5977_v27 = vld [vmem:[#allocation56_spill] sm:$0xff] }
 0x27b   :  { %v1493_v22 = vmul.f32 %v3386_v32, %v1482_v29  ;;  %v3388_v17 = vpop.eup %3387  ;;  %v5976_v29 = vld [vmem:[#allocation53_spill] sm:$0xff]  ;;  %v5978_v32 = vld [vmem:[#allocation39_spill] sm:$0xff] }
 0x27c   :  { %1643 = vmatpush.bf16.msra.mxu1 %v5900_v44  ;;  %1669 = vmatpush.bf16.msra.mxu3 %v5901_v53  ;;  %v1490_v0 = vadd.f32 1.0, %v3388_v17  ;;  %v5981_v17 = vld [vmem:[#allocation42_spill] sm:$0xff] }
 0x27d   :  { %v4955_v50 = vadd.f32 %v1493_v22, %v1492_v20  ;;  %v5979_v20 = vld [vmem:[#allocation40_spill] sm:$0xff]  ;;  %v5980_v22 = vld [vmem:[#allocation41_spill] sm:$0xff] }
 0x27e   :  { %v1491_v30 = vmul.f32 0.5, %v1490_v0  ;;  %v5982_v0 = vld [vmem:[#allocation63_spill] sm:$0xff] }
 0x27f   :  { %3389 = vtanh.f32 %v4955_v50 }
 0x280   :  { %1644 = vmatpush.bf16.msra.mxu1 %v5902_v2  ;;  %1670 = vmatpush.bf16.msra.mxu3 %v5903_v8 }
 0x283   :  { %1572 = vmatmul.bf16.vlgmr.msrb.gmra.mxu1 %v1498_v31  ;;  %1598 = vmatmul.bf16.vlgmr.msrb.gmra.mxu3 %v1498_v31  ;;  %v5972_v31 = vld [vmem:[#allocation49_spill] sm:$0xff] }
 0x284   :  { %1645 = vmatpush.bf16.msra.mxu1 %v5904_v25  ;;  %1671 = vmatpush.bf16.msra.mxu3 %v5905_v12 }
 0x285   :  { %v3390_v34 = vpop.eup %3389 }
 0x286   :  { %v1496_v40 = vmul.f32 %v3390_v34, %v1491_v30  ;;  %v5983_v30 = vld [vmem:[#allocation64_spill] sm:$0xff]  ;;  %v5984_v34 = vld [vmem:[#allocation45_spill] sm:$0xff] }
 0x288   :  { %v1497_v5 = vpack.c.bf16 %v1496_v40, %v1496_v40  ;;  %1646 = vmatpush.bf16.msra.mxu1 %v5906_v6  ;;  %1672 = vmatpush.bf16.msra.mxu3 %v3960_v46  ;;  %v5985_v40 = vld [vmem:[#allocation47_spill] sm:$0xff] }
 0x28a   :  { %1507 = vmatmul.bf16.vlgmr.msra.gmra.mxu0 %v1497_v5  ;;  %1533 = vmatmul.bf16.vlgmr.msra.gmra.mxu2 %v1497_v5 }
 0x28b   :  { %1628 = vmatpush.bf16.msra.mxu0 %v3749_v37  ;;  %1654 = vmatpush.bf16.msra.mxu2 %v3777_v47 }
 0x28c   :  { %1647 = vmatpush.bf16.msra.mxu1 %v5907_v42  ;;  %1673 = vmatpush.bf16.msra.mxu3 %v5908_v19 }
 0x28f   :  { %1629 = vmatpush.bf16.msra.mxu0 %v3782_v49  ;;  %1655 = vmatpush.bf16.msra.mxu2 %v3812_v59 }
 0x290   :  { %1648 = vmatpush.bf16.msra.mxu1 %v5909_v55  ;;  %1674 = vmatpush.bf16.msra.mxu3 %v4023_v15 }
 0x293   :  { %1630 = vmatpush.bf16.msra.mxu0 %v3818_v61  ;;  %1656 = vmatpush.bf16.msra.mxu2 %v3848_v7 }
 0x294   :  { %1717 = vmatpush.bf16.msrb.mxu1 %v5910_v1  ;;  %1743 = vmatpush.bf16.msrb.mxu3 %v4052_v28 }
 0x295   :  { %1649 = vmatmul.bf16.vlgmr.msra.gmra.mxu1 %v1497_v5  ;;  %1675 = vmatmul.bf16.vlgmr.msra.gmra.mxu3 %v1497_v5 }
 0x297   :  { %1631 = vmatpush.bf16.msra.mxu0 %v5856_v36  ;;  %1657 = vmatpush.bf16.msra.mxu2 %v5857_v60 }
 0x298   :  { %1718 = vmatpush.bf16.msrb.mxu1 %v4065_v35  ;;  %1744 = vmatpush.bf16.msrb.mxu3 %v4070_v39 }
 0x29a   :  { %1559 = vmatmul.bf16.vlgmr.msrb.gmra.mxu0 %v1497_v5  ;;  %1585 = vmatmul.bf16.vlgmr.msrb.gmra.mxu2 %v1497_v5 }
 0x29b   :  { %1632 = vmatpush.bf16.msra.mxu0 %v5860_v3  ;;  %1658 = vmatpush.bf16.msra.mxu2 %v5861_v21 }
 0x29c   :  { %1719 = vmatpush.bf16.msrb.mxu1 %v5911_v57  ;;  %1745 = vmatpush.bf16.msrb.mxu3 %v4088_v52 }
 0x29f   :  { %1633 = vmatpush.bf16.msra.mxu0 %v5864_v33  ;;  %1659 = vmatpush.bf16.msra.mxu2 %v5865_v13 }
 0x2a0   :  { %1720 = vmatpush.bf16.msrb.mxu1 %v4101_v58  ;;  %1746 = vmatpush.bf16.msrb.mxu3 %v4106_v63 }
 0x2a3   :  { %1634 = vmatpush.bf16.msra.mxu0 %v5867_v54  ;;  %1660 = vmatpush.bf16.msra.mxu2 %v5868_v38  ;;  %v6026_v38 = vld [vmem:[#allocation76_spill] sm:$0xff] }
 0x2a4   :  { %1721 = vmatpush.bf16.msrb.mxu1 %v5964_v4  ;;  %1747 = vmatpush.bf16.msrb.mxu3 %v5965_v23 }
 0x2a7   :  { %1635 = vmatpush.bf16.msra.mxu0 %v5966_v48  ;;  %1661 = vmatpush.bf16.msra.mxu2 %v5967_v43  ;;  %v6024_v48 = vld [vmem:[#allocation17_spill] sm:$0xff] }
 0x2a8   :  { %1722 = vmatpush.bf16.msrb.mxu1 %v5970_v24  ;;  %1748 = vmatpush.bf16.msrb.mxu3 %v5971_v18  ;;  %v6023_v24 = vld [vmem:[#allocation15_spill] sm:$0xff] }
 0x2aa   :  { %1636 = vmatmul.bf16.vlgmr.msra.gmra.mxu0 %v1497_v5  ;;  %1662 = vmatmul.bf16.vlgmr.msra.gmra.mxu2 %v1497_v5  ;;  %v5986_v5 = vld [vmem:[#allocation68_spill] sm:$0xff] }
 0x2ab   :  { %1704 = vmatpush.bf16.msrb.mxu0 %v5968_v51  ;;  %1730 = vmatpush.bf16.msrb.mxu2 %v5969_v9 }
 0x2ac   :  { %1723 = vmatpush.bf16.msrb.mxu1 %v5974_v10  ;;  %1749 = vmatpush.bf16.msrb.mxu3 %v5975_v11 }
 0x2af   :  { %1705 = vmatpush.bf16.msrb.mxu0 %v5972_v31  ;;  %1731 = vmatpush.bf16.msrb.mxu2 %v5973_v16  ;;  %v6022_v16 = vld [vmem:[#allocation13_spill] sm:$0xff] }
 0x2b0   :  { %1724 = vmatpush.bf16.msrb.mxu1 %v5978_v32  ;;  %1750 = vmatpush.bf16.msrb.mxu3 %v5979_v20  ;;  %v5989_v32 = vld [vmem:[#allocation52_spill] sm:$0xff]  ;;  %v5990_v20 = vld [vmem:[#allocation77_spill] sm:$0xff] }
 0x2b3   :  { %1706 = vmatpush.bf16.msrb.mxu0 %v5976_v29  ;;  %1732 = vmatpush.bf16.msrb.mxu2 %v5977_v27  ;;  %v5987_v29 = vld [vmem:[#allocation70_spill] sm:$0xff]  ;;  %v5988_v27 = vld [vmem:[#allocation51_spill] sm:$0xff] }
 0x2b4   :  { %1769 = vmatpush.bf16.msra.mxu1 %v5980_v22  ;;  %1795 = vmatpush.bf16.msra.mxu3 %v5981_v17  ;;  %v5991_v22 = vld [vmem:[#allocation78_spill] sm:$0xff]  ;;  %v5992_v17 = vld [vmem:[#allocation57_spill] sm:$0xff] }
 0x2b7   :  { %1707 = vmatpush.bf16.msrb.mxu0 %v5982_v0  ;;  %1733 = vmatpush.bf16.msrb.mxu2 %v5983_v30  ;;  %v5993_v0 = vld [vmem:[#allocation60_spill] sm:$0xff]  ;;  %v5994_v30 = vld [vmem:[#allocation81_spill] sm:$0xff] }
 0x2b8   :  { %1770 = vmatpush.bf16.msra.mxu1 %v5984_v34  ;;  %1796 = vmatpush.bf16.msra.mxu3 %v5985_v40  ;;  %v5995_v34 = vld [vmem:[#allocation83_spill] sm:$0xff]  ;;  %v5996_v40 = vld [vmem:[#allocation65_spill] sm:$0xff] }
 0x2bb   :  { %1708 = vmatpush.bf16.msrb.mxu0 %v5986_v5  ;;  %1734 = vmatpush.bf16.msrb.mxu2 %v5987_v29  ;;  %v5997_v5 = vld [vmem:[#allocation67_spill] sm:$0xff]  ;;  %v5998_v29 = vld [vmem:[#allocation89_spill] sm:$0xff] }
 0x2bc   :  { %1771 = vmatpush.bf16.msra.mxu1 %v5988_v27  ;;  %1797 = vmatpush.bf16.msra.mxu3 %v5989_v32  ;;  %v5999_v27 = vld [vmem:[#allocation90_spill] sm:$0xff]  ;;  %v6000_v32 = vld [vmem:[#allocation91_spill] sm:$0xff] }
 0x2bf   :  { %1709 = vmatpush.bf16.msrb.mxu0 %v5990_v20  ;;  %1735 = vmatpush.bf16.msrb.mxu2 %v5991_v22  ;;  %v6001_v20 = vld [vmem:[#allocation92_spill] sm:$0xff]  ;;  %v6002_v22 = vld [vmem:[#allocation71_spill] sm:$0xff] }
 0x2c0   :  { %1772 = vmatpush.bf16.msra.mxu1 %v5992_v17  ;;  %1798 = vmatpush.bf16.msra.mxu3 %v5993_v0  ;;  %v6003_v17 = vld [vmem:[#allocation74_spill] sm:$0xff]  ;;  %v6004_v0 = vld [vmem:[#allocation93_spill] sm:$0xff] }
 0x2c3   :  { %1710 = vmatpush.bf16.msrb.mxu0 %v5994_v30  ;;  %1736 = vmatpush.bf16.msrb.mxu2 %v5995_v34  ;;  %v6005_v30 = vld [vmem:[#allocation96_spill] sm:$0xff]  ;;  %v6006_v34 = vld [vmem:[#allocation79_spill] sm:$0xff] }
 0x2c4   :  { %1773 = vmatpush.bf16.msra.mxu1 %v5996_v40  ;;  %1799 = vmatpush.bf16.msra.mxu3 %v5997_v5  ;;  %v6007_v40 = vld [vmem:[#allocation80_spill] sm:$0xff]  ;;  %v6008_v5 = vld [vmem:[#allocation99_spill] sm:$0xff] }
 0x2c7   :  { %1711 = vmatpush.bf16.msrb.mxu0 %v5998_v29  ;;  %1737 = vmatpush.bf16.msrb.mxu2 %v5999_v27  ;;  %v6009_v29 = vld [vmem:[#allocation100_spill] sm:$0xff] }
 0x2c8   :  { %1774 = vmatpush.bf16.msra.mxu1 %v6002_v22  ;;  %1800 = vmatpush.bf16.msra.mxu3 %v6003_v17  ;;  %v6010_v27 = vld [vmem:[#allocation84_spill] sm:$0xff]  ;;  %v6014_v17 = vld [vmem:[#allocation107_spill] sm:$0xff] }
 0x2c9   :  { %v6013_v22 = vld [vmem:[#allocation104_spill] sm:$0xff] }
 0x2cb   :  { %1756 = vmatpush.bf16.msra.mxu0 %v6000_v32  ;;  %1782 = vmatpush.bf16.msra.mxu2 %v6001_v20  ;;  %v6011_v32 = vld [vmem:[#allocation86_spill] sm:$0xff] }
 0x2cc   :  { %1775 = vmatpush.bf16.msra.mxu1 %v6006_v34  ;;  %1801 = vmatpush.bf16.msra.mxu3 %v6007_v40  ;;  %v6012_v20 = vld [vmem:[#allocation102_spill] sm:$0xff]  ;;  %v6017_v34 = vld [vmem:[#allocation112_spill] sm:$0xff]  ;;  %v6018_v40 = vld [vmem:[#allocation115_spill] sm:$0xff] }
 0x2cf   :  { %1757 = vmatpush.bf16.msra.mxu0 %v6004_v0  ;;  %1783 = vmatpush.bf16.msra.mxu2 %v6005_v30  ;;  %v6015_v0 = vld [vmem:[#allocation108_spill] sm:$0xff]  ;;  %v6016_v30 = vld [vmem:[#allocation109_spill] sm:$0xff] }
 0x2d0   :  { %1776 = vmatpush.bf16.msra.mxu1 %v6010_v27  ;;  %1802 = vmatpush.bf16.msra.mxu3 %v6011_v32  ;;  %v6021_v27 = vld [vmem:[#allocation120_spill] sm:$0xff] }
 0x2d3   :  { %1758 = vmatpush.bf16.msra.mxu0 %v6008_v5  ;;  %1784 = vmatpush.bf16.msra.mxu2 %v6009_v29  ;;  %v6019_v5 = vld [vmem:[#allocation116_spill] sm:$0xff]  ;;  %v6020_v29 = vld [vmem:[#allocation118_spill] sm:$0xff] }
 0x2d7   :  { %1759 = vmatpush.bf16.msra.mxu0 %v6012_v20  ;;  %1785 = vmatpush.bf16.msra.mxu2 %v6013_v22 }
 0x2db   :  { %1760 = vmatpush.bf16.msra.mxu0 %v6014_v17  ;;  %1786 = vmatpush.bf16.msra.mxu2 %v6015_v0 }
 0x2df   :  { %1761 = vmatpush.bf16.msra.mxu0 %v6016_v30  ;;  %1787 = vmatpush.bf16.msra.mxu2 %v6017_v34 }
 0x2e3   :  { %1762 = vmatpush.bf16.msra.mxu0 %v6018_v40  ;;  %1788 = vmatpush.bf16.msra.mxu2 %v6019_v5 }
 0x2e7   :  { %1763 = vmatpush.bf16.msra.mxu0 %v6020_v29  ;;  %1789 = vmatpush.bf16.msra.mxu2 %v6021_v27 }
 0x2f0   :  { %v1521_v32 = vpop.f32.mrf.mxu1 }
 0x2f6   :  { %v1547_v20 = vpop.f32.mrf.mxu3 }
 0x2f8   :  { %v1523_v11 = vpop.f32.mrf.mxu1 }
 0x2fe   :  { %v1549_v22 = vpop.f32.mrf.mxu3 }
 0x300   :  { %v1573_v10 = vpop.f32.mrf.mxu1 }
 0x306   :  { %v1599_v31 = vpop.f32.mrf.mxu3 }
 0x307   :  { %v1508_v17 = vpop.f32.mrf.mxu0 }
 0x308   :  { %v1509_v0 = vadd.f32 %v1508_v17, %v6022_v16  ;;  %v1575_v18 = vpop.f32.mrf.mxu1 }
 0x30a   :  { %v1522_v30 = vadd.f32 %v1521_v32, %v1509_v0  ;;  %v6025_v0 = vld [vmem:[#allocation58_spill] sm:$0xff] }
 0x30c   :  { %v1603_v9 = vmul.f32 0.5, %v1522_v30 }
 0x30d   :  { %v1534_v34 = vpop.f32.mrf.mxu2 }
 0x30e   :  { %v1535_v40 = vadd.f32 %v1534_v34, %v6023_v24  ;;  %v1601_v29 = vpop.f32.mrf.mxu3  ;;  %3391 = vtanh.f32 %v1603_v9  ;;  %v313_v34 = vadd.f32 %v6026_v38, %v6025_v0  ;;  %v6056_v0 = vld [vmem:[#allocation68_spill] sm:$0xff] }
 0x30f   :  { %v1510_v5 = vpop.f32.mrf.mxu0 }
 0x310   :  { %v1548_v51 = vadd.f32 %v1547_v20, %v1535_v40 }
 0x312   :  { %v1607_v43 = vmul.f32 0.5, %v1548_v51  ;;  %v1650_v27 = vpop.f32.mrf.mxu1 }
 0x313   :  { %v1681_v51 = vadd.f32 %v1650_v27, %v313_v34 }
 0x314   :  { %3393 = vtanh.f32 %v1607_v43  ;;  %v3392_v4 = vpop.eup %3391 }
 0x315   :  { %v1536_v11 = vpop.f32.mrf.mxu2  ;;  %v1605_v20 = vadd.f32 1.0, %v3392_v4  ;;  %v6027_v4 = vld [vmem:[#allocation54_spill] sm:$0xff] }
 0x317   :  { %v1560_v22 = vpop.f32.mrf.mxu0  ;;  %v1606_v11 = vmul.f32 0.5, %v1605_v20  ;;  %v6029_v20 = vld [vmem:[#allocation69_spill] sm:$0xff] }
 0x318   :  { %v1561_v23 = vadd.f32 %v1560_v22, %v6024_v48  ;;  %v1676_v18 = vpop.f32.mrf.mxu3  ;;  %v1688_v48 = vmul.f32 0.5, %v1681_v51 }
 0x31a   :  { %v3394_v17 = vpop.eup %3393  ;;  %v1574_v16 = vadd.f32 %v1573_v10, %v1561_v23  ;;  %v1652_v30 = vpop.f32.mrf.mxu1 }
 0x31b   :  { %v1609_v32 = vadd.f32 1.0, %v3394_v17  ;;  %v6028_v30 = vld [vmem:[#allocation73_spill] sm:$0xff] }
 0x31c   :  { %3395 = vtanh.f32 %v1574_v16  ;;  %v284_v27 = vadd.f32 %v6028_v30, %v6027_v4 }
 0x31d   :  { %v1586_v29 = vpop.f32.mrf.mxu2  ;;  %v1610_v9 = vmul.f32 0.5, %v1609_v32 }
 0x31e   :  { %v1587_v43 = vadd.f32 %v1586_v29, %v4824_v45  ;;  %v6030_v29 = vld [vmem:[#allocation85_spill] sm:$0xff] }
 0x31f   :  { %v1562_v40 = vpop.f32.mrf.mxu0  ;;  %v1616_v23 = vmul.f32 %v1610_v9, %v4944_v41  ;;  %v371_v51 = vadd.f32 %v6030_v29, %v6029_v20  ;;  %v6055_v20 = vld [vmem:[#allocation47_spill] sm:$0xff] }
 0x320   :  { %v1600_v5 = vadd.f32 %v1599_v31, %v1587_v43  ;;  %v1678_v17 = vpop.f32.mrf.mxu3 }
 0x321   :  { %v1683_v40 = vadd.f32 %v1676_v18, %v371_v51 }
 0x322   :  { %v3396_v22 = vpop.eup %3395  ;;  %v1612_v24 = vmul.f32 0.5, %v1600_v5  ;;  %v6031_v5 = vld [vmem:[#allocation66_spill] sm:$0xff] }
 0x323   :  { %v1617_v10 = vmul.f32 %v3396_v22, %v1606_v11  ;;  %v6032_v11 = vld [vmem:[#allocation82_spill] sm:$0xff] }
 0x324   :  { %3397 = vtanh.f32 %v1612_v24  ;;  %v342_v22 = vadd.f32 %v6032_v11, %v6031_v5  ;;  %v6054_v5 = vld [vmem:[#allocation45_spill] sm:$0xff] }
 0x325   :  { %v5057_v38 = vadd.f32 %v1617_v10, %v1616_v23  ;;  %v1588_v16 = vpop.f32.mrf.mxu2  ;;  %3399 = vtanh.f32 %v1688_v48 }
 0x327   :  { %3401 = vtanh.f32 %v5057_v38  ;;  %v1637_v32 = vpop.f32.mrf.mxu0 }
 0x328   :  { %v1680_v31 = vadd.f32 %v1637_v32, %v284_v27  ;;  %v1693_v27 = vmul.f32 0.5, %v1683_v40 }
 0x32a   :  { %v3398_v34 = vpop.eup %3397  ;;  %v1684_v43 = vmul.f32 0.5, %v1680_v31 }
 0x32b   :  { %v1614_v41 = vadd.f32 1.0, %v3398_v34  ;;  %v3400_v9 = vpop.eup %3399 }
 0x32c   :  { %3403 = vtanh.f32 %v1684_v43  ;;  %v1690_v30 = vadd.f32 1.0, %v3400_v9 }
 0x32d   :  { %v3402_v24 = vpop.eup %3401  ;;  %v1615_v23 = vmul.f32 0.5, %v1614_v41  ;;  %v1663_v10 = vpop.f32.mrf.mxu2 }
 0x32e   :  { %v1682_v17 = vadd.f32 %v1663_v10, %v342_v22  ;;  %v1691_v31 = vmul.f32 0.5, %v1690_v30  ;;  %v6034_v10 = vld [vmem:[#allocation33_spill] sm:$0xff]  ;;  %v6038_v30 = vld [vmem:[#allocation43_spill] sm:$0xff] }
 0x32f   :  { %v1620_v48 = vmul.f32 %v3402_v24, %v1615_v23  ;;  %v1639_v16 = vpop.f32.mrf.mxu0  ;;  %v6033_v23 = vld [vmem:[#allocation26_spill] sm:$0xff] }
 0x330   :  { %3405 = vtanh.f32 %v1682_v17  ;;  %v1697_v43 = vmul.f32 %v1691_v31, %v4955_v50  ;;  %v6036_v17 = vld [vmem:[#allocation28_spill] sm:$0xff]  ;;  %v6037_v16 = vld [vmem:[#allocation30_spill] sm:$0xff]  ;;  %v6042_v31 = vld [vmem:[#allocation49_spill] sm:$0xff] }
 0x331   :  { %v1703_v32 = vpack.c.bf16 %v1620_v48, %v1620_v48  ;;  %3407 = vtanh.f32 %v1693_v27  ;;  %v6035_v48 = vld [vmem:[#allocation34_spill] sm:$0xff]  ;;  %v6039_v27 = vld [vmem:[#allocation44_spill] sm:$0xff] }
 0x332   :  { %v3404_v4 = vpop.eup %3403 }
 0x333   :  { %v1686_v29 = vadd.f32 1.0, %v3404_v4  ;;  %1725 = vmatmul.bf16.vlgmr.msrb.gmra.mxu1 %v1703_v32  ;;  %1751 = vmatmul.bf16.vlgmr.msrb.gmra.mxu3 %v1703_v32 }
 0x334   :  { %1846 = vmatpush.bf16.msrb.mxu1 %v5896_v62  ;;  %1872 = vmatpush.bf16.msrb.mxu3 %v5897_v56 }
 0x335   :  { %v1687_v18 = vmul.f32 0.5, %v1686_v29  ;;  %v1665_v34 = vpop.f32.mrf.mxu2  ;;  %v6041_v29 = vld [vmem:[#allocation36_spill] sm:$0xff] }
 0x336   :  { %v3406_v51 = vpop.eup %3405  ;;  %v6044_v34 = vld [vmem:[#allocation37_spill] sm:$0xff] }
 0x337   :  { %v1698_v41 = vmul.f32 %v3406_v51, %v1687_v18  ;;  %v3408_v9 = vpop.eup %3407  ;;  %v6043_v18 = vld [vmem:[#allocation50_spill] sm:$0xff] }
 0x338   :  { %1847 = vmatpush.bf16.msrb.mxu1 %v5898_v14  ;;  %1873 = vmatpush.bf16.msrb.mxu3 %v5899_v26  ;;  %v1695_v40 = vadd.f32 1.0, %v3408_v9  ;;  %v6045_v51 = vld [vmem:[#allocation38_spill] sm:$0xff]  ;;  %v6048_v9 = vld [vmem:[#allocation39_spill] sm:$0xff] }
 0x339   :  { %v5071_v4 = vadd.f32 %v1698_v41, %v1697_v43  ;;  %v6046_v43 = vld [vmem:[#allocation53_spill] sm:$0xff]  ;;  %v6047_v41 = vld [vmem:[#allocation56_spill] sm:$0xff] }
 0x33a   :  { %v1696_v50 = vmul.f32 0.5, %v1695_v40  ;;  %v6049_v40 = vld [vmem:[#allocation40_spill] sm:$0xff] }
 0x33b   :  { %3409 = vtanh.f32 %v5071_v4 }
 0x33c   :  { %1848 = vmatpush.bf16.msrb.mxu1 %v5900_v44  ;;  %1874 = vmatpush.bf16.msrb.mxu3 %v5901_v53 }
 0x340   :  { %1849 = vmatpush.bf16.msrb.mxu1 %v5902_v2  ;;  %1875 = vmatpush.bf16.msrb.mxu3 %v5903_v8 }
 0x341   :  { %v3410_v24 = vpop.eup %3409 }
 0x342   :  { %v1701_v11 = vmul.f32 %v3410_v24, %v1696_v50  ;;  %v6050_v50 = vld [vmem:[#allocation41_spill] sm:$0xff]  ;;  %v6051_v24 = vld [vmem:[#allocation42_spill] sm:$0xff] }
 0x343   :  { %1777 = vmatmul.bf16.vlgmr.msra.gmra.mxu1 %v1703_v32  ;;  %1803 = vmatmul.bf16.vlgmr.msra.gmra.mxu3 %v1703_v32  ;;  %v6040_v32 = vld [vmem:[#allocation35_spill] sm:$0xff] }
 0x344   :  { %1850 = vmatpush.bf16.msrb.mxu1 %v5904_v25  ;;  %1876 = vmatpush.bf16.msrb.mxu3 %v5905_v12  ;;  %v1702_v22 = vpack.c.bf16 %v1701_v11, %v1701_v11  ;;  %v6052_v11 = vld [vmem:[#allocation63_spill] sm:$0xff] }
 0x346   :  { %1712 = vmatmul.bf16.vlgmr.msrb.gmra.mxu0 %v1702_v22  ;;  %1738 = vmatmul.bf16.vlgmr.msrb.gmra.mxu2 %v1702_v22 }
 0x347   :  { %1833 = vmatpush.bf16.msrb.mxu0 %v3749_v37  ;;  %1859 = vmatpush.bf16.msrb.mxu2 %v3777_v47 }
 0x348   :  { %1851 = vmatpush.bf16.msrb.mxu1 %v5906_v6  ;;  %1877 = vmatpush.bf16.msrb.mxu3 %v3960_v46 }
 0x34b   :  { %1834 = vmatpush.bf16.msrb.mxu0 %v3782_v49  ;;  %1860 = vmatpush.bf16.msrb.mxu2 %v3812_v59 }
 0x34c   :  { %1852 = vmatpush.bf16.msrb.mxu1 %v5907_v42  ;;  %1878 = vmatpush.bf16.msrb.mxu3 %v5908_v19 }
 0x34f   :  { %1835 = vmatpush.bf16.msrb.mxu0 %v3818_v61  ;;  %1861 = vmatpush.bf16.msrb.mxu2 %v3848_v7 }
 0x350   :  { %1853 = vmatpush.bf16.msrb.mxu1 %v5909_v55  ;;  %1879 = vmatpush.bf16.msrb.mxu3 %v4023_v15 }
 0x353   :  { %1836 = vmatpush.bf16.msrb.mxu0 %v5856_v36  ;;  %1854 = vmatmul.bf16.vlgmr.msrb.gmra.mxu1 %v1702_v22 }
 0x354   :  { %1922 = vmatpush.bf16.msra.mxu1 %v5910_v1  ;;  %1948 = vmatpush.bf16.msra.mxu3 %v4052_v28 }
 0x355   :  { %1862 = vmatpush.bf16.msrb.mxu2 %v5857_v60  ;;  %1880 = vmatmul.bf16.vlgmr.msrb.gmra.mxu3 %v1702_v22 }
 0x356   :  { %1764 = vmatmul.bf16.vlgmr.msra.gmra.mxu0 %v1702_v22  ;;  %1790 = vmatmul.bf16.vlgmr.msra.gmra.mxu2 %v1702_v22 }
 0x357   :  { %1837 = vmatpush.bf16.msrb.mxu0 %v5860_v3 }
 0x358   :  { %1923 = vmatpush.bf16.msra.mxu1 %v4065_v35  ;;  %1949 = vmatpush.bf16.msra.mxu3 %v4070_v39 }
 0x359   :  { %1863 = vmatpush.bf16.msrb.mxu2 %v5861_v21 }
 0x35b   :  { %1838 = vmatpush.bf16.msrb.mxu0 %v5864_v33 }
 0x35c   :  { %1924 = vmatpush.bf16.msra.mxu1 %v5911_v57  ;;  %1950 = vmatpush.bf16.msra.mxu3 %v4088_v52 }
 0x35d   :  { %1864 = vmatpush.bf16.msrb.mxu2 %v5865_v13 }
 0x35f   :  { %1839 = vmatpush.bf16.msrb.mxu0 %v5867_v54 }
 0x360   :  { %1925 = vmatpush.bf16.msra.mxu1 %v4101_v58  ;;  %1951 = vmatpush.bf16.msra.mxu3 %v4106_v63 }
 0x361   :  { %1865 = vmatpush.bf16.msrb.mxu2 %v6033_v23 }
 0x363   :  { %1840 = vmatpush.bf16.msrb.mxu0 %v6036_v17  ;;  %v6094_v17 = vld [vmem:[#allocation17_spill] sm:$0xff] }
 0x364   :  { %1926 = vmatpush.bf16.msra.mxu1 %v6034_v10  ;;  %1952 = vmatpush.bf16.msra.mxu3 %v6035_v48 }
 0x365   :  { %1866 = vmatpush.bf16.msrb.mxu2 %v6037_v16 }
 0x366   :  { %1841 = vmatmul.bf16.vlgmr.msrb.gmra.mxu0 %v1702_v22 }
 0x367   :  { %1909 = vmatpush.bf16.msra.mxu0 %v6038_v30 }
 0x368   :  { %1927 = vmatpush.bf16.msra.mxu1 %v6040_v32  ;;  %1953 = vmatpush.bf16.msra.mxu3 %v6041_v29  ;;  %v6093_v32 = vld [vmem:[#allocation15_spill] sm:$0xff] }
 0x369   :  { %1935 = vmatpush.bf16.msra.mxu2 %v6039_v27 }
 0x36a   :  { %1867 = vmatmul.bf16.vlgmr.msrb.gmra.mxu2 %v1702_v22  ;;  %v6053_v22 = vld [vmem:[#allocation64_spill] sm:$0xff] }
 0x36b   :  { %1910 = vmatpush.bf16.msra.mxu0 %v6042_v31 }
 0x36c   :  { %1928 = vmatpush.bf16.msra.mxu1 %v6044_v34  ;;  %1954 = vmatpush.bf16.msra.mxu3 %v6045_v51 }
 0x36d   :  { %1936 = vmatpush.bf16.msra.mxu2 %v6043_v18  ;;  %v6092_v18 = vld [vmem:[#allocation13_spill] sm:$0xff] }
 0x36f   :  { %1911 = vmatpush.bf16.msra.mxu0 %v6046_v43  ;;  %v6057_v43 = vld [vmem:[#allocation70_spill] sm:$0xff] }
 0x370   :  { %1929 = vmatpush.bf16.msra.mxu1 %v6048_v9  ;;  %1955 = vmatpush.bf16.msra.mxu3 %v6049_v40  ;;  %v6059_v9 = vld [vmem:[#allocation52_spill] sm:$0xff]  ;;  %v6060_v40 = vld [vmem:[#allocation77_spill] sm:$0xff] }
 0x371   :  { %1937 = vmatpush.bf16.msra.mxu2 %v6047_v41  ;;  %v6058_v41 = vld [vmem:[#allocation51_spill] sm:$0xff] }
 0x373   :  { %1912 = vmatpush.bf16.msra.mxu0 %v6052_v11  ;;  %v6063_v11 = vld [vmem:[#allocation60_spill] sm:$0xff] }
 0x374   :  { %1974 = vmatpush.bf16.msrb.mxu1 %v6050_v50  ;;  %2000 = vmatpush.bf16.msrb.mxu3 %v6051_v24  ;;  %v6061_v50 = vld [vmem:[#allocation78_spill] sm:$0xff]  ;;  %v6062_v24 = vld [vmem:[#allocation57_spill] sm:$0xff] }
 0x375   :  { %1938 = vmatpush.bf16.msra.mxu2 %v6053_v22  ;;  %v6064_v22 = vld [vmem:[#allocation81_spill] sm:$0xff] }
 0x377   :  { %1913 = vmatpush.bf16.msra.mxu0 %v6056_v0  ;;  %v6067_v0 = vld [vmem:[#allocation67_spill] sm:$0xff] }
 0x378   :  { %1975 = vmatpush.bf16.msrb.mxu1 %v6054_v5  ;;  %2001 = vmatpush.bf16.msrb.mxu3 %v6055_v20  ;;  %v6065_v5 = vld [vmem:[#allocation83_spill] sm:$0xff]  ;;  %v6066_v20 = vld [vmem:[#allocation65_spill] sm:$0xff] }
 0x379   :  { %1939 = vmatpush.bf16.msra.mxu2 %v6057_v43  ;;  %v6068_v43 = vld [vmem:[#allocation89_spill] sm:$0xff] }
 0x37b   :  { %1914 = vmatpush.bf16.msra.mxu0 %v6060_v40  ;;  %v6071_v40 = vld [vmem:[#allocation92_spill] sm:$0xff] }
 0x37c   :  { %1976 = vmatpush.bf16.msrb.mxu1 %v6058_v41  ;;  %2002 = vmatpush.bf16.msrb.mxu3 %v6059_v9  ;;  %v6069_v41 = vld [vmem:[#allocation90_spill] sm:$0xff]  ;;  %v6070_v9 = vld [vmem:[#allocation91_spill] sm:$0xff] }
 0x37d   :  { %1940 = vmatpush.bf16.msra.mxu2 %v6061_v50  ;;  %v6072_v50 = vld [vmem:[#allocation71_spill] sm:$0xff] }
 0x37f   :  { %1915 = vmatpush.bf16.msra.mxu0 %v6064_v22  ;;  %v6075_v22 = vld [vmem:[#allocation96_spill] sm:$0xff] }
 0x380   :  { %1977 = vmatpush.bf16.msrb.mxu1 %v6062_v24  ;;  %2003 = vmatpush.bf16.msrb.mxu3 %v6063_v11  ;;  %v6073_v24 = vld [vmem:[#allocation74_spill] sm:$0xff]  ;;  %v6074_v11 = vld [vmem:[#allocation93_spill] sm:$0xff] }
 0x381   :  { %1941 = vmatpush.bf16.msra.mxu2 %v6065_v5  ;;  %v6076_v5 = vld [vmem:[#allocation79_spill] sm:$0xff] }
 0x383   :  { %1916 = vmatpush.bf16.msra.mxu0 %v6068_v43  ;;  %v6079_v43 = vld [vmem:[#allocation100_spill] sm:$0xff] }
 0x384   :  { %1978 = vmatpush.bf16.msrb.mxu1 %v6066_v20  ;;  %2004 = vmatpush.bf16.msrb.mxu3 %v6067_v0  ;;  %v6077_v20 = vld [vmem:[#allocation80_spill] sm:$0xff]  ;;  %v6078_v0 = vld [vmem:[#allocation99_spill] sm:$0xff] }
 0x385   :  { %1942 = vmatpush.bf16.msra.mxu2 %v6069_v41  ;;  %v6080_v41 = vld [vmem:[#allocation84_spill] sm:$0xff] }
 0x387   :  { %1961 = vmatpush.bf16.msrb.mxu0 %v6070_v9  ;;  %v6081_v9 = vld [vmem:[#allocation86_spill] sm:$0xff] }
 0x388   :  { %1979 = vmatpush.bf16.msrb.mxu1 %v6072_v50  ;;  %2005 = vmatpush.bf16.msrb.mxu3 %v6073_v24  ;;  %v6083_v50 = vld [vmem:[#allocation104_spill] sm:$0xff]  ;;  %v6084_v24 = vld [vmem:[#allocation107_spill] sm:$0xff] }
 0x389   :  { %1987 = vmatpush.bf16.msrb.mxu2 %v6071_v40  ;;  %v6082_v40 = vld [vmem:[#allocation102_spill] sm:$0xff] }
 0x38b   :  { %1962 = vmatpush.bf16.msrb.mxu0 %v6074_v11  ;;  %v6085_v11 = vld [vmem:[#allocation108_spill] sm:$0xff] }
 0x38c   :  { %1980 = vmatpush.bf16.msrb.mxu1 %v6076_v5  ;;  %2006 = vmatpush.bf16.msrb.mxu3 %v6077_v20  ;;  %v6087_v5 = vld [vmem:[#allocation112_spill] sm:$0xff]  ;;  %v6088_v20 = vld [vmem:[#allocation115_spill] sm:$0xff] }
 0x38d   :  { %1988 = vmatpush.bf16.msrb.mxu2 %v6075_v22  ;;  %v6086_v22 = vld [vmem:[#allocation109_spill] sm:$0xff] }
 0x38f   :  { %1963 = vmatpush.bf16.msrb.mxu0 %v6078_v0  ;;  %v6089_v0 = vld [vmem:[#allocation116_spill] sm:$0xff] }
 0x390   :  { %1981 = vmatpush.bf16.msrb.mxu1 %v6080_v41  ;;  %2007 = vmatpush.bf16.msrb.mxu3 %v6081_v9  ;;  %v6091_v41 = vld [vmem:[#allocation120_spill] sm:$0xff] }
 0x391   :  { %1989 = vmatpush.bf16.msrb.mxu2 %v6079_v43  ;;  %v6090_v43 = vld [vmem:[#allocation118_spill] sm:$0xff] }
 0x393   :  { %1964 = vmatpush.bf16.msrb.mxu0 %v6082_v40 }
 0x395   :  { %1990 = vmatpush.bf16.msrb.mxu2 %v6083_v50 }
 0x397   :  { %1965 = vmatpush.bf16.msrb.mxu0 %v6084_v24 }
 0x399   :  { %1991 = vmatpush.bf16.msrb.mxu2 %v6085_v11 }
 0x39b   :  { %1966 = vmatpush.bf16.msrb.mxu0 %v6086_v22 }
 0x39d   :  { %1992 = vmatpush.bf16.msrb.mxu2 %v6087_v5 }
 0x39f   :  { %1967 = vmatpush.bf16.msrb.mxu0 %v6088_v20 }
 0x3a1   :  { %1993 = vmatpush.bf16.msrb.mxu2 %v6089_v0 }
 0x3a3   :  { %1968 = vmatpush.bf16.msrb.mxu0 %v6090_v43 }
 0x3a5   :  { %1994 = vmatpush.bf16.msrb.mxu2 %v6091_v41 }
 0x3b0   :  { %v1726_v9 = vpop.f32.mrf.mxu1 }
 0x3b6   :  { %v1752_v40 = vpop.f32.mrf.mxu3 }
 0x3b8   :  { %v1728_v51 = vpop.f32.mrf.mxu1 }
 0x3be   :  { %v1754_v50 = vpop.f32.mrf.mxu3 }
 0x3c0   :  { %v1778_v34 = vpop.f32.mrf.mxu1 }
 0x3c3   :  { %v1713_v24 = vpop.f32.mrf.mxu0 }
 0x3c4   :  { %v1714_v11 = vadd.f32 %v1713_v24, %v6092_v18 }
 0x3c6   :  { %v1804_v31 = vpop.f32.mrf.mxu3  ;;  %v1727_v22 = vadd.f32 %v1726_v9, %v1714_v11 }
 0x3c8   :  { %v1780_v29 = vpop.f32.mrf.mxu1  ;;  %v1808_v27 = vmul.f32 0.5, %v1727_v22 }
 0x3c9   :  { %v1739_v5 = vpop.f32.mrf.mxu2 }
 0x3ca   :  { %v1740_v20 = vadd.f32 %v1739_v5, %v6093_v32  ;;  %3411 = vtanh.f32 %v1808_v27 }
 0x3cb   :  { %v1715_v0 = vpop.f32.mrf.mxu0 }
 0x3cc   :  { %v1753_v30 = vadd.f32 %v1752_v40, %v1740_v20  ;;  %v6095_v0 = vld [vmem:[#allocation88_spill] sm:$0xff] }
 0x3ce   :  { %v1806_v43 = vpop.f32.mrf.mxu3  ;;  %v1812_v16 = vmul.f32 0.5, %v1753_v30 }
 0x3d0   :  { %3413 = vtanh.f32 %v1812_v16  ;;  %v1855_v41 = vpop.f32.mrf.mxu1  ;;  %v3412_v10 = vpop.eup %3411 }
 0x3d1   :  { %v1741_v51 = vpop.f32.mrf.mxu2  ;;  %v1810_v5 = vadd.f32 1.0, %v3412_v10  ;;  %v1886_v20 = vadd.f32 %v1855_v41, %v6095_v0  ;;  %v6097_v0 = vld [vmem:[#allocation97_spill] sm:$0xff] }
 0x3d3   :  { %v1765_v50 = vpop.f32.mrf.mxu0  ;;  %v1811_v40 = vmul.f32 0.5, %v1810_v5  ;;  %v1893_v32 = vmul.f32 0.5, %v1886_v20 }
 0x3d4   :  { %v1766_v48 = vadd.f32 %v1765_v50, %v6094_v17 }
 0x3d6   :  { %v3414_v24 = vpop.eup %3413  ;;  %v1779_v18 = vadd.f32 %v1778_v34, %v1766_v48 }
 0x3d7   :  { %v1814_v9 = vadd.f32 1.0, %v3414_v24  ;;  %v6096_v24 = vld [vmem:[#allocation87_spill] sm:$0xff] }
 0x3d8   :  { %v1881_v29 = vpop.f32.mrf.mxu3  ;;  %3415 = vtanh.f32 %v1779_v18  ;;  %v1857_v11 = vpop.f32.mrf.mxu1 }
 0x3d9   :  { %v1791_v22 = vpop.f32.mrf.mxu2  ;;  %v1815_v27 = vmul.f32 0.5, %v1814_v9  ;;  %v1888_v20 = vadd.f32 %v1881_v29, %v6097_v0 }
 0x3da   :  { %v1792_v30 = vadd.f32 %v1791_v22, %v4824_v45 }
 0x3db   :  { %v1767_v16 = vpop.f32.mrf.mxu0  ;;  %v1821_v17 = vmul.f32 %v1815_v27, %v5057_v38 }
 0x3dc   :  { %v1805_v43 = vadd.f32 %v1804_v31, %v1792_v30 }
 0x3de   :  { %v3416_v51 = vpop.eup %3415  ;;  %v1817_v50 = vmul.f32 0.5, %v1805_v43 }
 0x3df   :  { %v1822_v48 = vmul.f32 %v3416_v51, %v1811_v40  ;;  %v1898_v51 = vmul.f32 0.5, %v1888_v20 }
 0x3e0   :  { %v1883_v34 = vpop.f32.mrf.mxu3  ;;  %3417 = vtanh.f32 %v1817_v50 }
 0x3e1   :  { %v5172_v18 = vadd.f32 %v1822_v48, %v1821_v17  ;;  %v1793_v10 = vpop.f32.mrf.mxu2  ;;  %3419 = vtanh.f32 %v1893_v32  ;;  %v6098_v17 = vld [vmem:[#allocation94_spill] sm:$0xff] }
 0x3e3   :  { %3421 = vtanh.f32 %v5172_v18  ;;  %v1842_v41 = vpop.f32.mrf.mxu0 }
 0x3e4   :  { %v1885_v9 = vadd.f32 %v1842_v41, %v6096_v24 }
 0x3e6   :  { %v3418_v11 = vpop.eup %3417  ;;  %v1889_v31 = vmul.f32 0.5, %v1885_v9 }
 0x3e7   :  { %v1819_v5 = vadd.f32 1.0, %v3418_v11  ;;  %v3420_v22 = vpop.eup %3419 }
 0x3e8   :  { %3423 = vtanh.f32 %v1889_v31  ;;  %v1895_v32 = vadd.f32 1.0, %v3420_v22 }
 0x3e9   :  { %v3422_v38 = vpop.eup %3421  ;;  %v1820_v30 = vmul.f32 0.5, %v1819_v5 }
 0x3ea   :  { %v1896_v10 = vmul.f32 0.5, %v1895_v32  ;;  %v6105_v32 = vld [vmem:[#allocation35_spill] sm:$0xff] }
 0x3eb   :  { %v1825_v16 = vmul.f32 %v3422_v38, %v1820_v30  ;;  %v1844_v40 = vpop.f32.mrf.mxu0  ;;  %v6099_v30 = vld [vmem:[#allocation33_spill] sm:$0xff] }
 0x3ec   :  { %v1902_v9 = vmul.f32 %v1896_v10, %v5071_v4  ;;  %v6104_v40 = vld [vmem:[#allocation44_spill] sm:$0xff]  ;;  %v6110_v10 = vld [vmem:[#allocation38_spill] sm:$0xff] }
 0x3ed   :  { %v1868_v27 = vpop.f32.mrf.mxu2  ;;  %v1908_v50 = vpack.c.bf16 %v1825_v16, %v1825_v16  ;;  %v6101_v16 = vld [vmem:[#allocation28_spill] sm:$0xff] }
 0x3ee   :  { %v1887_v43 = vadd.f32 %v1868_v27, %v6098_v17  ;;  %v3424_v48 = vpop.eup %3423  ;;  %v6100_v27 = vld [vmem:[#allocation34_spill] sm:$0xff] }
 0x3ef   :  { %v1891_v34 = vadd.f32 1.0, %v3424_v48  ;;  %1930 = vmatmul.bf16.vlgmr.msra.gmra.mxu1 %v1908_v50  ;;  %1956 = vmatmul.bf16.vlgmr.msra.gmra.mxu3 %v1908_v50  ;;  %v6102_v17 = vld [vmem:[#allocation30_spill] sm:$0xff] }
 0x3f0   :  { %3425 = vtanh.f32 %v1887_v43  ;;  %2051 = vmatpush.bf16.msra.mxu1 %v5896_v62  ;;  %2077 = vmatpush.bf16.msra.mxu3 %v5897_v56  ;;  %v6103_v43 = vld [vmem:[#allocation43_spill] sm:$0xff]  ;;  %v6108_v48 = vld [vmem:[#allocation50_spill] sm:$0xff] }
 0x3f1   :  { %3427 = vtanh.f32 %v1898_v51  ;;  %v1892_v29 = vmul.f32 0.5, %v1891_v34  ;;  %v6106_v51 = vld [vmem:[#allocation36_spill] sm:$0xff]  ;;  %v6109_v34 = vld [vmem:[#allocation37_spill] sm:$0xff] }
 0x3f4   :  { %2052 = vmatpush.bf16.msra.mxu1 %v5898_v14  ;;  %2078 = vmatpush.bf16.msra.mxu3 %v5899_v26 }
 0x3f5   :  { %v1870_v41 = vpop.f32.mrf.mxu2 }
 0x3f6   :  { %v3426_v24 = vpop.eup %3425  ;;  %v6112_v41 = vld [vmem:[#allocation56_spill] sm:$0xff] }
 0x3f7   :  { %v1903_v11 = vmul.f32 %v3426_v24, %v1892_v29  ;;  %v3428_v31 = vpop.eup %3427  ;;  %v6111_v29 = vld [vmem:[#allocation53_spill] sm:$0xff]  ;;  %v6113_v24 = vld [vmem:[#allocation39_spill] sm:$0xff] }
 0x3f8   :  { %2053 = vmatpush.bf16.msra.mxu1 %v5900_v44  ;;  %2079 = vmatpush.bf16.msra.mxu3 %v5901_v53  ;;  %v1900_v22 = vadd.f32 1.0, %v3428_v31  ;;  %v6116_v31 = vld [vmem:[#allocation42_spill] sm:$0xff] }
 0x3f9   :  { %v5183_v5 = vadd.f32 %v1903_v11, %v1902_v9  ;;  %v6114_v9 = vld [vmem:[#allocation40_spill] sm:$0xff]  ;;  %v6115_v11 = vld [vmem:[#allocation41_spill] sm:$0xff] }
 0x3fa   :  { %v1901_v4 = vmul.f32 0.5, %v1900_v22  ;;  %v6117_v22 = vld [vmem:[#allocation63_spill] sm:$0xff] }
 0x3fb   :  { %3429 = vtanh.f32 %v5183_v5 }
 0x3fc   :  { %2054 = vmatpush.bf16.msra.mxu1 %v5902_v2  ;;  %2080 = vmatpush.bf16.msra.mxu3 %v5903_v8 }
 0x3ff   :  { %1982 = vmatmul.bf16.vlgmr.msrb.gmra.mxu1 %v1908_v50  ;;  %2008 = vmatmul.bf16.vlgmr.msrb.gmra.mxu3 %v1908_v50  ;;  %v6107_v50 = vld [vmem:[#allocation49_spill] sm:$0xff] }
 0x400   :  { %2055 = vmatpush.bf16.msra.mxu1 %v5904_v25  ;;  %2081 = vmatpush.bf16.msra.mxu3 %v5905_v12 }
 0x401   :  { %v3430_v0 = vpop.eup %3429 }
 0x402   :  { %v1906_v20 = vmul.f32 %v3430_v0, %v1901_v4  ;;  %v6118_v4 = vld [vmem:[#allocation64_spill] sm:$0xff]  ;;  %v6119_v0 = vld [vmem:[#allocation45_spill] sm:$0xff] }
 0x404   :  { %v1907_v38 = vpack.c.bf16 %v1906_v20, %v1906_v20  ;;  %2056 = vmatpush.bf16.msra.mxu1 %v5906_v6  ;;  %2082 = vmatpush.bf16.msra.mxu3 %v3960_v46  ;;  %v6120_v20 = vld [vmem:[#allocation47_spill] sm:$0xff] }
 0x406   :  { %1917 = vmatmul.bf16.vlgmr.msra.gmra.mxu0 %v1907_v38  ;;  %1943 = vmatmul.bf16.vlgmr.msra.gmra.mxu2 %v1907_v38 }
 0x407   :  { %2038 = vmatpush.bf16.msra.mxu0 %v3749_v37  ;;  %2064 = vmatpush.bf16.msra.mxu2 %v3777_v47 }
 0x408   :  { %2057 = vmatpush.bf16.msra.mxu1 %v5907_v42  ;;  %2083 = vmatpush.bf16.msra.mxu3 %v5908_v19 }
 0x40b   :  { %2039 = vmatpush.bf16.msra.mxu0 %v3782_v49  ;;  %2065 = vmatpush.bf16.msra.mxu2 %v3812_v59 }
 0x40c   :  { %2058 = vmatpush.bf16.msra.mxu1 %v5909_v55  ;;  %2084 = vmatpush.bf16.msra.mxu3 %v4023_v15 }
 0x40f   :  { %2040 = vmatpush.bf16.msra.mxu0 %v3818_v61  ;;  %2066 = vmatpush.bf16.msra.mxu2 %v3848_v7 }
 0x410   :  { %2127 = vmatpush.bf16.msrb.mxu1 %v5910_v1  ;;  %2153 = vmatpush.bf16.msrb.mxu3 %v4052_v28 }
 0x411   :  { %2059 = vmatmul.bf16.vlgmr.msra.gmra.mxu1 %v1907_v38  ;;  %2085 = vmatmul.bf16.vlgmr.msra.gmra.mxu3 %v1907_v38 }
 0x413   :  { %2041 = vmatpush.bf16.msra.mxu0 %v5856_v36  ;;  %2067 = vmatpush.bf16.msra.mxu2 %v5857_v60 }
 0x414   :  { %2128 = vmatpush.bf16.msrb.mxu1 %v4065_v35  ;;  %2154 = vmatpush.bf16.msrb.mxu3 %v4070_v39 }
 0x416   :  { %1969 = vmatmul.bf16.vlgmr.msrb.gmra.mxu0 %v1907_v38  ;;  %1995 = vmatmul.bf16.vlgmr.msrb.gmra.mxu2 %v1907_v38 }
 0x417   :  { %2042 = vmatpush.bf16.msra.mxu0 %v5860_v3  ;;  %2068 = vmatpush.bf16.msra.mxu2 %v5861_v21 }
 0x418   :  { %2129 = vmatpush.bf16.msrb.mxu1 %v5911_v57  ;;  %2155 = vmatpush.bf16.msrb.mxu3 %v4088_v52 }
 0x41b   :  { %2043 = vmatpush.bf16.msra.mxu0 %v5864_v33  ;;  %2069 = vmatpush.bf16.msra.mxu2 %v5865_v13 }
 0x41c   :  { %2130 = vmatpush.bf16.msrb.mxu1 %v4101_v58  ;;  %2156 = vmatpush.bf16.msrb.mxu3 %v4106_v63 }
 0x41f   :  { %2044 = vmatpush.bf16.msra.mxu0 %v5867_v54  ;;  %2070 = vmatpush.bf16.msra.mxu2 %v6033_v23  ;;  %v6161_v23 = vld [vmem:[#allocation98_spill] sm:$0xff] }
 0x420   :  { %2131 = vmatpush.bf16.msrb.mxu1 %v6099_v30  ;;  %2157 = vmatpush.bf16.msrb.mxu3 %v6100_v27 }
 0x423   :  { %2045 = vmatpush.bf16.msra.mxu0 %v6101_v16  ;;  %2071 = vmatpush.bf16.msra.mxu2 %v6102_v17  ;;  %v6159_v16 = vld [vmem:[#allocation17_spill] sm:$0xff] }
 0x424   :  { %2132 = vmatpush.bf16.msrb.mxu1 %v6105_v32  ;;  %2158 = vmatpush.bf16.msrb.mxu3 %v6106_v51  ;;  %v6158_v32 = vld [vmem:[#allocation15_spill] sm:$0xff] }
 0x426   :  { %2046 = vmatmul.bf16.vlgmr.msra.gmra.mxu0 %v1907_v38  ;;  %2072 = vmatmul.bf16.vlgmr.msra.gmra.mxu2 %v1907_v38  ;;  %v6121_v38 = vld [vmem:[#allocation68_spill] sm:$0xff] }
 0x427   :  { %2114 = vmatpush.bf16.msrb.mxu0 %v6103_v43  ;;  %2140 = vmatpush.bf16.msrb.mxu2 %v6104_v40 }
 0x428   :  { %2133 = vmatpush.bf16.msrb.mxu1 %v6109_v34  ;;  %2159 = vmatpush.bf16.msrb.mxu3 %v6110_v10 }
 0x42b   :  { %2115 = vmatpush.bf16.msrb.mxu0 %v6107_v50  ;;  %2141 = vmatpush.bf16.msrb.mxu2 %v6108_v48  ;;  %v6157_v48 = vld [vmem:[#allocation13_spill] sm:$0xff] }
 0x42c   :  { %2134 = vmatpush.bf16.msrb.mxu1 %v6113_v24  ;;  %2160 = vmatpush.bf16.msrb.mxu3 %v6114_v9  ;;  %v6124_v24 = vld [vmem:[#allocation52_spill] sm:$0xff]  ;;  %v6125_v9 = vld [vmem:[#allocation77_spill] sm:$0xff] }
 0x42f   :  { %2116 = vmatpush.bf16.msrb.mxu0 %v6111_v29  ;;  %2142 = vmatpush.bf16.msrb.mxu2 %v6112_v41  ;;  %v6122_v29 = vld [vmem:[#allocation70_spill] sm:$0xff]  ;;  %v6123_v41 = vld [vmem:[#allocation51_spill] sm:$0xff] }
 0x430   :  { %2179 = vmatpush.bf16.msra.mxu1 %v6115_v11  ;;  %2205 = vmatpush.bf16.msra.mxu3 %v6116_v31  ;;  %v6126_v11 = vld [vmem:[#allocation78_spill] sm:$0xff]  ;;  %v6127_v31 = vld [vmem:[#allocation57_spill] sm:$0xff] }
 0x433   :  { %2117 = vmatpush.bf16.msrb.mxu0 %v6117_v22  ;;  %2143 = vmatpush.bf16.msrb.mxu2 %v6118_v4  ;;  %v6128_v22 = vld [vmem:[#allocation60_spill] sm:$0xff]  ;;  %v6129_v4 = vld [vmem:[#allocation81_spill] sm:$0xff] }
 0x434   :  { %2180 = vmatpush.bf16.msra.mxu1 %v6119_v0  ;;  %2206 = vmatpush.bf16.msra.mxu3 %v6120_v20  ;;  %v6130_v0 = vld [vmem:[#allocation83_spill] sm:$0xff]  ;;  %v6131_v20 = vld [vmem:[#allocation65_spill] sm:$0xff] }
 0x437   :  { %2118 = vmatpush.bf16.msrb.mxu0 %v6121_v38  ;;  %2144 = vmatpush.bf16.msrb.mxu2 %v6122_v29  ;;  %v6132_v38 = vld [vmem:[#allocation67_spill] sm:$0xff]  ;;  %v6133_v29 = vld [vmem:[#allocation89_spill] sm:$0xff] }
 0x438   :  { %2181 = vmatpush.bf16.msra.mxu1 %v6123_v41  ;;  %2207 = vmatpush.bf16.msra.mxu3 %v6124_v24  ;;  %v6134_v41 = vld [vmem:[#allocation90_spill] sm:$0xff]  ;;  %v6135_v24 = vld [vmem:[#allocation91_spill] sm:$0xff] }
 0x43b   :  { %2119 = vmatpush.bf16.msrb.mxu0 %v6125_v9  ;;  %2145 = vmatpush.bf16.msrb.mxu2 %v6126_v11  ;;  %v6136_v9 = vld [vmem:[#allocation92_spill] sm:$0xff]  ;;  %v6137_v11 = vld [vmem:[#allocation71_spill] sm:$0xff] }
 0x43c   :  { %2182 = vmatpush.bf16.msra.mxu1 %v6127_v31  ;;  %2208 = vmatpush.bf16.msra.mxu3 %v6128_v22  ;;  %v6138_v31 = vld [vmem:[#allocation74_spill] sm:$0xff]  ;;  %v6139_v22 = vld [vmem:[#allocation93_spill] sm:$0xff] }
 0x43f   :  { %2120 = vmatpush.bf16.msrb.mxu0 %v6129_v4  ;;  %2146 = vmatpush.bf16.msrb.mxu2 %v6130_v0  ;;  %v6140_v4 = vld [vmem:[#allocation96_spill] sm:$0xff]  ;;  %v6141_v0 = vld [vmem:[#allocation79_spill] sm:$0xff] }
 0x440   :  { %2183 = vmatpush.bf16.msra.mxu1 %v6131_v20  ;;  %2209 = vmatpush.bf16.msra.mxu3 %v6132_v38  ;;  %v6142_v20 = vld [vmem:[#allocation80_spill] sm:$0xff]  ;;  %v6143_v38 = vld [vmem:[#allocation99_spill] sm:$0xff] }
 0x443   :  { %2121 = vmatpush.bf16.msrb.mxu0 %v6133_v29  ;;  %2147 = vmatpush.bf16.msrb.mxu2 %v6134_v41  ;;  %v6144_v29 = vld [vmem:[#allocation100_spill] sm:$0xff] }
 0x444   :  { %2184 = vmatpush.bf16.msra.mxu1 %v6137_v11  ;;  %2210 = vmatpush.bf16.msra.mxu3 %v6138_v31  ;;  %v6145_v41 = vld [vmem:[#allocation84_spill] sm:$0xff]  ;;  %v6149_v31 = vld [vmem:[#allocation107_spill] sm:$0xff] }
 0x445   :  { %v6148_v11 = vld [vmem:[#allocation104_spill] sm:$0xff] }
 0x447   :  { %2166 = vmatpush.bf16.msra.mxu0 %v6135_v24  ;;  %2192 = vmatpush.bf16.msra.mxu2 %v6136_v9  ;;  %v6146_v24 = vld [vmem:[#allocation86_spill] sm:$0xff] }
 0x448   :  { %2185 = vmatpush.bf16.msra.mxu1 %v6141_v0  ;;  %2211 = vmatpush.bf16.msra.mxu3 %v6142_v20  ;;  %v6147_v9 = vld [vmem:[#allocation102_spill] sm:$0xff]  ;;  %v6152_v0 = vld [vmem:[#allocation112_spill] sm:$0xff]  ;;  %v6153_v20 = vld [vmem:[#allocation115_spill] sm:$0xff] }
 0x44b   :  { %2167 = vmatpush.bf16.msra.mxu0 %v6139_v22  ;;  %2193 = vmatpush.bf16.msra.mxu2 %v6140_v4  ;;  %v6150_v22 = vld [vmem:[#allocation108_spill] sm:$0xff]  ;;  %v6151_v4 = vld [vmem:[#allocation109_spill] sm:$0xff] }
 0x44c   :  { %2186 = vmatpush.bf16.msra.mxu1 %v6145_v41  ;;  %2212 = vmatpush.bf16.msra.mxu3 %v6146_v24  ;;  %v6156_v41 = vld [vmem:[#allocation120_spill] sm:$0xff] }
 0x44f   :  { %2168 = vmatpush.bf16.msra.mxu0 %v6143_v38  ;;  %2194 = vmatpush.bf16.msra.mxu2 %v6144_v29  ;;  %v6154_v38 = vld [vmem:[#allocation116_spill] sm:$0xff]  ;;  %v6155_v29 = vld [vmem:[#allocation118_spill] sm:$0xff] }
 0x453   :  { %2169 = vmatpush.bf16.msra.mxu0 %v6147_v9  ;;  %2195 = vmatpush.bf16.msra.mxu2 %v6148_v11 }
 0x457   :  { %2170 = vmatpush.bf16.msra.mxu0 %v6149_v31  ;;  %2196 = vmatpush.bf16.msra.mxu2 %v6150_v22 }
 0x45b   :  { %2171 = vmatpush.bf16.msra.mxu0 %v6151_v4  ;;  %2197 = vmatpush.bf16.msra.mxu2 %v6152_v0 }
 0x45f   :  { %2172 = vmatpush.bf16.msra.mxu0 %v6153_v20  ;;  %2198 = vmatpush.bf16.msra.mxu2 %v6154_v38 }
 0x463   :  { %2173 = vmatpush.bf16.msra.mxu0 %v6155_v29  ;;  %2199 = vmatpush.bf16.msra.mxu2 %v6156_v41 }
 0x46c   :  { %v1931_v24 = vpop.f32.mrf.mxu1 }
 0x472   :  { %v1957_v9 = vpop.f32.mrf.mxu3 }
 0x474   :  { %v1933_v10 = vpop.f32.mrf.mxu1 }
 0x47a   :  { %v1959_v11 = vpop.f32.mrf.mxu3 }
 0x47c   :  { %v1983_v34 = vpop.f32.mrf.mxu1 }
 0x482   :  { %v2009_v50 = vpop.f32.mrf.mxu3 }
 0x483   :  { %v1918_v31 = vpop.f32.mrf.mxu0 }
 0x484   :  { %v1919_v22 = vadd.f32 %v1918_v31, %v6157_v48  ;;  %v1985_v51 = vpop.f32.mrf.mxu1 }
 0x486   :  { %v1932_v4 = vadd.f32 %v1931_v24, %v1919_v22  ;;  %v6160_v22 = vld [vmem:[#allocation58_spill] sm:$0xff] }
 0x488   :  { %v2013_v40 = vmul.f32 0.5, %v1932_v4 }
 0x489   :  { %v1944_v0 = vpop.f32.mrf.mxu2 }
 0x48a   :  { %v1945_v20 = vadd.f32 %v1944_v0, %v6158_v32  ;;  %v2011_v29 = vpop.f32.mrf.mxu3  ;;  %3431 = vtanh.f32 %v2013_v40  ;;  %v318_v0 = vadd.f32 %v6161_v23, %v6160_v22  ;;  %v6191_v22 = vld [vmem:[#allocation68_spill] sm:$0xff] }
 0x48b   :  { %v1920_v38 = vpop.f32.mrf.mxu0 }
 0x48c   :  { %v1958_v43 = vadd.f32 %v1957_v9, %v1945_v20 }
 0x48e   :  { %v2017_v17 = vmul.f32 0.5, %v1958_v43  ;;  %v2060_v41 = vpop.f32.mrf.mxu1 }
 0x48f   :  { %v2091_v43 = vadd.f32 %v2060_v41, %v318_v0 }
 0x490   :  { %3433 = vtanh.f32 %v2017_v17  ;;  %v3432_v30 = vpop.eup %3431 }
 0x491   :  { %v1946_v10 = vpop.f32.mrf.mxu2  ;;  %v2015_v9 = vadd.f32 1.0, %v3432_v30  ;;  %v6162_v30 = vld [vmem:[#allocation54_spill] sm:$0xff] }
 0x493   :  { %v1970_v11 = vpop.f32.mrf.mxu0  ;;  %v2016_v10 = vmul.f32 0.5, %v2015_v9  ;;  %v6164_v9 = vld [vmem:[#allocation69_spill] sm:$0xff] }
 0x494   :  { %v1971_v27 = vadd.f32 %v1970_v11, %v6159_v16  ;;  %v2086_v51 = vpop.f32.mrf.mxu3  ;;  %v2098_v16 = vmul.f32 0.5, %v2091_v43 }
 0x496   :  { %v3434_v31 = vpop.eup %3433  ;;  %v1984_v48 = vadd.f32 %v1983_v34, %v1971_v27  ;;  %v2062_v4 = vpop.f32.mrf.mxu1 }
 0x497   :  { %v2019_v24 = vadd.f32 1.0, %v3434_v31  ;;  %v6163_v4 = vld [vmem:[#allocation95_spill] sm:$0xff] }
 0x498   :  { %3435 = vtanh.f32 %v1984_v48  ;;  %v289_v41 = vadd.f32 %v6163_v4, %v6162_v30 }
 0x499   :  { %v1996_v29 = vpop.f32.mrf.mxu2  ;;  %v2020_v40 = vmul.f32 0.5, %v2019_v24 }
 0x49a   :  { %v1997_v17 = vadd.f32 %v1996_v29, %v4824_v45  ;;  %v6165_v29 = vld [vmem:[#allocation103_spill] sm:$0xff] }
 0x49b   :  { %v1972_v20 = vpop.f32.mrf.mxu0  ;;  %v2026_v27 = vmul.f32 %v2020_v40, %v5172_v18  ;;  %v376_v43 = vadd.f32 %v6165_v29, %v6164_v9  ;;  %v6190_v9 = vld [vmem:[#allocation47_spill] sm:$0xff] }
 0x49c   :  { %v2010_v38 = vadd.f32 %v2009_v50, %v1997_v17  ;;  %v2088_v31 = vpop.f32.mrf.mxu3 }
 0x49d   :  { %v2093_v20 = vadd.f32 %v2086_v51, %v376_v43 }
 0x49e   :  { %v3436_v11 = vpop.eup %3435  ;;  %v2022_v32 = vmul.f32 0.5, %v2010_v38  ;;  %v6166_v38 = vld [vmem:[#allocation66_spill] sm:$0xff] }
 0x49f   :  { %v2027_v34 = vmul.f32 %v3436_v11, %v2016_v10  ;;  %v6167_v10 = vld [vmem:[#allocation101_spill] sm:$0xff] }
 0x4a0   :  { %3437 = vtanh.f32 %v2022_v32  ;;  %v347_v11 = vadd.f32 %v6167_v10, %v6166_v38  ;;  %v6189_v38 = vld [vmem:[#allocation45_spill] sm:$0xff] }
 0x4a1   :  { %v5285_v23 = vadd.f32 %v2027_v34, %v2026_v27  ;;  %v1998_v48 = vpop.f32.mrf.mxu2  ;;  %3439 = vtanh.f32 %v2098_v16 }
 0x4a3   :  { %3441 = vtanh.f32 %v5285_v23  ;;  %v2047_v24 = vpop.f32.mrf.mxu0 }
 0x4a4   :  { %v2090_v50 = vadd.f32 %v2047_v24, %v289_v41  ;;  %v2103_v41 = vmul.f32 0.5, %v2093_v20 }
 0x4a6   :  { %v3438_v0 = vpop.eup %3437  ;;  %v2094_v17 = vmul.f32 0.5, %v2090_v50 }
 0x4a7   :  { %v2024_v18 = vadd.f32 1.0, %v3438_v0  ;;  %v3440_v40 = vpop.eup %3439 }
 0x4a8   :  { %3443 = vtanh.f32 %v2094_v17  ;;  %v2100_v4 = vadd.f32 1.0, %v3440_v40 }
 0x4a9   :  { %v3442_v32 = vpop.eup %3441  ;;  %v2025_v27 = vmul.f32 0.5, %v2024_v18  ;;  %v2073_v34 = vpop.f32.mrf.mxu2 }
 0x4aa   :  { %v2092_v31 = vadd.f32 %v2073_v34, %v347_v11  ;;  %v2101_v50 = vmul.f32 0.5, %v2100_v4  ;;  %v6169_v34 = vld [vmem:[#allocation33_spill] sm:$0xff]  ;;  %v6173_v4 = vld [vmem:[#allocation43_spill] sm:$0xff] }
 0x4ab   :  { %v2030_v16 = vmul.f32 %v3442_v32, %v2025_v27  ;;  %v2049_v48 = vpop.f32.mrf.mxu0  ;;  %v6168_v27 = vld [vmem:[#allocation26_spill] sm:$0xff] }
 0x4ac   :  { %3445 = vtanh.f32 %v2092_v31  ;;  %v2107_v17 = vmul.f32 %v2101_v50, %v5183_v5  ;;  %v6171_v31 = vld [vmem:[#allocation28_spill] sm:$0xff]  ;;  %v6172_v48 = vld [vmem:[#allocation30_spill] sm:$0xff]  ;;  %v6177_v50 = vld [vmem:[#allocation49_spill] sm:$0xff] }
 0x4ad   :  { %v2113_v24 = vpack.c.bf16 %v2030_v16, %v2030_v16  ;;  %3447 = vtanh.f32 %v2103_v41  ;;  %v6170_v16 = vld [vmem:[#allocation34_spill] sm:$0xff]  ;;  %v6174_v41 = vld [vmem:[#allocation44_spill] sm:$0xff] }
 0x4ae   :  { %v3444_v30 = vpop.eup %3443 }
 0x4af   :  { %v2096_v29 = vadd.f32 1.0, %v3444_v30  ;;  %2135 = vmatmul.bf16.vlgmr.msrb.gmra.mxu1 %v2113_v24  ;;  %2161 = vmatmul.bf16.vlgmr.msrb.gmra.mxu3 %v2113_v24 }
 0x4b0   :  { %2256 = vmatpush.bf16.msrb.mxu1 %v5896_v62  ;;  %2282 = vmatpush.bf16.msrb.mxu3 %v5897_v56 }
 0x4b1   :  { %v2097_v51 = vmul.f32 0.5, %v2096_v29  ;;  %v2075_v0 = vpop.f32.mrf.mxu2  ;;  %v6176_v29 = vld [vmem:[#allocation36_spill] sm:$0xff] }
 0x4b2   :  { %v3446_v43 = vpop.eup %3445  ;;  %v6179_v0 = vld [vmem:[#allocation37_spill] sm:$0xff] }
 0x4b3   :  { %v2108_v18 = vmul.f32 %v3446_v43, %v2097_v51  ;;  %v3448_v40 = vpop.eup %3447  ;;  %v6178_v51 = vld [vmem:[#allocation50_spill] sm:$0xff] }
 0x4b4   :  { %2257 = vmatpush.bf16.msrb.mxu1 %v5898_v14  ;;  %2283 = vmatpush.bf16.msrb.mxu3 %v5899_v26  ;;  %v2105_v20 = vadd.f32 1.0, %v3448_v40  ;;  %v6180_v43 = vld [vmem:[#allocation38_spill] sm:$0xff]  ;;  %v6183_v40 = vld [vmem:[#allocation39_spill] sm:$0xff] }
 0x4b5   :  { %v5299_v30 = vadd.f32 %v2108_v18, %v2107_v17  ;;  %v6181_v17 = vld [vmem:[#allocation53_spill] sm:$0xff]  ;;  %v6182_v18 = vld [vmem:[#allocation56_spill] sm:$0xff] }
 0x4b6   :  { %v2106_v5 = vmul.f32 0.5, %v2105_v20  ;;  %v6184_v20 = vld [vmem:[#allocation40_spill] sm:$0xff] }
 0x4b7   :  { %3449 = vtanh.f32 %v5299_v30 }
 0x4b8   :  { %2258 = vmatpush.bf16.msrb.mxu1 %v5900_v44  ;;  %2284 = vmatpush.bf16.msrb.mxu3 %v5901_v53 }
 0x4bc   :  { %2259 = vmatpush.bf16.msrb.mxu1 %v5902_v2  ;;  %2285 = vmatpush.bf16.msrb.mxu3 %v5903_v8 }
 0x4bd   :  { %v3450_v32 = vpop.eup %3449 }
 0x4be   :  { %v2111_v10 = vmul.f32 %v3450_v32, %v2106_v5  ;;  %v6185_v5 = vld [vmem:[#allocation41_spill] sm:$0xff]  ;;  %v6186_v32 = vld [vmem:[#allocation42_spill] sm:$0xff] }
 0x4bf   :  { %2187 = vmatmul.bf16.vlgmr.msra.gmra.mxu1 %v2113_v24  ;;  %2213 = vmatmul.bf16.vlgmr.msra.gmra.mxu3 %v2113_v24  ;;  %v6175_v24 = vld [vmem:[#allocation35_spill] sm:$0xff] }
 0x4c0   :  { %2260 = vmatpush.bf16.msrb.mxu1 %v5904_v25  ;;  %2286 = vmatpush.bf16.msrb.mxu3 %v5905_v12  ;;  %v2112_v11 = vpack.c.bf16 %v2111_v10, %v2111_v10  ;;  %v6187_v10 = vld [vmem:[#allocation63_spill] sm:$0xff] }
 0x4c2   :  { %2122 = vmatmul.bf16.vlgmr.msrb.gmra.mxu0 %v2112_v11  ;;  %2148 = vmatmul.bf16.vlgmr.msrb.gmra.mxu2 %v2112_v11 }
 0x4c3   :  { %2243 = vmatpush.bf16.msrb.mxu0 %v3749_v37  ;;  %2269 = vmatpush.bf16.msrb.mxu2 %v3777_v47 }
 0x4c4   :  { %2261 = vmatpush.bf16.msrb.mxu1 %v5906_v6  ;;  %2287 = vmatpush.bf16.msrb.mxu3 %v3960_v46 }
 0x4c7   :  { %2244 = vmatpush.bf16.msrb.mxu0 %v3782_v49  ;;  %2270 = vmatpush.bf16.msrb.mxu2 %v3812_v59 }
 0x4c8   :  { %2262 = vmatpush.bf16.msrb.mxu1 %v5907_v42  ;;  %2288 = vmatpush.bf16.msrb.mxu3 %v5908_v19 }
 0x4cb   :  { %2245 = vmatpush.bf16.msrb.mxu0 %v3818_v61  ;;  %2271 = vmatpush.bf16.msrb.mxu2 %v3848_v7 }
 0x4cc   :  { %2263 = vmatpush.bf16.msrb.mxu1 %v5909_v55  ;;  %2289 = vmatpush.bf16.msrb.mxu3 %v4023_v15 }
 0x4cf   :  { %2246 = vmatpush.bf16.msrb.mxu0 %v5856_v36  ;;  %2264 = vmatmul.bf16.vlgmr.msrb.gmra.mxu1 %v2112_v11 }
 0x4d0   :  { %2332 = vmatpush.bf16.msra.mxu1 %v5910_v1  ;;  %2358 = vmatpush.bf16.msra.mxu3 %v4052_v28 }
 0x4d1   :  { %2272 = vmatpush.bf16.msrb.mxu2 %v5857_v60  ;;  %2290 = vmatmul.bf16.vlgmr.msrb.gmra.mxu3 %v2112_v11 }
 0x4d2   :  { %2174 = vmatmul.bf16.vlgmr.msra.gmra.mxu0 %v2112_v11  ;;  %2200 = vmatmul.bf16.vlgmr.msra.gmra.mxu2 %v2112_v11 }
 0x4d3   :  { %2247 = vmatpush.bf16.msrb.mxu0 %v5860_v3 }
 0x4d4   :  { %2333 = vmatpush.bf16.msra.mxu1 %v4065_v35  ;;  %2359 = vmatpush.bf16.msra.mxu3 %v4070_v39 }
 0x4d5   :  { %2273 = vmatpush.bf16.msrb.mxu2 %v5861_v21 }
 0x4d7   :  { %2248 = vmatpush.bf16.msrb.mxu0 %v5864_v33 }
 0x4d8   :  { %2334 = vmatpush.bf16.msra.mxu1 %v5911_v57  ;;  %2360 = vmatpush.bf16.msra.mxu3 %v4088_v52 }
 0x4d9   :  { %2274 = vmatpush.bf16.msrb.mxu2 %v5865_v13 }
 0x4db   :  { %2249 = vmatpush.bf16.msrb.mxu0 %v5867_v54 }
 0x4dc   :  { %2335 = vmatpush.bf16.msra.mxu1 %v4101_v58  ;;  %2361 = vmatpush.bf16.msra.mxu3 %v4106_v63 }
 0x4dd   :  { %2275 = vmatpush.bf16.msrb.mxu2 %v6168_v27 }
 0x4df   :  { %2250 = vmatpush.bf16.msrb.mxu0 %v6171_v31  ;;  %v6229_v31 = vld [vmem:[#allocation17_spill] sm:$0xff] }
 0x4e0   :  { %2336 = vmatpush.bf16.msra.mxu1 %v6169_v34  ;;  %2362 = vmatpush.bf16.msra.mxu3 %v6170_v16 }
 0x4e1   :  { %2276 = vmatpush.bf16.msrb.mxu2 %v6172_v48 }
 0x4e2   :  { %2251 = vmatmul.bf16.vlgmr.msrb.gmra.mxu0 %v2112_v11 }
 0x4e3   :  { %2319 = vmatpush.bf16.msra.mxu0 %v6173_v4 }
 0x4e4   :  { %2337 = vmatpush.bf16.msra.mxu1 %v6175_v24  ;;  %2363 = vmatpush.bf16.msra.mxu3 %v6176_v29  ;;  %v6228_v24 = vld [vmem:[#allocation15_spill] sm:$0xff] }
 0x4e5   :  { %2345 = vmatpush.bf16.msra.mxu2 %v6174_v41 }
 0x4e6   :  { %2277 = vmatmul.bf16.vlgmr.msrb.gmra.mxu2 %v2112_v11  ;;  %v6188_v11 = vld [vmem:[#allocation64_spill] sm:$0xff] }
 0x4e7   :  { %2320 = vmatpush.bf16.msra.mxu0 %v6177_v50 }
 0x4e8   :  { %2338 = vmatpush.bf16.msra.mxu1 %v6179_v0  ;;  %2364 = vmatpush.bf16.msra.mxu3 %v6180_v43 }
 0x4e9   :  { %2346 = vmatpush.bf16.msra.mxu2 %v6178_v51  ;;  %v6227_v51 = vld [vmem:[#allocation13_spill] sm:$0xff] }
 0x4eb   :  { %2321 = vmatpush.bf16.msra.mxu0 %v6181_v17  ;;  %v6192_v17 = vld [vmem:[#allocation70_spill] sm:$0xff] }
 0x4ec   :  { %2339 = vmatpush.bf16.msra.mxu1 %v6183_v40  ;;  %2365 = vmatpush.bf16.msra.mxu3 %v6184_v20  ;;  %v6194_v40 = vld [vmem:[#allocation52_spill] sm:$0xff]  ;;  %v6195_v20 = vld [vmem:[#allocation77_spill] sm:$0xff] }
 0x4ed   :  { %2347 = vmatpush.bf16.msra.mxu2 %v6182_v18  ;;  %v6193_v18 = vld [vmem:[#allocation51_spill] sm:$0xff] }
 0x4ef   :  { %2322 = vmatpush.bf16.msra.mxu0 %v6187_v10  ;;  %v6198_v10 = vld [vmem:[#allocation60_spill] sm:$0xff] }
 0x4f0   :  { %2384 = vmatpush.bf16.msrb.mxu1 %v6185_v5  ;;  %2410 = vmatpush.bf16.msrb.mxu3 %v6186_v32  ;;  %v6196_v5 = vld [vmem:[#allocation78_spill] sm:$0xff]  ;;  %v6197_v32 = vld [vmem:[#allocation57_spill] sm:$0xff] }
 0x4f1   :  { %2348 = vmatpush.bf16.msra.mxu2 %v6188_v11  ;;  %v6199_v11 = vld [vmem:[#allocation81_spill] sm:$0xff] }
 0x4f3   :  { %2323 = vmatpush.bf16.msra.mxu0 %v6191_v22  ;;  %v6202_v22 = vld [vmem:[#allocation67_spill] sm:$0xff] }
 0x4f4   :  { %2385 = vmatpush.bf16.msrb.mxu1 %v6189_v38  ;;  %2411 = vmatpush.bf16.msrb.mxu3 %v6190_v9  ;;  %v6200_v38 = vld [vmem:[#allocation83_spill] sm:$0xff]  ;;  %v6201_v9 = vld [vmem:[#allocation65_spill] sm:$0xff] }
 0x4f5   :  { %2349 = vmatpush.bf16.msra.mxu2 %v6192_v17  ;;  %v6203_v17 = vld [vmem:[#allocation89_spill] sm:$0xff] }
 0x4f7   :  { %2324 = vmatpush.bf16.msra.mxu0 %v6195_v20  ;;  %v6206_v20 = vld [vmem:[#allocation92_spill] sm:$0xff] }
 0x4f8   :  { %2386 = vmatpush.bf16.msrb.mxu1 %v6193_v18  ;;  %2412 = vmatpush.bf16.msrb.mxu3 %v6194_v40  ;;  %v6204_v18 = vld [vmem:[#allocation90_spill] sm:$0xff]  ;;  %v6205_v40 = vld [vmem:[#allocation91_spill] sm:$0xff] }
 0x4f9   :  { %2350 = vmatpush.bf16.msra.mxu2 %v6196_v5  ;;  %v6207_v5 = vld [vmem:[#allocation71_spill] sm:$0xff] }
 0x4fb   :  { %2325 = vmatpush.bf16.msra.mxu0 %v6199_v11  ;;  %v6210_v11 = vld [vmem:[#allocation96_spill] sm:$0xff] }
 0x4fc   :  { %2387 = vmatpush.bf16.msrb.mxu1 %v6197_v32  ;;  %2413 = vmatpush.bf16.msrb.mxu3 %v6198_v10  ;;  %v6208_v32 = vld [vmem:[#allocation74_spill] sm:$0xff]  ;;  %v6209_v10 = vld [vmem:[#allocation93_spill] sm:$0xff] }
 0x4fd   :  { %2351 = vmatpush.bf16.msra.mxu2 %v6200_v38  ;;  %v6211_v38 = vld [vmem:[#allocation79_spill] sm:$0xff] }
 0x4ff   :  { %2326 = vmatpush.bf16.msra.mxu0 %v6203_v17  ;;  %v6214_v17 = vld [vmem:[#allocation100_spill] sm:$0xff] }
 0x500   :  { %2388 = vmatpush.bf16.msrb.mxu1 %v6201_v9  ;;  %2414 = vmatpush.bf16.msrb.mxu3 %v6202_v22  ;;  %v6212_v9 = vld [vmem:[#allocation80_spill] sm:$0xff]  ;;  %v6213_v22 = vld [vmem:[#allocation99_spill] sm:$0xff] }
 0x501   :  { %2352 = vmatpush.bf16.msra.mxu2 %v6204_v18  ;;  %v6215_v18 = vld [vmem:[#allocation84_spill] sm:$0xff] }
 0x503   :  { %2371 = vmatpush.bf16.msrb.mxu0 %v6205_v40  ;;  %v6216_v40 = vld [vmem:[#allocation86_spill] sm:$0xff] }
 0x504   :  { %2389 = vmatpush.bf16.msrb.mxu1 %v6207_v5  ;;  %2415 = vmatpush.bf16.msrb.mxu3 %v6208_v32  ;;  %v6218_v5 = vld [vmem:[#allocation104_spill] sm:$0xff]  ;;  %v6219_v32 = vld [vmem:[#allocation107_spill] sm:$0xff] }
 0x505   :  { %2397 = vmatpush.bf16.msrb.mxu2 %v6206_v20  ;;  %v6217_v20 = vld [vmem:[#allocation102_spill] sm:$0xff] }
 0x507   :  { %2372 = vmatpush.bf16.msrb.mxu0 %v6209_v10  ;;  %v6220_v10 = vld [vmem:[#allocation108_spill] sm:$0xff] }
 0x508   :  { %2390 = vmatpush.bf16.msrb.mxu1 %v6211_v38  ;;  %2416 = vmatpush.bf16.msrb.mxu3 %v6212_v9  ;;  %v6222_v38 = vld [vmem:[#allocation112_spill] sm:$0xff]  ;;  %v6223_v9 = vld [vmem:[#allocation115_spill] sm:$0xff] }
 0x509   :  { %2398 = vmatpush.bf16.msrb.mxu2 %v6210_v11  ;;  %v6221_v11 = vld [vmem:[#allocation109_spill] sm:$0xff] }
 0x50b   :  { %2373 = vmatpush.bf16.msrb.mxu0 %v6213_v22  ;;  %v6224_v22 = vld [vmem:[#allocation116_spill] sm:$0xff] }
 0x50c   :  { %2391 = vmatpush.bf16.msrb.mxu1 %v6215_v18  ;;  %2417 = vmatpush.bf16.msrb.mxu3 %v6216_v40  ;;  %v6226_v18 = vld [vmem:[#allocation120_spill] sm:$0xff] }
 0x50d   :  { %2399 = vmatpush.bf16.msrb.mxu2 %v6214_v17  ;;  %v6225_v17 = vld [vmem:[#allocation118_spill] sm:$0xff] }
 0x50f   :  { %2374 = vmatpush.bf16.msrb.mxu0 %v6217_v20 }
 0x511   :  { %2400 = vmatpush.bf16.msrb.mxu2 %v6218_v5 }
 0x513   :  { %2375 = vmatpush.bf16.msrb.mxu0 %v6219_v32 }
 0x515   :  { %2401 = vmatpush.bf16.msrb.mxu2 %v6220_v10 }
 0x517   :  { %2376 = vmatpush.bf16.msrb.mxu0 %v6221_v11 }
 0x519   :  { %2402 = vmatpush.bf16.msrb.mxu2 %v6222_v38 }
 0x51b   :  { %2377 = vmatpush.bf16.msrb.mxu0 %v6223_v9 }
 0x51d   :  { %2403 = vmatpush.bf16.msrb.mxu2 %v6224_v22 }
 0x51f   :  { %2378 = vmatpush.bf16.msrb.mxu0 %v6225_v17 }
 0x521   :  { %2404 = vmatpush.bf16.msrb.mxu2 %v6226_v18 }
 0x52c   :  { %v2136_v40 = vpop.f32.mrf.mxu1 }
 0x532   :  { %v2162_v20 = vpop.f32.mrf.mxu3 }
 0x534   :  { %v2138_v43 = vpop.f32.mrf.mxu1 }
 0x53a   :  { %v2164_v5 = vpop.f32.mrf.mxu3 }
 0x53c   :  { %v2188_v0 = vpop.f32.mrf.mxu1 }
 0x53f   :  { %v2123_v32 = vpop.f32.mrf.mxu0 }
 0x540   :  { %v2124_v10 = vadd.f32 %v2123_v32, %v6227_v51 }
 0x542   :  { %v2214_v50 = vpop.f32.mrf.mxu3  ;;  %v2137_v11 = vadd.f32 %v2136_v40, %v2124_v10 }
 0x544   :  { %v2190_v29 = vpop.f32.mrf.mxu1  ;;  %v2218_v41 = vmul.f32 0.5, %v2137_v11 }
 0x545   :  { %v2149_v38 = vpop.f32.mrf.mxu2 }
 0x546   :  { %v2150_v9 = vadd.f32 %v2149_v38, %v6228_v24  ;;  %3451 = vtanh.f32 %v2218_v41 }
 0x547   :  { %v2125_v22 = vpop.f32.mrf.mxu0 }
 0x548   :  { %v2163_v4 = vadd.f32 %v2162_v20, %v2150_v9  ;;  %v6230_v22 = vld [vmem:[#allocation106_spill] sm:$0xff] }
 0x54a   :  { %v2216_v17 = vpop.f32.mrf.mxu3  ;;  %v2222_v48 = vmul.f32 0.5, %v2163_v4 }
 0x54c   :  { %3453 = vtanh.f32 %v2222_v48  ;;  %v2265_v18 = vpop.f32.mrf.mxu1  ;;  %v3452_v34 = vpop.eup %3451 }
 0x54d   :  { %v2151_v43 = vpop.f32.mrf.mxu2  ;;  %v2220_v38 = vadd.f32 1.0, %v3452_v34  ;;  %v2296_v9 = vadd.f32 %v2265_v18, %v6230_v22  ;;  %v6232_v22 = vld [vmem:[#allocation113_spill] sm:$0xff] }
 0x54f   :  { %v2175_v5 = vpop.f32.mrf.mxu0  ;;  %v2221_v20 = vmul.f32 0.5, %v2220_v38  ;;  %v2303_v24 = vmul.f32 0.5, %v2296_v9 }
 0x550   :  { %v2176_v16 = vadd.f32 %v2175_v5, %v6229_v31 }
 0x552   :  { %v3454_v32 = vpop.eup %3453  ;;  %v2189_v51 = vadd.f32 %v2188_v0, %v2176_v16 }
 0x553   :  { %v2224_v40 = vadd.f32 1.0, %v3454_v32  ;;  %v6231_v32 = vld [vmem:[#allocation105_spill] sm:$0xff] }
 0x554   :  { %v2291_v29 = vpop.f32.mrf.mxu3  ;;  %3455 = vtanh.f32 %v2189_v51  ;;  %v2267_v10 = vpop.f32.mrf.mxu1 }
 0x555   :  { %v2201_v11 = vpop.f32.mrf.mxu2  ;;  %v2225_v41 = vmul.f32 0.5, %v2224_v40  ;;  %v2298_v9 = vadd.f32 %v2291_v29, %v6232_v22  ;;  %v6269_v22 = vld [vmem:[#allocation90_spill] sm:$0xff] }
 0x556   :  { %v2202_v4 = vadd.f32 %v2201_v11, %v4824_v45 }
 0x557   :  { %v2177_v48 = vpop.f32.mrf.mxu0  ;;  %v2231_v31 = vmul.f32 %v2225_v41, %v5285_v23 }
 0x558   :  { %v2215_v17 = vadd.f32 %v2214_v50, %v2202_v4 }
 0x55a   :  { %v3456_v43 = vpop.eup %3455  ;;  %v2227_v5 = vmul.f32 0.5, %v2215_v17 }
 0x55b   :  { %v2232_v16 = vmul.f32 %v3456_v43, %v2221_v20  ;;  %v2308_v43 = vmul.f32 0.5, %v2298_v9  ;;  %v6270_v9 = vld [vmem:[#allocation91_spill] sm:$0xff] }
 0x55c   :  { %v2293_v0 = vpop.f32.mrf.mxu3  ;;  %3457 = vtanh.f32 %v2227_v5 }
 0x55d   :  { %v5400_v51 = vadd.f32 %v2232_v16, %v2231_v31  ;;  %v2203_v34 = vpop.f32.mrf.mxu2  ;;  %3459 = vtanh.f32 %v2303_v24  ;;  %v6233_v31 = vld [vmem:[#allocation110_spill] sm:$0xff] }
 0x55f   :  { %3461 = vtanh.f32 %v5400_v51  ;;  %v2252_v18 = vpop.f32.mrf.mxu0 }
 0x560   :  { %v2295_v40 = vadd.f32 %v2252_v18, %v6231_v32 }
 0x562   :  { %v3458_v10 = vpop.eup %3457  ;;  %v2299_v50 = vmul.f32 0.5, %v2295_v40 }
 0x563   :  { %v2229_v38 = vadd.f32 1.0, %v3458_v10  ;;  %v3460_v11 = vpop.eup %3459 }
 0x564   :  { %3463 = vtanh.f32 %v2299_v50  ;;  %v2305_v24 = vadd.f32 1.0, %v3460_v11 }
 0x565   :  { %v3462_v23 = vpop.eup %3461  ;;  %v2230_v4 = vmul.f32 0.5, %v2229_v38 }
 0x566   :  { %v2306_v34 = vmul.f32 0.5, %v2305_v24  ;;  %v6278_v24 = vld [vmem:[#allocation99_spill] sm:$0xff] }
 0x567   :  { %v2235_v48 = vmul.f32 %v3462_v23, %v2230_v4  ;;  %v2254_v20 = vpop.f32.mrf.mxu0  ;;  %v6271_v23 = vld [vmem:[#allocation92_spill] sm:$0xff]  ;;  %v6272_v4 = vld [vmem:[#allocation71_spill] sm:$0xff] }
 0x568   :  { %v2312_v40 = vmul.f32 %v2306_v34, %v5299_v30  ;;  %v6277_v20 = vld [vmem:[#allocation80_spill] sm:$0xff] }
 0x569   :  { %v2278_v41 = vpop.f32.mrf.mxu2  ;;  %v2318_v5 = vpack.c.bf16 %v2235_v48, %v2235_v48  ;;  %v6274_v48 = vld [vmem:[#allocation93_spill] sm:$0xff]  ;;  %v6283_v34 = vld [vmem:[#allocation104_spill] sm:$0xff] }
 0x56a   :  { %v2297_v17 = vadd.f32 %v2278_v41, %v6233_v31  ;;  %v3464_v16 = vpop.eup %3463  ;;  %v6273_v41 = vld [vmem:[#allocation74_spill] sm:$0xff]  ;;  %v6275_v31 = vld [vmem:[#allocation96_spill] sm:$0xff] }
 0x56b   :  { %v2301_v0 = vadd.f32 1.0, %v3464_v16  ;;  %2340 = vmatmul.bf16.vlgmr.msra.gmra.mxu1 %v2318_v5  ;;  %2366 = vmatmul.bf16.vlgmr.msra.gmra.mxu3 %v2318_v5  ;;  %v6281_v16 = vld [vmem:[#allocation86_spill] sm:$0xff] }
 0x56c   :  { %3465 = vtanh.f32 %v2297_v17  ;;  %2461 = vmatpush.bf16.msra.mxu1 %v5896_v62  ;;  %2487 = vmatpush.bf16.msra.mxu3 %v5897_v56  ;;  %v6276_v17 = vld [vmem:[#allocation79_spill] sm:$0xff] }
 0x56d   :  { %3467 = vtanh.f32 %v2308_v43  ;;  %v2302_v29 = vmul.f32 0.5, %v2301_v0  ;;  %v6279_v43 = vld [vmem:[#allocation100_spill] sm:$0xff]  ;;  %v6282_v0 = vld [vmem:[#allocation102_spill] sm:$0xff] }
 0x570   :  { %2462 = vmatpush.bf16.msra.mxu1 %v5898_v14  ;;  %2488 = vmatpush.bf16.msra.mxu3 %v5899_v26  ;;  %v6255_v26 = vld [vmem:[#allocation47_spill] sm:$0xff] }
 0x571   :  { %v2280_v18 = vpop.f32.mrf.mxu2 }
 0x572   :  { %v3466_v32 = vpop.eup %3465  ;;  %v6285_v18 = vld [vmem:[#allocation108_spill] sm:$0xff] }
 0x573   :  { %v2313_v10 = vmul.f32 %v3466_v32, %v2302_v29  ;;  %v3468_v50 = vpop.eup %3467  ;;  %v6284_v29 = vld [vmem:[#allocation107_spill] sm:$0xff]  ;;  %v6286_v32 = vld [vmem:[#allocation109_spill] sm:$0xff] }
 0x574   :  { %2463 = vmatpush.bf16.msra.mxu1 %v5900_v44  ;;  %2489 = vmatpush.bf16.msra.mxu3 %v5901_v53  ;;  %v2310_v62 = vadd.f32 1.0, %v3468_v50  ;;  %v6256_v44 = vld [vmem:[#allocation68_spill] sm:$0xff]  ;;  %v6257_v53 = vld [vmem:[#allocation70_spill] sm:$0xff] }
 0x575   :  { %v5411_v38 = vadd.f32 %v2313_v10, %v2312_v40  ;;  %v6287_v40 = vld [vmem:[#allocation112_spill] sm:$0xff]  ;;  %v6288_v10 = vld [vmem:[#allocation115_spill] sm:$0xff] }
 0x576   :  { %v2311_v56 = vmul.f32 0.5, %v2310_v62  ;;  %v6289_v50 = vld [vmem:[#allocation116_spill] sm:$0xff]  ;;  %v6290_v62 = vld [vmem:[#allocation118_spill] sm:$0xff] }
 0x577   :  { %3469 = vtanh.f32 %v5411_v38 }
 0x578   :  { %2464 = vmatpush.bf16.msra.mxu1 %v5902_v2  ;;  %2490 = vmatpush.bf16.msra.mxu3 %v5903_v8  ;;  %v6258_v2 = vld [vmem:[#allocation51_spill] sm:$0xff]  ;;  %v6259_v8 = vld [vmem:[#allocation52_spill] sm:$0xff] }
 0x57b   :  { %2392 = vmatmul.bf16.vlgmr.msrb.gmra.mxu1 %v2318_v5  ;;  %2418 = vmatmul.bf16.vlgmr.msrb.gmra.mxu3 %v2318_v5  ;;  %v6280_v5 = vld [vmem:[#allocation84_spill] sm:$0xff] }
 0x57c   :  { %2465 = vmatpush.bf16.msra.mxu1 %v5904_v25  ;;  %2491 = vmatpush.bf16.msra.mxu3 %v5905_v12  ;;  %v6260_v25 = vld [vmem:[#allocation77_spill] sm:$0xff]  ;;  %v6261_v12 = vld [vmem:[#allocation78_spill] sm:$0xff] }
 0x57d   :  { %v3470_v30 = vpop.eup %3469 }
 0x57e   :  { %v2316_v11 = vmul.f32 %v3470_v30, %v2311_v56  ;;  %v6291_v56 = vld [vmem:[#allocation120_spill] sm:$0xff] }
 0x580   :  { %v2317_v14 = vpack.c.bf16 %v2316_v11, %v2316_v11  ;;  %2466 = vmatpush.bf16.msra.mxu1 %v5906_v6  ;;  %2492 = vmatpush.bf16.msra.mxu3 %v3960_v46  ;;  %v6240_v46 = vld [vmem:[#allocation35_spill] sm:$0xff]  ;;  %v6262_v6 = vld [vmem:[#allocation57_spill] sm:$0xff] }
 0x582   :  { %2327 = vmatmul.bf16.vlgmr.msra.gmra.mxu0 %v2317_v14  ;;  %2353 = vmatmul.bf16.vlgmr.msra.gmra.mxu2 %v2317_v14 }
 0x583   :  { %2448 = vmatpush.bf16.msra.mxu0 %v3749_v37  ;;  %2474 = vmatpush.bf16.msra.mxu2 %v3777_v47  ;;  %v6234_v37 = vld [vmem:[#allocation33_spill] sm:$0xff]  ;;  %v6235_v47 = vld [vmem:[#allocation34_spill] sm:$0xff] }
 0x584   :  { %2467 = vmatpush.bf16.msra.mxu1 %v5907_v42  ;;  %2493 = vmatpush.bf16.msra.mxu3 %v5908_v19  ;;  %v6263_v42 = vld [vmem:[#allocation60_spill] sm:$0xff]  ;;  %v6264_v19 = vld [vmem:[#allocation81_spill] sm:$0xff] }
 0x587   :  { %2449 = vmatpush.bf16.msra.mxu0 %v3782_v49  ;;  %2475 = vmatpush.bf16.msra.mxu2 %v3812_v59  ;;  %v6236_v49 = vld [vmem:[#allocation28_spill] sm:$0xff]  ;;  %v6237_v59 = vld [vmem:[#allocation30_spill] sm:$0xff] }
 0x588   :  { %2468 = vmatpush.bf16.msra.mxu1 %v5909_v55  ;;  %2494 = vmatpush.bf16.msra.mxu3 %v4023_v15  ;;  %v6241_v15 = vld [vmem:[#allocation36_spill] sm:$0xff]  ;;  %v6265_v55 = vld [vmem:[#allocation83_spill] sm:$0xff] }
 0x58b   :  { %2450 = vmatpush.bf16.msra.mxu0 %v3818_v61  ;;  %2476 = vmatpush.bf16.msra.mxu2 %v3848_v7  ;;  %v6238_v61 = vld [vmem:[#allocation43_spill] sm:$0xff]  ;;  %v6239_v7 = vld [vmem:[#allocation44_spill] sm:$0xff] }
 0x58c   :  { %2537 = vmatpush.bf16.msrb.mxu1 %v5910_v1  ;;  %2563 = vmatpush.bf16.msrb.mxu3 %v4052_v28  ;;  %v6242_v28 = vld [vmem:[#allocation49_spill] sm:$0xff] }
 0x58d   :  { %2469 = vmatmul.bf16.vlgmr.msra.gmra.mxu1 %v2317_v14  ;;  %2495 = vmatmul.bf16.vlgmr.msra.gmra.mxu3 %v2317_v14  ;;  %v6266_v1 = vld [vmem:[#allocation65_spill] sm:$0xff] }
 0x58f   :  { %2451 = vmatpush.bf16.msra.mxu0 %v5856_v36  ;;  %2477 = vmatpush.bf16.msra.mxu2 %v5857_v60  ;;  %v6248_v36 = vld [vmem:[#allocation39_spill] sm:$0xff]  ;;  %v6249_v60 = vld [vmem:[#allocation40_spill] sm:$0xff] }
 0x590   :  { %2538 = vmatpush.bf16.msrb.mxu1 %v4065_v35  ;;  %2564 = vmatpush.bf16.msrb.mxu3 %v4070_v39  ;;  %v6243_v35 = vld [vmem:[#allocation50_spill] sm:$0xff]  ;;  %v6244_v39 = vld [vmem:[#allocation37_spill] sm:$0xff] }
 0x592   :  { %2379 = vmatmul.bf16.vlgmr.msrb.gmra.mxu0 %v2317_v14  ;;  %2405 = vmatmul.bf16.vlgmr.msrb.gmra.mxu2 %v2317_v14 }
 0x593   :  { %2452 = vmatpush.bf16.msra.mxu0 %v5860_v3  ;;  %2478 = vmatpush.bf16.msra.mxu2 %v5861_v21  ;;  %v6251_v3 = vld [vmem:[#allocation42_spill] sm:$0xff]  ;;  %v6252_v21 = vld [vmem:[#allocation63_spill] sm:$0xff] }
 0x594   :  { %2539 = vmatpush.bf16.msrb.mxu1 %v5911_v57  ;;  %2565 = vmatpush.bf16.msrb.mxu3 %v4088_v52  ;;  %v6245_v52 = vld [vmem:[#allocation38_spill] sm:$0xff]  ;;  %v6267_v57 = vld [vmem:[#allocation67_spill] sm:$0xff] }
 0x597   :  { %2453 = vmatpush.bf16.msra.mxu0 %v5864_v33  ;;  %2479 = vmatpush.bf16.msra.mxu2 %v5865_v13  ;;  %v6253_v33 = vld [vmem:[#allocation64_spill] sm:$0xff]  ;;  %v6254_v13 = vld [vmem:[#allocation45_spill] sm:$0xff] }
 0x598   :  { %2540 = vmatpush.bf16.msrb.mxu1 %v4101_v58  ;;  %2566 = vmatpush.bf16.msrb.mxu3 %v4106_v63  ;;  %v6246_v58 = vld [vmem:[#allocation53_spill] sm:$0xff]  ;;  %v6247_v63 = vld [vmem:[#allocation56_spill] sm:$0xff] }
 0x59b   :  { %2454 = vmatpush.bf16.msra.mxu0 %v5867_v54  ;;  %2480 = vmatpush.bf16.msra.mxu2 %v6168_v27  ;;  %v6250_v54 = vld [vmem:[#allocation41_spill] sm:$0xff] }
 0x59c   :  { %2541 = vmatpush.bf16.msrb.mxu1 %v6234_v37  ;;  %2567 = vmatpush.bf16.msrb.mxu3 %v6235_v47  ;;  %v6268_v27 = vld [vmem:[#allocation89_spill] sm:$0xff] }
 0x59f   :  { %2455 = vmatpush.bf16.msra.mxu0 %v6236_v49  ;;  %2481 = vmatpush.bf16.msra.mxu2 %v6237_v59  ;;  %v6292_v59 = vld [vmem:[#allocation13_spill] sm:$0xff] }
 0x5a0   :  { %2542 = vmatpush.bf16.msrb.mxu1 %v6240_v46  ;;  %2568 = vmatpush.bf16.msrb.mxu3 %v6241_v15 }
 0x5a2   :  { %2456 = vmatmul.bf16.vlgmr.msra.gmra.mxu0 %v2317_v14  ;;  %2482 = vmatmul.bf16.vlgmr.msra.gmra.mxu2 %v2317_v14 }
 0x5a3   :  { %2524 = vmatpush.bf16.msrb.mxu0 %v6238_v61  ;;  %2550 = vmatpush.bf16.msrb.mxu2 %v6239_v7 }
 0x5a4   :  { %2543 = vmatpush.bf16.msrb.mxu1 %v6244_v39  ;;  %2569 = vmatpush.bf16.msrb.mxu3 %v6245_v52 }
 0x5a7   :  { %2525 = vmatpush.bf16.msrb.mxu0 %v6242_v28  ;;  %2551 = vmatpush.bf16.msrb.mxu2 %v6243_v35  ;;  %v6293_v35 = vld [vmem:[#allocation15_spill] sm:$0xff] }
 0x5a8   :  { %2544 = vmatpush.bf16.msrb.mxu1 %v6248_v36  ;;  %2570 = vmatpush.bf16.msrb.mxu3 %v6249_v60 }
 0x5ab   :  { %2526 = vmatpush.bf16.msrb.mxu0 %v6246_v58  ;;  %2552 = vmatpush.bf16.msrb.mxu2 %v6247_v63 }
 0x5ac   :  { %2589 = vmatpush.bf16.msra.mxu1 %v6250_v54  ;;  %2615 = vmatpush.bf16.msra.mxu3 %v6251_v3 }
 0x5af   :  { %2527 = vmatpush.bf16.msrb.mxu0 %v6252_v21  ;;  %2553 = vmatpush.bf16.msrb.mxu2 %v6253_v33  ;;  %v6294_v33 = vld [vmem:[#allocation17_spill] sm:$0xff] }
 0x5b0   :  { %2590 = vmatpush.bf16.msra.mxu1 %v6254_v13  ;;  %2616 = vmatpush.bf16.msra.mxu3 %v6255_v26 }
 0x5b3   :  { %2528 = vmatpush.bf16.msrb.mxu0 %v6256_v44  ;;  %2554 = vmatpush.bf16.msrb.mxu2 %v6257_v53 }
 0x5b4   :  { %2591 = vmatpush.bf16.msra.mxu1 %v6258_v2  ;;  %2617 = vmatpush.bf16.msra.mxu3 %v6259_v8 }
 0x5b7   :  { %2529 = vmatpush.bf16.msrb.mxu0 %v6260_v25  ;;  %2555 = vmatpush.bf16.msrb.mxu2 %v6261_v12  ;;  %v6295_v25 = vld [vmem:[#allocation58_spill] sm:$0xff] }
 0x5b8   :  { %2592 = vmatpush.bf16.msra.mxu1 %v6262_v6  ;;  %2618 = vmatpush.bf16.msra.mxu3 %v6263_v42  ;;  %v6296_v12 = vld [vmem:[#allocation114_spill] sm:$0xff] }
 0x5b9   :  { %v323_v6 = vadd.f32 %v6296_v12, %v6295_v25 }
 0x5bb   :  { %2530 = vmatpush.bf16.msrb.mxu0 %v6264_v19  ;;  %2556 = vmatpush.bf16.msrb.mxu2 %v6265_v55 }
 0x5bc   :  { %2593 = vmatpush.bf16.msra.mxu1 %v6266_v1  ;;  %2619 = vmatpush.bf16.msra.mxu3 %v6267_v57 }
 0x5bf   :  { %2531 = vmatpush.bf16.msrb.mxu0 %v6268_v27  ;;  %2557 = vmatpush.bf16.msrb.mxu2 %v6269_v22 }
 0x5c0   :  { %2594 = vmatpush.bf16.msra.mxu1 %v6272_v4  ;;  %2620 = vmatpush.bf16.msra.mxu3 %v6273_v41 }
 0x5c3   :  { %2576 = vmatpush.bf16.msra.mxu0 %v6270_v9  ;;  %2602 = vmatpush.bf16.msra.mxu2 %v6271_v23 }
 0x5c4   :  { %2595 = vmatpush.bf16.msra.mxu1 %v6276_v17  ;;  %2621 = vmatpush.bf16.msra.mxu3 %v6277_v20 }
 0x5c7   :  { %2577 = vmatpush.bf16.msra.mxu0 %v6274_v48  ;;  %2603 = vmatpush.bf16.msra.mxu2 %v6275_v31 }
 0x5c8   :  { %2596 = vmatpush.bf16.msra.mxu1 %v6280_v5  ;;  %2622 = vmatpush.bf16.msra.mxu3 %v6281_v16  ;;  %v6297_v5 = vld [vmem:[#allocation54_spill] sm:$0xff]  ;;  %v6298_v16 = vld [vmem:[#allocation111_spill] sm:$0xff] }
 0x5cb   :  { %2578 = vmatpush.bf16.msra.mxu0 %v6278_v24  ;;  %2604 = vmatpush.bf16.msra.mxu2 %v6279_v43 }
 0x5cf   :  { %2579 = vmatpush.bf16.msra.mxu0 %v6282_v0  ;;  %2605 = vmatpush.bf16.msra.mxu2 %v6283_v34  ;;  %v294_v0 = vadd.f32 %v6298_v16, %v6297_v5 }
 0x5d3   :  { %2580 = vmatpush.bf16.msra.mxu0 %v6284_v29  ;;  %2606 = vmatpush.bf16.msra.mxu2 %v6285_v18 }
 0x5d7   :  { %2581 = vmatpush.bf16.msra.mxu0 %v6286_v32  ;;  %2607 = vmatpush.bf16.msra.mxu2 %v6287_v40  ;;  %v6299_v32 = vld [vmem:[#allocation69_spill] sm:$0xff]  ;;  %v6300_v40 = vld [vmem:[#allocation119_spill] sm:$0xff] }
 0x5db   :  { %2582 = vmatpush.bf16.msra.mxu0 %v6288_v10  ;;  %2608 = vmatpush.bf16.msra.mxu2 %v6289_v50  ;;  %v381_v10 = vadd.f32 %v6300_v40, %v6299_v32 }
 0x5df   :  { %2583 = vmatpush.bf16.msra.mxu0 %v6290_v62  ;;  %2609 = vmatpush.bf16.msra.mxu2 %v6291_v56 }
 0x5e8   :  { %v2341_v30 = vpop.f32.mrf.mxu1 }
 0x5ee   :  { %v2367_v11 = vpop.f32.mrf.mxu3 }
 0x5f0   :  { %v2343_v14 = vpop.f32.mrf.mxu1 }
 0x5f1   :  { %v6302_v14 = vld [vmem:[#allocation117_spill] sm:$0xff] }
 0x5f6   :  { %v2369_v37 = vpop.f32.mrf.mxu3 }
 0x5f8   :  { %v2393_v47 = vpop.f32.mrf.mxu1 }
 0x5fe   :  { %v2419_v7 = vpop.f32.mrf.mxu3 }
 0x5ff   :  { %v2328_v49 = vpop.f32.mrf.mxu0 }
 0x600   :  { %v2329_v61 = vadd.f32 %v2328_v49, %v6292_v59  ;;  %v2395_v15 = vpop.f32.mrf.mxu1 }
 0x602   :  { %v2342_v46 = vadd.f32 %v2341_v30, %v2329_v61 }
 0x604   :  { %v2423_v52 = vmul.f32 0.5, %v2342_v46 }
 0x605   :  { %v2354_v28 = vpop.f32.mrf.mxu2 }
 0x606   :  { %v2355_v39 = vadd.f32 %v2354_v28, %v6293_v35  ;;  %v2421_v36 = vpop.f32.mrf.mxu3  ;;  %3471 = vtanh.f32 %v2423_v52 }
 0x607   :  { %v2330_v58 = vpop.f32.mrf.mxu0 }
 0x608   :  { %v2368_v63 = vadd.f32 %v2367_v11, %v2355_v39  ;;  %v6301_v11 = vld [vmem:[#allocation66_spill] sm:$0xff] }
 0x609   :  { %v352_v37 = vadd.f32 %v6302_v14, %v6301_v11 }
 0x60a   :  { %v2427_v60 = vmul.f32 0.5, %v2368_v63  ;;  %v2470_v54 = vpop.f32.mrf.mxu1 }
 0x60b   :  { %v2501_v1 = vadd.f32 %v2470_v54, %v323_v6 }
 0x60c   :  { %3473 = vtanh.f32 %v2427_v60  ;;  %v3472_v26 = vpop.eup %3471 }
 0x60d   :  { %v2356_v3 = vpop.f32.mrf.mxu2  ;;  %v2425_v19 = vadd.f32 1.0, %v3472_v26  ;;  %v2508_v41 = vmul.f32 0.5, %v2501_v1 }
 0x60f   :  { %v2380_v21 = vpop.f32.mrf.mxu0  ;;  %v2426_v23 = vmul.f32 0.5, %v2425_v19 }
 0x610   :  { %v2381_v13 = vadd.f32 %v2380_v21, %v6294_v33  ;;  %v2496_v8 = vpop.f32.mrf.mxu3 }
 0x611   :  { %v2503_v56 = vadd.f32 %v2496_v8, %v381_v10 }
 0x612   :  { %v3474_v44 = vpop.eup %3473  ;;  %v2394_v53 = vadd.f32 %v2393_v47, %v2381_v13  ;;  %v2472_v42 = vpop.f32.mrf.mxu1 }
 0x613   :  { %v2429_v2 = vadd.f32 1.0, %v3474_v44  ;;  %v2513_v28 = vmul.f32 0.5, %v2503_v56 }
 0x614   :  { %3475 = vtanh.f32 %v2394_v53 }
 0x615   :  { %v2406_v55 = vpop.f32.mrf.mxu2  ;;  %v2430_v27 = vmul.f32 0.5, %v2429_v2 }
 0x616   :  { %v2407_v57 = vadd.f32 %v2406_v55, %v4824_v45 }
 0x617   :  { %v2382_v22 = vpop.f32.mrf.mxu0  ;;  %v2436_v31 = vmul.f32 %v2430_v27, %v5400_v51 }
 0x618   :  { %v2420_v9 = vadd.f32 %v2419_v7, %v2407_v57  ;;  %v2498_v20 = vpop.f32.mrf.mxu3 }
 0x61a   :  { %v3476_v4 = vpop.eup %3475  ;;  %v2432_v48 = vmul.f32 0.5, %v2420_v9 }
 0x61b   :  { %v2437_v17 = vmul.f32 %v3476_v4, %v2426_v23 }
 0x61c   :  { %3477 = vtanh.f32 %v2432_v48 }
 0x61d   :  { %v5513_v24 = vadd.f32 %v2437_v17, %v2436_v31  ;;  %v2408_v43 = vpop.f32.mrf.mxu2  ;;  %3479 = vtanh.f32 %v2508_v41 }
 0x61f   :  { %3481 = vtanh.f32 %v5513_v24  ;;  %v2457_v34 = vpop.f32.mrf.mxu0 }
 0x620   :  { %v2500_v29 = vadd.f32 %v2457_v34, %v294_v0 }
 0x622   :  { %v3478_v18 = vpop.eup %3477  ;;  %v2504_v50 = vmul.f32 0.5, %v2500_v29 }
 0x623   :  { %v2434_v51 = vadd.f32 1.0, %v3478_v18  ;;  %v3480_v62 = vpop.eup %3479 }
 0x624   :  { %3483 = vtanh.f32 %v2504_v50  ;;  %v2510_v15 = vadd.f32 1.0, %v3480_v62 }
 0x625   :  { %v3482_v30 = vpop.eup %3481  ;;  %v2435_v47 = vmul.f32 0.5, %v2434_v51  ;;  %v2483_v49 = vpop.f32.mrf.mxu2 }
 0x626   :  { %v2502_v7 = vadd.f32 %v2483_v49, %v352_v37  ;;  %v2511_v63 = vmul.f32 0.5, %v2510_v15 }
 0x627   :  { %v2440_v61 = vmul.f32 %v3482_v30, %v2435_v47  ;;  %v2459_v46 = vpop.f32.mrf.mxu0 }
 0x628   :  { %3485 = vtanh.f32 %v2502_v7  ;;  %v2517_v3 = vmul.f32 %v2511_v63, %v5411_v38 }
 0x629   :  { %v2523_v39 = vpack.c.bf16 %v2440_v61, %v2440_v61  ;;  %3487 = vtanh.f32 %v2513_v28 }
 0x62a   :  { %v3484_v52 = vpop.eup %3483 }
 0x62b   :  { %v2506_v58 = vadd.f32 1.0, %v3484_v52  ;;  %2545 = vmatmul.bf16.vlgmr.msrb.gmra.mxu1 %v2523_v39  ;;  %2571 = vmatmul.bf16.vlgmr.msrb.gmra.mxu3 %v2523_v39 }
 0x62d   :  { %v2507_v36 = vmul.f32 0.5, %v2506_v58  ;;  %v2485_v60 = vpop.f32.mrf.mxu2 }
 0x62e   :  { %v3486_v54 = vpop.eup %3485 }
 0x62f   :  { %v2518_v21 = vmul.f32 %v3486_v54, %v2507_v36  ;;  %v3488_v13 = vpop.eup %3487 }
 0x630   :  { %v2515_v44 = vadd.f32 1.0, %v3488_v13 }
 0x631   :  { %v2519_v26 = vadd.f32 %v2518_v21, %v2517_v3 }
 0x632   :  { %v2516_v53 = vmul.f32 0.5, %v2515_v44 }
 0x633   :  { %3489 = vtanh.f32 %v2519_v26  ;;  %2659 = vst [vmem:[%s5546_s7] sm:$0xff] %v2519_v26 }
 0x639   :  { %v3490_v2 = vpop.eup %3489 }
 0x63a   :  { %v2521_v8 = vmul.f32 %v3490_v2, %v2516_v53 }
 0x63b   :  { %2597 = vmatmul.bf16.vlgmr.msra.gmra.mxu1 %v2523_v39  ;;  %2623 = vmatmul.bf16.vlgmr.msra.gmra.mxu3 %v2523_v39 }
 0x63c   :  { %v2522_v25 = vpack.c.bf16 %v2521_v8, %v2521_v8  ;;  %2654 = vst [vmem:[%s5547_s6] sm:$0xff] %v2521_v8 }
 0x63e   :  { %2532 = vmatmul.bf16.vlgmr.msrb.gmra.mxu0 %v2522_v25  ;;  %2558 = vmatmul.bf16.vlgmr.msrb.gmra.mxu2 %v2522_v25 }
 0x64e   :  { %2584 = vmatmul.bf16.vlgmr.msra.gmra.mxu0 %v2522_v25  ;;  %2610 = vmatmul.bf16.vlgmr.msra.gmra.mxu2 %v2522_v25 }
 0x6a8   :  { %v2546_v38 = vpop.f32.mrf.mxu1 }
 0x6ae   :  { %v2572_v12 = vpop.f32.mrf.mxu3 }
 0x6b0   :  { %v2548_v6 = vpop.f32.mrf.mxu1 }
 0x6b6   :  { %v2574_v42 = vpop.f32.mrf.mxu3 }
 0x6b8   :  { %v2598_v19 = vpop.f32.mrf.mxu1 }
 0x6bb   :  { %v2533_v55 = vpop.f32.mrf.mxu0 }
 0x6bc   :  { %v2534_v1 = vadd.f32 %v2533_v55, %v6292_v59 }
 0x6be   :  { %v2624_v57 = vpop.f32.mrf.mxu3  ;;  %v2547_v27 = vadd.f32 %v2546_v38, %v2534_v1 }
 0x6c0   :  { %v2600_v22 = vpop.f32.mrf.mxu1  ;;  %v2628_v4 = vmul.f32 0.5, %v2547_v27 }
 0x6c1   :  { %v2559_v9 = vpop.f32.mrf.mxu2 }
 0x6c2   :  { %v2560_v23 = vadd.f32 %v2559_v9, %v6293_v35  ;;  %3491 = vtanh.f32 %v2628_v4 }
 0x6c3   :  { %v2535_v41 = vpop.f32.mrf.mxu0 }
 0x6c4   :  { %v2573_v48 = vadd.f32 %v2572_v12, %v2560_v23 }
 0x6c6   :  { %v2626_v31 = vpop.f32.mrf.mxu3  ;;  %v2632_v17 = vmul.f32 0.5, %v2573_v48 }
 0x6c8   :  { %3493 = vtanh.f32 %v2632_v17  ;;  %v3492_v16 = vpop.eup %3491 }
 0x6c9   :  { %v2561_v20 = vpop.f32.mrf.mxu2  ;;  %v2630_v29 = vadd.f32 1.0, %v3492_v16 }
 0x6cb   :  { %v2585_v43 = vpop.f32.mrf.mxu0  ;;  %v2631_v50 = vmul.f32 0.5, %v2630_v29 }
 0x6cc   :  { %v2586_v5 = vadd.f32 %v2585_v43, %v6294_v33 }
 0x6ce   :  { %v3494_v0 = vpop.eup %3493  ;;  %v2599_v59 = vadd.f32 %v2598_v19, %v2586_v5 }
 0x6cf   :  { %v2634_v34 = vadd.f32 1.0, %v3494_v0 }
 0x6d0   :  { %3495 = vtanh.f32 %v2599_v59 }
 0x6d1   :  { %v2611_v18 = vpop.f32.mrf.mxu2  ;;  %v2635_v32 = vmul.f32 0.5, %v2634_v34 }
 0x6d2   :  { %v2612_v35 = vadd.f32 %v2611_v18, %v4824_v45 }
 0x6d3   :  { %v2587_v40 = vpop.f32.mrf.mxu0  ;;  %v2641_v56 = vmul.f32 %v2635_v32, %v5513_v24 }
 0x6d4   :  { %v2625_v10 = vadd.f32 %v2624_v57, %v2612_v35 }
 0x6d6   :  { %v3496_v51 = vpop.eup %3495  ;;  %v2637_v62 = vmul.f32 0.5, %v2625_v10 }
 0x6d7   :  { %v2642_v30 = vmul.f32 %v3496_v51, %v2631_v50 }
 0x6d8   :  { %3497 = vtanh.f32 %v2637_v62 }
 0x6d9   :  { %v2643_v33 = vadd.f32 %v2642_v30, %v2641_v56  ;;  %v2613_v11 = vpop.f32.mrf.mxu2 }
 0x6db   :  { %3499 = vtanh.f32 %v2643_v33  ;;  %3207 = vst [vmem:[%s5546_s7 + $0x8] sm:$0xff] %v2643_v33 }
 0x6de   :  { %v3498_v14 = vpop.eup %3497 }
 0x6df   :  { %v2639_v37 = vadd.f32 1.0, %v3498_v14 }
 0x6e1   :  { %v3500_v45 = vpop.eup %3499  ;;  %v2640_v47 = vmul.f32 0.5, %v2639_v37 }
 0x6e3   :  { %v2645_v49 = vmul.f32 %v3500_v45, %v2640_v47 }
 0x6e5   :  { %3206 = vst [vmem:[%s5547_s6 + $0x8] sm:$0xff] %v2645_v49 }

</bundles_post_ra>
